<compile_context>
chip_gen: v6e
topology: v6e:2x2x1
jax: 0.10.0
libtpu: 0.0.40
codegen_flags: <defaults>
</compile_context>

<pallas_src>
import jax
import jax.numpy as jnp
from jax.experimental import pallas as pl
from jax.experimental.pallas import tpu as pltpu


def stance_para_kernel(bert_ref, idx_ref, tm_ref, wp_ref, bp_ref, ws_ref, para_ref):
    # bert_ref: (BB, L, D)   f32   raw BERT sequence output for this batch block
    # idx_ref : (BB, ST, 1)  int32 token gather indices (ST = S*T)
    # tm_ref  : (BB, S, T, 1) f32  token mask
    # wp/bp   : att_proj Linear(D, D)   (wp stored in bf16)
    # ws      : att_scorer Linear(D, 1) weight as a (1, D) row (bias dropped)
    # para_ref: (BB, 1, D)   f32   paragraph representations (lane-dense)
    bert = bert_ref[...]                         # (BB, L, D) f32
    BB, L, D = bert.shape
    tm = tm_ref[...]                             # (BB, S, T, 1) f32
    _, S, T, _ = tm.shape
    ST = S * T

    # ---- fused token gather: one-hot (ST, L) @ (L, D) on the MXU -------------
    idx = idx_ref[...]                                            # (BB, ST, 1) int32
    iota_l = jax.lax.broadcasted_iota(jnp.int32, (BB, ST, L), 2)
    onehot = jnp.where(idx == iota_l, 1.0, 0.0).astype(jnp.bfloat16)   # (BB, ST, L)
    x = jnp.einsum('bkl,bld->bkd', onehot, bert.astype(jnp.bfloat16),
                   preferred_element_type=jnp.float32).astype(jnp.bfloat16)
    # x == bert_out[b, indices_by_batch[b, s, t]] exactly (single-term selection)

    # ---- WordAttention --------------------------------------------------------
    proj = jnp.tanh(
        jnp.dot(x.reshape(BB * ST, D), wp_ref[...],
                preferred_element_type=jnp.float32)
        + bp_ref[...])                                            # (BB*ST, D) f32
    scores = jnp.sum(proj.reshape(BB, S, T, D) * ws_ref[...], axis=-1,
                     keepdims=True)                               # (BB, S, T, 1)
    # att_scorer bias omitted: softmax over T is shift invariant.

    valid = tm > 0.5
    neg = jnp.float32(-1e30)
    s_masked = jnp.where(valid, scores, neg)
    m = jnp.max(s_masked, axis=2, keepdims=True)                  # (BB, S, 1, 1)
    # exp() never sees +/-inf; fully masked sentences end up with att = 0,
    # matching torch's NaN -> 0 path.
    p = jnp.where(valid, jnp.exp(s_masked - m), 0.0)              # (BB, S, T, 1)
    denom = jnp.sum(p, axis=2, keepdims=True)
    denom = jnp.where(denom > 0.0, denom, 1.0)
    att = p / denom                                               # (BB, S, T, 1)

    # attention-weighted token sum: bf16 products, f32 accumulation over T
    prod = att.astype(jnp.bfloat16) * x.reshape(BB, S, T, D)      # bf16 VPU
    sent = jnp.sum(prod, axis=2, dtype=jnp.float32)               # (BB, S, D) f32

    # ---- DynamicSentenceAttention ---------------------------------------------
    mask_s = tm[:, :, 0, :]                                       # (BB, S, 1)
    s2 = jnp.where(mask_s > 0.5, jnp.float32(1.0), jnp.float32(-10000.0))
    m2 = jnp.max(s2, axis=1, keepdims=True)                       # (BB, 1, 1)
    e2 = jnp.exp(s2 - m2)
    att2 = e2 / jnp.sum(e2, axis=1, keepdims=True)                # (BB, S, 1)
    para = jnp.sum(att2 * sent, axis=1, keepdims=True)            # (BB, 1, D)

    para_ref[...] = para.astype(para_ref.dtype)


def _choose_block_batch(B, S, T, D, L):
    """Pick the per-grid-step batch block BB and a VMEM limit.

    Accounts for the f32 bert block (double buffered), the in-kernel one-hot /
    bf16 / f32 intermediates, padded mask & index tiles and the double-buffered
    weight blocks.  Generation aware via pltpu.get_tpu_info().
    """
    ST = S * T
    lane = 128
    try:
        vmem_phys = int(pltpu.get_tpu_info().vmem_capacity_bytes)
    except Exception:                            # conservative default
        vmem_phys = 64 << 20
    # v7x: 64 MiB / TC, 2 TCs -> keep >= 4 grid steps so each core still
    # double-buffers; v5e/v6e: 128 MiB, 1 TC -> >= 2 steps is enough.
    min_steps = 4 if vmem_phys <= (64 << 20) else 2
    vmem_limit = min(vmem_phys * 3 // 4, 100 << 20)
    budget = vmem_limit * 11 // 20               # headroom for compiler temps

    d_pad = max(D, lane)
    l_pad = max(L, lane)
    st_pad = -(-ST // 8) * 8
    per_bb = (
        2 * L * d_pad * 4                 # f32 bert block, double buffered
        + L * d_pad * 2                   # in-kernel bf16 copy of the bert block
        + ST * l_pad * (4 + 2)            # one-hot (f32 where + bf16 cast)
        + ST * d_pad * (2 + 4 + 2 + 4)    # x bf16, proj f32, prod bf16, slack
        + S * d_pad * 4                   # sent f32
        + 2 * S * 8 * lane * 4            # (BB,S,T,1) mask block (padded), x2 buf
        + 6 * S * 8 * lane * 4            # small f32 softmax temps in (T,1) tiles
        + 2 * st_pad * lane * 4           # (BB,ST,1) index block (padded), x2 buf
        + 2 * 8 * d_pad * 4               # (BB,1,D) output block, x2 buf
    )
    fixed = 2 * D * d_pad * 2 + 4 * 8 * d_pad * 4   # Wp bf16 x2 buffers + bias rows
    bb_vmem = max(1, (budget - fixed) // per_bb)

    steps_cap = max(1, B // min_steps)    # keep >= min_steps grid iterations
    m_floor = -(-256 // ST)               # BB*S*T >= 256 fills the MXU M dim
    bb = int(min(bb_vmem, max(steps_cap, min(m_floor, B))))
    bb = max(1, min(bb, B))
    while B % bb != 0:
        bb -= 1
    return bb, int(vmem_limit)


def stance_paragraph_classifier(bert_out, batch_indices, indices_by_batch,
                                token_mask, params, stance_label=None):
    """Forward pass of StanceParagraphClassifier (inference path)."""
    Wp, bp, Ws, bs, Wd, bd, Wo, bo = params
    del bs  # cancels inside the token softmax (shift invariance)
    del batch_indices  # TODO(synk): assumed == arange(B) broadcast (see header)

    B, L, D = bert_out.shape
    _, S, T = indices_by_batch.shape
    ST = S * T

    idx = indices_by_batch.astype(jnp.int32).reshape(B, ST, 1)
    tm = token_mask.astype(jnp.float32).reshape(B, S, T, 1)

    BB, vmem_limit = _choose_block_batch(B, S, T, D, L)

    para = pl.pallas_call(
        stance_para_kernel,
        out_shape=jax.ShapeDtypeStruct((B, 1, D), jnp.float32),
        grid=(B // BB,),
        in_specs=[
            pl.BlockSpec((BB, L, D), lambda i: (i, 0, 0)),        # bert_out (f32)
            pl.BlockSpec((BB, ST, 1), lambda i: (i, 0, 0)),       # gather indices
            pl.BlockSpec((BB, S, T, 1), lambda i: (i, 0, 0, 0)),  # token mask
            pl.BlockSpec((D, D), lambda i: (0, 0)),               # Wp (bf16)
            pl.BlockSpec((1, D), lambda i: (0, 0)),               # bp
            pl.BlockSpec((1, D), lambda i: (0, 0)),               # Ws (scorer row)
        ],
        out_specs=pl.BlockSpec((BB, 1, D), lambda i: (i, 0, 0)),
        compiler_params=pltpu.CompilerParams(
            dimension_semantics=("parallel",),
            vmem_limit_bytes=vmem_limit),
    )(bert_out, idx, tm, Wp.astype(jnp.bfloat16), bp, Ws)

    para = para[:, 0, :]                                          # (B, D)

    # ClassificationHead on the whole batch in plain XLA.
    h = jnp.tanh(para @ Wd + bd)
    logits = h @ Wo + bo                                          # (B, 3)

    stance_out = jnp.argmax(logits, axis=-1)
    if stance_label is not None:
        logp = jax.nn.log_softmax(logits, axis=-1)
        stance_loss = -jnp.mean(
            jnp.take_along_axis(logp, stance_label[:, None].astype(jnp.int32), axis=-1))
    else:
        stance_loss = None
    return stance_out, logits, stance_loss


def reference_forward(bert_out, batch_indices, indices_by_batch, token_mask, params):
    """Pure-JAX f32 reference mirroring the PyTorch forward (eval mode)."""
    Wp, bp, Ws, bs, Wd, bd, Wo, bo = params
    bert_tokens = bert_out[batch_indices, indices_by_batch]
    B, S, T, D = bert_tokens.shape
    proj = jnp.tanh(bert_tokens.reshape(-1, D) @ Wp + bp)
    raw = (proj @ Ws.T + bs).reshape(B, S, T)
    mask = token_mask.astype(bool)
    att = jax.nn.softmax(jnp.where(mask, raw, -jnp.inf), axis=-1)
    att = jnp.where(jnp.isnan(att), 0.0, att)
    sent = jnp.einsum('bst,bstd->bsd', att, bert_tokens)
    sm = mask[:, :, 0]
    att2 = jax.nn.softmax(jnp.where(sm, 1.0, -10000.0), axis=-1)
    para = jnp.einsum('bs,bsd->bd', att2, sent)
    h = jnp.tanh(para @ Wd + bd)
    return h @ Wo + bo


def init_params(key, D, n_labels=3):
    ks = jax.random.split(key, 8)
    scale = 0.05
    Wp = jax.random.normal(ks[0], (D, D), jnp.float32) * scale
    bp = jax.random.normal(ks[1], (1, D), jnp.float32) * scale
    Ws = jax.random.normal(ks[2], (1, D), jnp.float32) * scale   # Linear(D,1) row
    bs = jax.random.normal(ks[3], (1, 1), jnp.float32) * scale
    Wd = jax.random.normal(ks[4], (D, D), jnp.float32) * scale
    bd = jax.random.normal(ks[5], (1, D), jnp.float32) * scale
    Wo = jax.random.normal(ks[6], (D, n_labels), jnp.float32) * scale
    bo = jax.random.normal(ks[7], (1, n_labels), jnp.float32) * scale
    return (Wp, bp, Ws, bs, Wd, bd, Wo, bo)


if __name__ == "__main__":
    key = jax.random.PRNGKey(0)
    # batch, bert seq len, bert_dim (lane-aligned), sentences, tokens/sentence
    B, L, D, S, T = 8, 32, 128, 4, 8
    k_out, k_idx, k_mask, k_par = jax.random.split(key, 4)

    bert_out = jax.random.normal(k_out, (B, L, D), jnp.float32)
    batch_indices = jnp.broadcast_to(jnp.arange(B)[:, None, None], (B, S, T))
    indices_by_batch = jax.random.randint(k_idx, (B, S, T), 0, L)
    token_mask = (jax.random.uniform(k_mask, (B, S, T)) > 0.3).astype(jnp.int32)
    token_mask = token_mask.at[:, 0, 0].set(1)        # ensure a valid sentence
    token_mask = token_mask.at[0, S - 1, :].set(0)    # fully-masked sentence (NaN->0 path)

    params = init_params(k_par, D)

    stance_out, logits, stance_loss = stance_paragraph_classifier(
        bert_out, batch_indices, indices_by_batch, token_mask, params)
    logits = jax.block_until_ready(logits)

    ref = reference_forward(bert_out, batch_indices, indices_by_batch, token_mask, params)
    # bf16 gather/matmul operands and bf16 attention products vs the f32
    # reference -> loosened tolerance (errors are O(1e-2) on O(0.3) logits).
    assert jnp.allclose(logits, ref, rtol=4e-2, atol=4e-2), (logits, ref)
    _ = jax.device_get(stance_out).tolist()   # mirrors torch argmax(...).tolist()

    print("KERNEL_OK")
</pallas_src>

<mosaic_0001>
module attributes {stable_mosaic.version = 11 : i64} {
  func.func @stance_para_kernel(%arg0: i32, %arg1: memref<8x32x128xf32, #tpu.memory_space<vmem>>, %arg2: memref<8x32x1xi32, #tpu.memory_space<vmem>>, %arg3: memref<8x4x8x1xf32, #tpu.memory_space<vmem>>, %arg4: memref<128x128xbf16, #tpu.memory_space<vmem>>, %arg5: memref<1x128xf32, #tpu.memory_space<vmem>>, %arg6: memref<1x128xf32, #tpu.memory_space<vmem>>, %arg7: memref<8x1x128xf32, #tpu.memory_space<vmem>>) attributes {dimension_semantics = [#tpu.dimension_semantics<parallel>], iteration_bounds = array<i64: 1>, scalar_prefetch = 0 : i64, scratch_operands = 0 : i64, tpu.core_type = #tpu.core_type<tc>, window_params = [{transform_indices = @transform_0, window_bounds = array<i64: 8, 32, 128>}, {transform_indices = @transform_1, window_bounds = array<i64: 8, 32, 1>}, {transform_indices = @transform_2, window_bounds = array<i64: 8, 4, 8, 1>}, {pipeline_mode = #tpu.pipeline_mode<synchronous>, transform_indices = @transform_3, window_bounds = array<i64: 128, 128>}, {pipeline_mode = #tpu.pipeline_mode<synchronous>, transform_indices = @transform_4, window_bounds = array<i64: 1, 128>}, {pipeline_mode = #tpu.pipeline_mode<synchronous>, transform_indices = @transform_5, window_bounds = array<i64: 1, 128>}, {transform_indices = @transform_6, window_bounds = array<i64: 8, 1, 128>}]} {
    %c0 = arith.constant 0 : index
    %c0_0 = arith.constant 0 : index
    %c0_1 = arith.constant 0 : index
    %0 = vector.load %arg1[%c0, %c0_0, %c0_1] : memref<8x32x128xf32, #tpu.memory_space<vmem>>, vector<8x32x128xf32>
    %c0_2 = arith.constant 0 : index
    %c0_3 = arith.constant 0 : index
    %c0_4 = arith.constant 0 : index
    %c0_5 = arith.constant 0 : index
    %1 = vector.load %arg3[%c0_2, %c0_3, %c0_4, %c0_5] : memref<8x4x8x1xf32, #tpu.memory_space<vmem>>, vector<8x4x8x1xf32>
    %c0_6 = arith.constant 0 : index
    %c0_7 = arith.constant 0 : index
    %c0_8 = arith.constant 0 : index
    %2 = vector.load %arg2[%c0_6, %c0_7, %c0_8] : memref<8x32x1xi32, #tpu.memory_space<vmem>>, vector<8x32x1xi32>
    %3 = tpu.iota {dimensions = array<i32: 2>} : vector<8x32x32xi32>
    %4 = vector.broadcast %2 : vector<8x32x1xi32> to vector<8x32x32xi32>
    %5 = arith.cmpi eq, %4, %3 : vector<8x32x32xi32>
    %cst = arith.constant 1.000000e+00 : f32
    %cst_9 = arith.constant 0.000000e+00 : f32
    %6 = vector.broadcast %cst : f32 to vector<8x32x32xf32>
    %7 = vector.broadcast %cst_9 : f32 to vector<8x32x32xf32>
    %8 = arith.select %5, %6, %7 : vector<8x32x32xi1>, vector<8x32x32xf32>
    %9 = arith.truncf %8 : vector<8x32x32xf32> to vector<8x32x32xbf16>
    %10 = arith.truncf %0 : vector<8x32x128xf32> to vector<8x32x128xbf16>
    "tpu.trace_start"() <{level = 10 : i32, message = "bkl,bld->bkd"}> : () -> ()
    %cst_10 = arith.constant dense<0.000000e+00> : vector<8x32x128xf32>
    %11 = tpu.matmul %9, %10, %cst_10 {dimension_numbers = #tpu.dot_dimension_numbers<[2], [1], [1], [2], [0, 0, 0, 1, 1, 2], [0], [0]>} : vector<8x32x32xbf16>, vector<8x32x128xbf16>, vector<8x32x128xf32> -> vector<8x32x128xf32>
    "tpu.trace_stop"() : () -> ()
    %12 = arith.truncf %11 : vector<8x32x128xf32> to vector<8x32x128xbf16>
    %13 = vector.shape_cast %12 : vector<8x32x128xbf16> to vector<256x128xbf16>
    %c0_11 = arith.constant 0 : index
    %c0_12 = arith.constant 0 : index
    %14 = vector.load %arg4[%c0_11, %c0_12] : memref<128x128xbf16, #tpu.memory_space<vmem>>, vector<128x128xbf16>
    %cst_13 = arith.constant dense<0.000000e+00> : vector<256x128xf32>
    %15 = tpu.matmul %13, %14, %cst_13 {dimension_numbers = #tpu.dot_dimension_numbers<[1], [0], [0], [1], [0, 0, 1, 1], [], []>} : vector<256x128xbf16>, vector<128x128xbf16>, vector<256x128xf32> -> vector<256x128xf32>
    %c0_14 = arith.constant 0 : index
    %c0_15 = arith.constant 0 : index
    %16 = vector.load %arg5[%c0_14, %c0_15] : memref<1x128xf32, #tpu.memory_space<vmem>>, vector<1x128xf32>
    %17 = vector.broadcast %16 : vector<1x128xf32> to vector<256x128xf32>
    %18 = arith.addf %15, %17 : vector<256x128xf32>
    %19 = math.tanh %18 : vector<256x128xf32>
    %20 = vector.shape_cast %19 : vector<256x128xf32> to vector<8x4x8x128xf32>
    %c0_16 = arith.constant 0 : index
    %c0_17 = arith.constant 0 : index
    %21 = vector.load %arg6[%c0_16, %c0_17] : memref<1x128xf32, #tpu.memory_space<vmem>>, vector<1x128xf32>
    %22 = vector.shape_cast %21 : vector<1x128xf32> to vector<1x1x1x128xf32>
    %23 = vector.broadcast %22 : vector<1x1x1x128xf32> to vector<8x4x8x128xf32>
    %24 = arith.mulf %20, %23 : vector<8x4x8x128xf32>
    %cst_18 = arith.constant dense<0.000000e+00> : vector<8x4x8xf32>
    %25 = vector.multi_reduction <add>, %24, %cst_18 [3] : vector<8x4x8x128xf32> to vector<8x4x8xf32>
    %26 = vector.shape_cast %25 : vector<8x4x8xf32> to vector<8x4x8x1xf32>
    %cst_19 = arith.constant 5.000000e-01 : f32
    %27 = vector.broadcast %cst_19 : f32 to vector<8x4x8x1xf32>
    %28 = arith.cmpf ogt, %1, %27 : vector<8x4x8x1xf32>
    %cst_20 = arith.constant -1.000000e+30 : f32
    %29 = vector.broadcast %cst_20 : f32 to vector<8x4x8x1xf32>
    %30 = arith.select %28, %26, %29 : vector<8x4x8x1xi1>, vector<8x4x8x1xf32>
    %cst_21 = arith.constant dense<0xFF800000> : vector<8x4x1xf32>
    %31 = vector.multi_reduction <maximumf>, %30, %cst_21 [2] : vector<8x4x8x1xf32> to vector<8x4x1xf32>
    %32 = vector.shape_cast %31 : vector<8x4x1xf32> to vector<8x4x1x1xf32>
    %33 = vector.broadcast %32 : vector<8x4x1x1xf32> to vector<8x4x8x1xf32>
    %34 = arith.subf %30, %33 : vector<8x4x8x1xf32>
    %35 = math.exp %34 : vector<8x4x8x1xf32>
    %cst_22 = arith.constant 0.000000e+00 : f32
    %36 = vector.broadcast %cst_22 : f32 to vector<8x4x8x1xf32>
    %37 = arith.select %28, %35, %36 : vector<8x4x8x1xi1>, vector<8x4x8x1xf32>
    %cst_23 = arith.constant dense<0.000000e+00> : vector<8x4x1xf32>
    %38 = vector.multi_reduction <add>, %37, %cst_23 [2] : vector<8x4x8x1xf32> to vector<8x4x1xf32>
    %39 = vector.shape_cast %38 : vector<8x4x1xf32> to vector<8x4x1x1xf32>
    %cst_24 = arith.constant 0.000000e+00 : f32
    %40 = vector.broadcast %cst_24 : f32 to vector<8x4x1x1xf32>
    %41 = arith.cmpf ogt, %39, %40 : vector<8x4x1x1xf32>
    %cst_25 = arith.constant 1.000000e+00 : f32
    %42 = vector.broadcast %cst_25 : f32 to vector<8x4x1x1xf32>
    %43 = arith.select %41, %39, %42 : vector<8x4x1x1xi1>, vector<8x4x1x1xf32>
    %44 = vector.broadcast %43 : vector<8x4x1x1xf32> to vector<8x4x8x1xf32>
    %45 = arith.divf %37, %44 : vector<8x4x8x1xf32>
    %46 = arith.truncf %45 : vector<8x4x8x1xf32> to vector<8x4x8x1xbf16>
    %47 = vector.shape_cast %12 : vector<8x32x128xbf16> to vector<8x4x8x128xbf16>
    %48 = vector.broadcast %46 : vector<8x4x8x1xbf16> to vector<8x4x8x128xbf16>
    %49 = arith.mulf %48, %47 : vector<8x4x8x128xbf16>
    %50 = arith.extf %49 : vector<8x4x8x128xbf16> to vector<8x4x8x128xf32>
    %cst_26 = arith.constant dense<0.000000e+00> : vector<8x4x128xf32>
    %51 = vector.multi_reduction <add>, %50, %cst_26 [2] : vector<8x4x8x128xf32> to vector<8x4x128xf32>
    %52 = vector.extract_strided_slice %1 {offsets = [0, 0, 0, 0], sizes = [8, 4, 1, 1], strides = [1, 1, 1, 1]} : vector<8x4x8x1xf32> to vector<8x4x1x1xf32>
    %53 = vector.shape_cast %52 : vector<8x4x1x1xf32> to vector<8x4x1xf32>
    %cst_27 = arith.constant 5.000000e-01 : f32
    %54 = vector.broadcast %cst_27 : f32 to vector<8x4x1xf32>
    %55 = arith.cmpf ogt, %53, %54 : vector<8x4x1xf32>
    %cst_28 = arith.constant 1.000000e+00 : f32
    %cst_29 = arith.constant -1.000000e+04 : f32
    %56 = vector.broadcast %cst_28 : f32 to vector<8x4x1xf32>
    %57 = vector.broadcast %cst_29 : f32 to vector<8x4x1xf32>
    %58 = arith.select %55, %56, %57 : vector<8x4x1xi1>, vector<8x4x1xf32>
    %cst_30 = arith.constant dense<0xFF800000> : vector<8x1xf32>
    %59 = vector.multi_reduction <maximumf>, %58, %cst_30 [1] : vector<8x4x1xf32> to vector<8x1xf32>
    %60 = vector.shape_cast %59 : vector<8x1xf32> to vector<8x1x1xf32>
    %61 = vector.broadcast %60 : vector<8x1x1xf32> to vector<8x4x1xf32>
    %62 = arith.subf %58, %61 : vector<8x4x1xf32>
    %63 = math.exp %62 : vector<8x4x1xf32>
    %cst_31 = arith.constant dense<0.000000e+00> : vector<8x1xf32>
    %64 = vector.multi_reduction <add>, %63, %cst_31 [1] : vector<8x4x1xf32> to vector<8x1xf32>
    %65 = vector.shape_cast %64 : vector<8x1xf32> to vector<8x1x1xf32>
    %66 = vector.broadcast %65 : vector<8x1x1xf32> to vector<8x4x1xf32>
    %67 = arith.divf %63, %66 : vector<8x4x1xf32>
    %68 = vector.broadcast %67 : vector<8x4x1xf32> to vector<8x4x128xf32>
    %69 = arith.mulf %68, %51 : vector<8x4x128xf32>
    %cst_32 = arith.constant dense<0.000000e+00> : vector<8x128xf32>
    %70 = vector.multi_reduction <add>, %69, %cst_32 [1] : vector<8x4x128xf32> to vector<8x128xf32>
    %71 = vector.shape_cast %70 : vector<8x128xf32> to vector<8x1x128xf32>
    %c0_33 = arith.constant 0 : index
    %c0_34 = arith.constant 0 : index
    %c0_35 = arith.constant 0 : index
    %72 = vector.load %arg7[%c0_33, %c0_34, %c0_35] : memref<8x1x128xf32, #tpu.memory_space<vmem>>, vector<8x1x128xf32>
    tpu.vector_store %arg7[%c0_33, %c0_34, %c0_35], %71 {strides = array<i32>} : memref<8x1x128xf32, #tpu.memory_space<vmem>>, vector<8x1x128xf32>,
    return
  }
  func.func @transform_0(%arg0: i32) -> (i32, i32, i32) {
    %c0_i32 = arith.constant 0 : i32
    %c0_i32_0 = arith.constant 0 : i32
    %c0_i32_1 = arith.constant 0 : i32
    return %arg0, %c0_i32, %c0_i32_0 : i32, i32, i32
  }
  func.func @transform_1(%arg0: i32) -> (i32, i32, i32) {
    %c0_i32 = arith.constant 0 : i32
    %c0_i32_0 = arith.constant 0 : i32
    %c0_i32_1 = arith.constant 0 : i32
    return %arg0, %c0_i32, %c0_i32_0 : i32, i32, i32
  }
  func.func @transform_2(%arg0: i32) -> (i32, i32, i32, i32) {
    %c0_i32 = arith.constant 0 : i32
    %c0_i32_0 = arith.constant 0 : i32
    %c0_i32_1 = arith.constant 0 : i32
    %c0_i32_2 = arith.constant 0 : i32
    return %arg0, %c0_i32, %c0_i32_0, %c0_i32_1 : i32, i32, i32, i32
  }
  func.func @transform_3(%arg0: i32) -> (i32, i32) {
    %c0_i32 = arith.constant 0 : i32
    %c0_i32_0 = arith.constant 0 : i32
    %c0_i32_1 = arith.constant 0 : i32
    return %c0_i32, %c0_i32_0 : i32, i32
  }
  func.func @transform_4(%arg0: i32) -> (i32, i32) {
    %c0_i32 = arith.constant 0 : i32
    %c0_i32_0 = arith.constant 0 : i32
    %c0_i32_1 = arith.constant 0 : i32
    return %c0_i32, %c0_i32_0 : i32, i32
  }
  func.func @transform_5(%arg0: i32) -> (i32, i32) {
    %c0_i32 = arith.constant 0 : i32
    %c0_i32_0 = arith.constant 0 : i32
    %c0_i32_1 = arith.constant 0 : i32
    return %c0_i32, %c0_i32_0 : i32, i32
  }
  func.func @transform_6(%arg0: i32) -> (i32, i32, i32) {
    %c0_i32 = arith.constant 0 : i32
    %c0_i32_0 = arith.constant 0 : i32
    %c0_i32_1 = arith.constant 0 : i32
    return %arg0, %c0_i32, %c0_i32_0 : i32, i32, i32
  }
}

</mosaic_0001>

<bundles_post_ra>
// kernel: tpu_custom_call.1
= control target key start
LH: loop header
LB: loop body
LE: loop exit
PB: predicated region body
PF: predicated region fallthrough
CT: control target
= control target key end

     0   :  { %v3850_v2 = vmov 0   ;;  %s5801_s0 = inlined_call_operand.vmem [shape: f32[8,32,128], index: 0, kind: input, shape index: {}]   ;;  %s5802_s1 = inlined_call_operand.vmem [shape: s32[8,32,1], index: 1, kind: input, shape index: {}]   ;;  %s5803_s2 = inlined_call_operand.vmem [shape: f32[8,4,8,1], index: 2, kind: input, shape index: {}]   ;;  %s5804_s3 = inlined_call_operand.vmem [shape: bf16[128,128], index: 3, kind: input, shape index: {}]   ;;  %s5805_s4 = inlined_call_operand.vmem [shape: f32[1,128], index: 4, kind: input, shape index: {}]   ;;  %s5806_s5 = inlined_call_operand.vmem [shape: f32[1,128], index: 5, kind: input, shape index: {}]   ;;  %s5807_s6 = inlined_call_operand.hbm [shape: f32[8,1,128], index: 6, kind: output, shape index: {}]  }
   0x1   :  { %v91_v0 = vld [vmem:[%s5802_s1 + $0x10] sm:$0xff]  ;;  %v89_v1 = vld [vmem:[%s5802_s1] sm:$0xff]  ;;  %3547 = vset.pattern.permute.xlu1 %v3850_v2  ;;  %3546 = vset.pattern.permute.xlu0 %v3850_v2  ;;  %v92_v3 = vld [vmem:[%s5802_s1 + $0x18] sm:$0xff] }
   0x2   :  { %130 = vperm.xlu1 %3547, %v91_v0   ;;  %124 = vperm.xlu0 %3546, %v89_v1   ;;  %v90_v4 = vld [vmem:[%s5802_s1 + $0x8] sm:$0xff]  ;;  %v93_v6 = vld [vmem:[%s5802_s1 + $0x20] sm:$0xff]  ;;  %v27_v9 = vld [vmem:[%s5801_s0 + $0x10] sm:$0xff] }
   0x3   :  { %v94_v5 = vld [vmem:[%s5802_s1 + $0x28] sm:$0xff]  ;;  %v97_v8 = vld [vmem:[%s5802_s1 + $0x40] sm:$0xff]  ;;  %v28_v10 = vld [vmem:[%s5801_s0 + $0x18] sm:$0xff] }
   0x4   :  { %v98_v7 = vld [vmem:[%s5802_s1 + $0x48] sm:$0xff]  ;;  %v25_v11 = vld [vmem:[%s5801_s0] sm:$0xff]  ;;  %v300_v13 = vpack.c.bf16 %v28_v10, %v27_v9  ;;  %v31_v14 = vld [vmem:[%s5801_s0 + $0x30] sm:$0xff] }
   0x5   :  { %v26_v12 = vld [vmem:[%s5801_s0 + $0x8] sm:$0xff]  ;;  %v32_v15 = vld [vmem:[%s5801_s0 + $0x38] sm:$0xff]  ;;  %v29_v16 = vld [vmem:[%s5801_s0 + $0x20] sm:$0xff] }
   0x6   :  { %133 = vperm.xlu1 %3547, %v92_v3   ;;  %127 = vperm.xlu0 %3546, %v90_v4   ;;  %v299_v17 = vpack.c.bf16 %v26_v12, %v25_v11  ;;  %v302_v18 = vpack.c.bf16 %v32_v15, %v31_v14  ;;  %v30_v19 = vld [vmem:[%s5801_s0 + $0x28] sm:$0xff]  ;;  %v35_v20 = vld [vmem:[%s5801_s0 + $0x50] sm:$0xff]  ;;  %v36_v21 = vld [vmem:[%s5801_s0 + $0x58] sm:$0xff] }
   0x7   :  { %v301_v22 = vpack.c.bf16 %v30_v19, %v29_v16  ;;  %v96_v23 = vld [vmem:[%s5802_s1 + $0x38] sm:$0xff]  ;;  %v95_v24 = vld [vmem:[%s5802_s1 + $0x30] sm:$0xff]  ;;  %3412 = vmatprep.subr.bf16.mxu0 %v300_v13  ;;  %v3957_v27 = vpack.c.bf16 %v36_v21, %v35_v20 }
   0x8   :  { %3420 = vmatprep.subr.bf16.mxu1 %v302_v18  ;;  %3413 = vmatpush3.bf16.msra.mxu0 %v300_v13  ;;  %v100_v25 = vld [vmem:[%s5802_s1 + $0x58] sm:$0xff]  ;;  %v99_v26 = vld [vmem:[%s5802_s1 + $0x50] sm:$0xff] }
   0x9   :  { %3421 = vmatpush3.bf16.msra.mxu1 %v302_v18  ;;  %3414 = vmatprep.subr.bf16.mxu0 %v299_v17 }
   0xa   :  { %139 = vperm.xlu1 %3547, %v94_v5   ;;  %136 = vperm.xlu0 %3546, %v93_v6  }
   0xb   :  { %3422 = vmatprep.subr.bf16.mxu1 %v301_v22 }
   0xc   :  { %3415 = vmatpush3.bf16.msra.mxu0 %v299_v17 }
   0xd   :  { %3423 = vmatpush3.bf16.msra.mxu1 %v301_v22 }
   0xe   :  { %151 = vperm.xlu1 %3547, %v98_v7   ;;  %148 = vperm.xlu0 %3546, %v97_v8  }
  0x12   :  { %145 = vperm.xlu1 %3547, %v96_v23   ;;  %142 = vperm.xlu0 %3546, %v95_v24  }
  0x13   :  { %11 = vsyncpa [#allocation3], 0  ;;  %3428 = vmatprep.subr.bf16.mxu0 %v3957_v27  ;;  %v102_v28 = vld [vmem:[%s5802_s1 + $0x68] sm:$0xff]  ;;  %v101_v29 = vld [vmem:[%s5802_s1 + $0x60] sm:$0xff]  ;;  %v121_v51 = vlaneseq  ;;  %vm315_vm4 = vcmask 261120   ;;  %v3851_v59 = vmov 0.0  }
  0x14   :  { %v39_v30 = vld [vmem:[%s5801_s0 + $0x70] sm:$0xff]  ;;  %v40_v31 = vld [vmem:[%s5801_s0 + $0x78] sm:$0xff]  ;;  %v106_v33 = vld [vmem:[%s5802_s1 + $0x88] sm:$0xff] }
  0x15   :  { %v3972_v32 = vpack.c.bf16 %v40_v31, %v39_v30  ;;  %v105_v34 = vld [vmem:[%s5802_s1 + $0x80] sm:$0xff]  ;;  %v104_v35 = vld [vmem:[%s5802_s1 + $0x78] sm:$0xff]  ;;  %v103_v36 = vld [vmem:[%s5802_s1 + $0x70] sm:$0xff]  ;;  %v4030_v52 = vand.u32 127, %v121_v51 }
  0x16   :  { %157 = vperm.xlu1 %3547, %v100_v25   ;;  %154 = vperm.xlu0 %3546, %v99_v26   ;;  %v108_v37 = vld [vmem:[%s5802_s1 + $0x98] sm:$0xff]  ;;  %v107_v38 = vld [vmem:[%s5802_s1 + $0x90] sm:$0xff]  ;;  %v110_v39 = vld [vmem:[%s5802_s1 + $0xa8] sm:$0xff] }
  0x17   :  { %3436 = vmatprep.subr.bf16.mxu1 %v3972_v32  ;;  %v109_v40 = vld [vmem:[%s5802_s1 + $0xa0] sm:$0xff]  ;;  %v112_v41 = vld [vmem:[%s5802_s1 + $0xb8] sm:$0xff]  ;;  %v111_v42 = vld [vmem:[%s5802_s1 + $0xb0] sm:$0xff] }
  0x18   :  { %v114_v43 = vld [vmem:[%s5802_s1 + $0xc8] sm:$0xff]  ;;  %v113_v44 = vld [vmem:[%s5802_s1 + $0xc0] sm:$0xff]  ;;  %v116_v45 = vld [vmem:[%s5802_s1 + $0xd8] sm:$0xff] }
  0x19   :  { %v115_v46 = vld [vmem:[%s5802_s1 + $0xd0] sm:$0xff]  ;;  %v118_v47 = vld [vmem:[%s5802_s1 + $0xe8] sm:$0xff]  ;;  %v117_v48 = vld [vmem:[%s5802_s1 + $0xe0] sm:$0xff] }
  0x1a   :  { %163 = vperm.xlu1 %3547, %v102_v28   ;;  %160 = vperm.xlu0 %3546, %v101_v29   ;;  %v120_v49 = vld [vmem:[%s5802_s1 + $0xf8] sm:$0xff]  ;;  %v119_v50 = vld [vmem:[%s5802_s1 + $0xf0] sm:$0xff]  ;;  %v33_v57 = vld [vmem:[%s5801_s0 + $0x40] sm:$0xff] }
  0x1b   :  { %v34_v58 = vld [vmem:[%s5801_s0 + $0x48] sm:$0xff]  ;;  %v43_v5 = vld [vmem:[%s5801_s0 + $0x90] sm:$0xff]  ;;  %v44_v6 = vld [vmem:[%s5801_s0 + $0x98] sm:$0xff] }
  0x1c   :  { %v303_v4 = vpack.c.bf16 %v34_v58, %v33_v57  ;;  %v308_v12 = vpack.c.bf16 %v44_v6, %v43_v5  ;;  %v37_v18 = vld [vmem:[%s5801_s0 + $0x60] sm:$0xff]  ;;  %v38_v19 = vld [vmem:[%s5801_s0 + $0x68] sm:$0xff]  ;;  %v47_v28 = vld [vmem:[%s5801_s0 + $0xb0] sm:$0xff] }
  0x1d   :  { %v305_v23 = vpack.c.bf16 %v38_v19, %v37_v18  ;;  %v41_v24 = vld [vmem:[%s5801_s0 + $0x80] sm:$0xff]  ;;  %v48_v29 = vld [vmem:[%s5801_s0 + $0xb8] sm:$0xff] }
  0x1e   :  { %175 = vperm.xlu1 %3547, %v106_v33   ;;  %172 = vperm.xlu0 %3546, %v105_v34   ;;  %v49_v58 = vld [vmem:[%s5801_s0 + $0xc0] sm:$0xff] }
  0x22   :  { %169 = vperm.xlu1 %3547, %v104_v35   ;;  %166 = vperm.xlu0 %3546, %v103_v36   ;;  %v310_v35 = vpack.c.bf16 %v48_v29, %v47_v28 }
  0x26   :  { %181 = vperm.xlu1 %3547, %v108_v37   ;;  %178 = vperm.xlu0 %3546, %v107_v38   ;;  %v51_v38 = vld [vmem:[%s5801_s0 + $0xd0] sm:$0xff] }
  0x2a   :  { %187 = vperm.xlu1 %3547, %v110_v39   ;;  %184 = vperm.xlu0 %3546, %v109_v40   ;;  %v52_v39 = vld [vmem:[%s5801_s0 + $0xd8] sm:$0xff] }
  0x2e   :  { %193 = vperm.xlu1 %3547, %v112_v41   ;;  %190 = vperm.xlu0 %3546, %v111_v42   ;;  %v312_v42 = vpack.c.bf16 %v52_v39, %v51_v38 }
  0x32   :  { %199 = vperm.xlu1 %3547, %v114_v43   ;;  %196 = vperm.xlu0 %3546, %v113_v44  }
  0x36   :  { %205 = vperm.xlu1 %3547, %v116_v45   ;;  %202 = vperm.xlu0 %3546, %v115_v46  }
  0x3a   :  { %211 = vperm.xlu1 %3547, %v118_v47   ;;  %208 = vperm.xlu0 %3546, %v117_v48  }
  0x3e   :  { %217 = vperm.xlu1 %3547, %v120_v49   ;;  %214 = vperm.xlu0 %3546, %v119_v50   ;;  %v45_v50 = vld [vmem:[%s5801_s0 + $0xa0] sm:$0xff] }
  0x7d   :  { %v131_v53 = vpop.permute.xlu1 %130  ;;  %v125_v54 = vpop.permute.xlu0 %124 }
  0x7e   :  { %vm221_vm0 = vcmp.eq.s32.totalorder %v131_v53, %v4030_v52  ;;  %vm219_vm1 = vcmp.eq.s32.totalorder %v125_v54, %v4030_v52  ;;  %v46_v53 = vld [vmem:[%s5801_s0 + $0xa8] sm:$0xff] }
  0x7f   :  { %v253_v60 = vsel %vm221_vm0, 1.0, %v3851_v59  ;;  %v251_v62 = vsel %vm219_vm1, 1.0, %v3851_v59  ;;  %v309_v57 = vpack.c.bf16 %v46_v53, %v45_v50 }
  0x81   :  { %v134_v55 = vpop.permute.xlu1 %133  ;;  %v128_v56 = vpop.permute.xlu0 %127 }
  0x82   :  { %vm222_vm2 = vcmp.eq.s32.totalorder %v134_v55, %v4030_v52  ;;  %vm220_vm3 = vcmp.eq.s32.totalorder %v128_v56, %v4030_v52 }
  0x83   :  { %v254_v61 = vsel %vm222_vm2, 1.0, %v3851_v59  ;;  %v252_v63 = vsel %vm220_vm3, 1.0, %v3851_v59 }
  0x84   :  { %v284_v0 = vpack.c.bf16 %v254_v61, %v253_v60  ;;  %v283_v1 = vpack.c.bf16 %v252_v63, %v251_v62  ;;  %v50_v62 = vld [vmem:[%s5801_s0 + $0xc8] sm:$0xff]  ;;  %v55_v63 = vld [vmem:[%s5801_s0 + $0xf0] sm:$0xff] }
  0x85   :  { %v140_v2 = vpop.permute.xlu1 %139  ;;  %v137_v3 = vpop.permute.xlu0 %136 }
  0x86   :  { %vm224_vm5 = vcmp.eq.s32.totalorder %v140_v2, %v4030_v52  ;;  %vm223_vm6 = vcmp.eq.s32.totalorder %v137_v3, %v4030_v52  ;;  %3416 = vmatprep.mubr.msk.bf16.mxu0 %vm315_vm4, %v283_v1 }
  0x87   :  { %3417 = vmatmul.mubr.msk.bf16.vlgmr.msra.gmra.mxu0 %vm315_vm4, %v284_v0  ;;  %v255_v7 = vsel %vm223_vm6, 1.0, %v3851_v59  ;;  %v256_v8 = vsel %vm224_vm5, 1.0, %v3851_v59  ;;  %v56_v0 = vld [vmem:[%s5801_s0 + $0xf8] sm:$0xff] }
  0x88   :  { %v285_v9 = vpack.c.bf16 %v256_v8, %v255_v7  ;;  %3429 = vmatpush3.bf16.msra.mxu0 %v3957_v27  ;;  %v42_v27 = vld [vmem:[%s5801_s0 + $0x88] sm:$0xff]  ;;  %v314_v5 = vpack.c.bf16 %v56_v0, %v55_v63 }
  0x89   :  { %v152_v10 = vpop.permute.xlu1 %151  ;;  %v149_v11 = vpop.permute.xlu0 %148  ;;  %3430 = vmatprep.subr.bf16.mxu0 %v303_v4  ;;  %v307_v34 = vpack.c.bf16 %v42_v27, %v41_v24 }
  0x8a   :  { %vm228_vm7 = vcmp.eq.s32.totalorder %v152_v10, %v4030_v52  ;;  %vm227_vm8 = vcmp.eq.s32.totalorder %v149_v11, %v4030_v52  ;;  %3424 = vmatprep.mubr.msk.bf16.mxu1 %vm315_vm4, %v285_v9  ;;  %v3548_v11 = vld [vmem:[%s5804_s3 + $0x38] sm:$0xff]  }
  0x8b   :  { %v260_v13 = vsel %vm228_vm7, 1.0, %v3851_v59  ;;  %v259_v14 = vsel %vm227_vm8, 1.0, %v3851_v59 }
  0x8c   :  { %v287_v15 = vpack.c.bf16 %v260_v13, %v259_v14  ;;  %3431 = vmatpush3.bf16.msra.mxu0 %v303_v4  ;;  %v311_v4 = vpack.c.bf16 %v50_v62, %v49_v58  ;;  %v53_v14 = vld [vmem:[%s5801_s0 + $0xe0] sm:$0xff] }
  0x8d   :  { %v146_v16 = vpop.permute.xlu1 %145  ;;  %v143_v17 = vpop.permute.xlu0 %142  ;;  %3444 = vmatprep.subr.bf16.mxu0 %v308_v12 }
  0x8e   :  { %vm226_vm9 = vcmp.eq.s32.totalorder %v146_v16, %v4030_v52  ;;  %vm225_vm10 = vcmp.eq.s32.totalorder %v143_v17, %v4030_v52  ;;  %3432 = vmatprep.mubr.msk.bf16.mxu0 %vm315_vm4, %v287_v15  ;;  %v54_v15 = vld [vmem:[%s5801_s0 + $0xe8] sm:$0xff] }
  0x8f   :  { %v258_v20 = vsel %vm226_vm9, 1.0, %v3851_v59  ;;  %v257_v21 = vsel %vm225_vm10, 1.0, %v3851_v59  ;;  %v313_v19 = vpack.c.bf16 %v54_v15, %v53_v14 }
  0x90   :  { %v286_v22 = vpack.c.bf16 %v258_v20, %v257_v21 }
  0x91   :  { %v158_v25 = vpop.permute.xlu1 %157  ;;  %v155_v26 = vpop.permute.xlu0 %154 }
  0x92   :  { %vm230_vm11 = vcmp.eq.s32.totalorder %v158_v25, %v4030_v52  ;;  %vm229_vm12 = vcmp.eq.s32.totalorder %v155_v26, %v4030_v52  ;;  %3425 = vmatmul.mubr.msk.bf16.vlgmr.msra.gmra.mxu1 %vm315_vm4, %v286_v22 }
  0x93   :  { %v262_v30 = vsel %vm230_vm11, 1.0, %v3851_v59  ;;  %v261_v31 = vsel %vm229_vm12, 1.0, %v3851_v59  ;;  %3437 = vmatpush3.bf16.msra.mxu1 %v3972_v32 }
  0x94   :  { %v288_v33 = vpack.c.bf16 %v262_v30, %v261_v31  ;;  %3438 = vmatprep.subr.bf16.mxu1 %v305_v23  ;;  %v3549_v30 = vld [vmem:[%s5804_s3 + $0x30] sm:$0xff]  }
  0x95   :  { %v164_v36 = vpop.permute.xlu1 %163  ;;  %v161_v37 = vpop.permute.xlu0 %160 }
  0x96   :  { %vm232_vm13 = vcmp.eq.s32.totalorder %v164_v36, %v4030_v52  ;;  %vm231_vm14 = vcmp.eq.s32.totalorder %v161_v37, %v4030_v52  ;;  %3433 = vmatmul.mubr.msk.bf16.vlgmr.msra.gmra.mxu0 %vm315_vm4, %v288_v33  ;;  %v3550_v37 = vld [vmem:[%s5804_s3 + $0x28] sm:$0xff]  }
  0x97   :  { %v264_v32 = vsel %vm232_vm13, 1.0, %v3851_v59  ;;  %v263_v40 = vsel %vm231_vm14, 1.0, %v3851_v59  ;;  %3445 = vmatpush3.bf16.msra.mxu0 %v308_v12  ;;  %3439 = vmatpush3.bf16.msra.mxu1 %v305_v23 }
  0x98   :  { %v289_v41 = vpack.c.bf16 %v264_v32, %v263_v40  ;;  %3446 = vmatprep.subr.bf16.mxu0 %v307_v34  ;;  %3452 = vmatprep.subr.bf16.mxu1 %v310_v35 }
  0x99   :  { %v176_v43 = vpop.permute.xlu1 %175  ;;  %v173_v44 = vpop.permute.xlu0 %172 }
  0x9a   :  { %vm236_vm15 = vcmp.eq.s32.totalorder %v176_v43, %v4030_v52  ;;  %vm235_vm0 = vcmp.eq.s32.totalorder %v173_v44, %v4030_v52  ;;  %3440 = vmatprep.mubr.msk.bf16.mxu1 %vm315_vm4, %v289_v41  ;;  %v3554_v43 = vld [vmem:[%s5804_s3 + $0x8] sm:$0xff]   ;;  %v3555_v44 = vld [vmem:[%s5804_s3] sm:$0xff]  }
  0x9b   :  { %v268_v45 = vsel %vm236_vm15, 1.0, %v3851_v59  ;;  %v267_v46 = vsel %vm235_vm0, 1.0, %v3851_v59  ;;  %3447 = vmatpush3.bf16.msra.mxu0 %v307_v34 }
  0x9c   :  { %v291_v47 = vpack.c.bf16 %v268_v45, %v267_v46  ;;  %3460 = vmatprep.subr.bf16.mxu0 %v312_v42 }
  0x9d   :  { %v170_v48 = vpop.permute.xlu1 %169  ;;  %v167_v49 = vpop.permute.xlu0 %166 }
  0x9e   :  { %vm234_vm1 = vcmp.eq.s32.totalorder %v170_v48, %v4030_v52  ;;  %vm233_vm2 = vcmp.eq.s32.totalorder %v167_v49, %v4030_v52  ;;  %3448 = vmatprep.mubr.msk.bf16.mxu0 %vm315_vm4, %v291_v47 }
  0x9f   :  { %v266_v54 = vsel %vm234_vm1, 1.0, %v3851_v59  ;;  %v265_v55 = vsel %vm233_vm2, 1.0, %v3851_v59 }
  0xa0   :  { %v290_v56 = vpack.c.bf16 %v266_v54, %v265_v55 }
  0xa1   :  { %v182_v60 = vpop.permute.xlu1 %181  ;;  %v179_v61 = vpop.permute.xlu0 %178 }
  0xa2   :  { %vm238_vm3 = vcmp.eq.s32.totalorder %v182_v60, %v4030_v52  ;;  %vm237_vm5 = vcmp.eq.s32.totalorder %v179_v61, %v4030_v52  ;;  %3441 = vmatmul.mubr.msk.bf16.vlgmr.msra.gmra.mxu1 %vm315_vm4, %v290_v56 }
  0xa3   :  { %v270_v1 = vsel %vm238_vm3, 1.0, %v3851_v59  ;;  %v269_v2 = vsel %vm237_vm5, 1.0, %v3851_v59  ;;  %3453 = vmatpush3.bf16.msra.mxu1 %v310_v35  ;;  %vm2500_vm3 = vcmask 0  }
  0xa4   :  { %v292_v3 = vpack.c.bf16 %v270_v1, %v269_v2  ;;  %3454 = vmatprep.subr.bf16.mxu1 %v309_v57 }
  0xa5   :  { %v188_v6 = vpop.permute.xlu1 %187  ;;  %v185_v7 = vpop.permute.xlu0 %184 }
  0xa6   :  { %vm240_vm6 = vcmp.eq.s32.totalorder %v188_v6, %v4030_v52  ;;  %vm239_vm7 = vcmp.eq.s32.totalorder %v185_v7, %v4030_v52  ;;  %3449 = vmatmul.mubr.msk.bf16.vlgmr.msra.gmra.mxu0 %vm315_vm4, %v292_v3 }
  0xa7   :  { %v272_v8 = vsel %vm240_vm6, 1.0, %v3851_v59  ;;  %v271_v9 = vsel %vm239_vm7, 1.0, %v3851_v59  ;;  %3455 = vmatpush3.bf16.msra.mxu1 %v309_v57  ;;  %3461 = vmatpush3.bf16.msra.mxu0 %v312_v42  ;;  %v3551_v42 = vld [vmem:[%s5804_s3 + $0x20] sm:$0xff]  }
  0xa8   :  { %v293_v10 = vpack.c.bf16 %v272_v8, %v271_v9  ;;  %3462 = vmatprep.subr.bf16.mxu0 %v311_v4  ;;  %3468 = vmatprep.subr.bf16.mxu1 %v314_v5 }
  0xa9   :  { %v194_v12 = vpop.permute.xlu1 %193  ;;  %v191_v13 = vpop.permute.xlu0 %190 }
  0xaa   :  { %vm242_vm8 = vcmp.eq.s32.totalorder %v194_v12, %v4030_v52  ;;  %vm241_vm9 = vcmp.eq.s32.totalorder %v191_v13, %v4030_v52  ;;  %3456 = vmatprep.mubr.msk.bf16.mxu1 %vm315_vm4, %v293_v10 }
  0xab   :  { %v274_v16 = vsel %vm242_vm8, 1.0, %v3851_v59  ;;  %v273_v17 = vsel %vm241_vm9, 1.0, %v3851_v59  ;;  %3463 = vmatpush3.bf16.msra.mxu0 %v311_v4 }
  0xac   :  { %v294_v18 = vpack.c.bf16 %v274_v16, %v273_v17  ;;  %3476 = vmatprep.subr.bf16.mxu0 %v3548_v11 }
  0xad   :  { %v200_v20 = vpop.permute.xlu1 %199  ;;  %v197_v21 = vpop.permute.xlu0 %196 }
  0xae   :  { %vm244_vm10 = vcmp.eq.s32.totalorder %v200_v20, %v4030_v52  ;;  %vm243_vm11 = vcmp.eq.s32.totalorder %v197_v21, %v4030_v52  ;;  %3457 = vmatmul.mubr.msk.bf16.vlgmr.msra.gmra.mxu1 %vm315_vm4, %v294_v18 }
  0xaf   :  { %v276_v22 = vsel %vm244_vm10, 1.0, %v3851_v59  ;;  %v275_v23 = vsel %vm243_vm11, 1.0, %v3851_v59  ;;  %3469 = vmatpush3.bf16.msra.mxu1 %v314_v5 }
  0xb0   :  { %v295_v24 = vpack.c.bf16 %v276_v22, %v275_v23  ;;  %3470 = vmatprep.subr.bf16.mxu1 %v313_v19 }
  0xb1   :  { %v206_v25 = vpop.permute.xlu1 %205  ;;  %v203_v26 = vpop.permute.xlu0 %202 }
  0xb2   :  { %vm246_vm12 = vcmp.eq.s32.totalorder %v206_v25, %v4030_v52  ;;  %vm245_vm13 = vcmp.eq.s32.totalorder %v203_v26, %v4030_v52  ;;  %3464 = vmatprep.mubr.msk.bf16.mxu0 %vm315_vm4, %v295_v24 }
  0xb3   :  { %v278_v27 = vsel %vm246_vm12, 1.0, %v3851_v59  ;;  %v277_v28 = vsel %vm245_vm13, 1.0, %v3851_v59  ;;  %3471 = vmatpush3.bf16.msra.mxu1 %v313_v19 }
  0xb4   :  { %v296_v29 = vpack.c.bf16 %v278_v27, %v277_v28  ;;  %3524 = vmatprep.subr.bf16.mxu1 %v3548_v11 }
  0xb5   :  { %v212_v31 = vpop.permute.xlu1 %211  ;;  %v209_v33 = vpop.permute.xlu0 %208 }
  0xb6   :  { %vm248_vm14 = vcmp.eq.s32.totalorder %v212_v31, %v4030_v52  ;;  %vm247_vm15 = vcmp.eq.s32.totalorder %v209_v33, %v4030_v52  ;;  %3465 = vmatmul.mubr.msk.bf16.vlgmr.msra.gmra.mxu0 %vm315_vm4, %v296_v29  ;;  %v4297_v33 = vld [vmem:[%s5803_s2] sm:$0xff] }
  0xb7   :  { %v280_v34 = vsel %vm248_vm14, 1.0, %v3851_v59  ;;  %v279_v35 = vsel %vm247_vm15, 1.0, %v3851_v59  ;;  %3477 = vmatpush3.bf16.msra.mxu0 %v3548_v11 }
  0xb8   :  { %v297_v36 = vpack.c.bf16 %v280_v34, %v279_v35  ;;  %3478 = vmatprep.subr.bf16.mxu0 %v3549_v30  ;;  %v4302_v34 = vld [vmem:[%s5803_s2 + $0x8] sm:$0xff]  ;;  %v4309_v35 = vld [vmem:[%s5803_s2 + $0x10] sm:$0xff] }
  0xb9   :  { %v218_v38 = vpop.permute.xlu1 %217  ;;  %v215_v39 = vpop.permute.xlu0 %214  ;;  %vm1140_vm2 = vcmp.gt.f32.partialorder %v4302_v34, 0.5  ;;  %vm1141_vm5 = vcmp.gt.f32.partialorder %v4309_v35, 0.5 }
  0xba   :  { %vm250_vm0 = vcmp.eq.s32.totalorder %v218_v38, %v4030_v52  ;;  %vm249_vm1 = vcmp.eq.s32.totalorder %v215_v39, %v4030_v52  ;;  %3472 = vmatprep.mubr.msk.bf16.mxu1 %vm315_vm4, %v297_v36  ;;  %v3552_v52 = vld [vmem:[%s5804_s3 + $0x18] sm:$0xff]   ;;  %v5810_v36 = vmov -10000.0   ;;  %v4324_v39 = vld [vmem:[%s5803_s2 + $0x20] sm:$0xff] }
  0xbb   :  { %v282_v32 = vsel %vm250_vm0, 1.0, %v3851_v59  ;;  %v281_v40 = vsel %vm249_vm1, 1.0, %v3851_v59  ;;  %3479 = vmatpush3.bf16.msra.mxu0 %v3549_v30  ;;  %v3553_v59 = vld [vmem:[%s5804_s3 + $0x10] sm:$0xff]   ;;  %v4319_v38 = vsel %vm1140_vm2, 1.0, %v5810_v36  ;;  %5973 = vst [vmem:[#allocation37_spill] sm:$0xff] %v4324_v39  ;;  %vm1143_vm6 = vcmp.gt.f32.partialorder %v4324_v39, 0.5 }
  0xbc   :  { %v298_v41 = vpack.c.bf16 %v282_v32, %v281_v40  ;;  %3480 = vmatprep.subr.bf16.mxu0 %v3550_v37  ;;  %v4329_v32 = vld [vmem:[%s5803_s2 + $0x28] sm:$0xff]  ;;  %v4335_v40 = vld [vmem:[%s5803_s2 + $0x18] sm:$0xff] }
  0xbd   :  { %5974 = vst [vmem:[#allocation38_spill] sm:$0xff] %v4329_v32  ;;  %vm1144_vm7 = vcmp.gt.f32.partialorder %v4329_v32, 0.5  ;;  %vm1142_vm8 = vcmp.gt.f32.partialorder %v4335_v40, 0.5 }
  0xbe   :  { %3473 = vmatmul.mubr.msk.bf16.vlgmr.msra.gmra.mxu1 %vm315_vm4, %v298_v41  ;;  %vm1139_vm4 = vcmp.gt.f32.partialorder %v4297_v33, 0.5 }
  0xbf   :  { %3481 = vmatpush3.bf16.msra.mxu0 %v3550_v37  ;;  %3532 = vmatpush3.bf16.msra.mxu1 %v3548_v11 }
  0xc0   :  { %3482 = vmatprep.subr.bf16.mxu0 %v3551_v42  ;;  %3525 = vmatprep.subr.bf16.mxu1 %v3549_v30 }
  0xc3   :  { %3483 = vmatpush3.bf16.msra.mxu0 %v3551_v42  ;;  %3533 = vmatpush3.bf16.msra.mxu1 %v3549_v30 }
  0xc4   :  { %3484 = vmatprep.subr.bf16.mxu0 %v3552_v52  ;;  %3526 = vmatprep.subr.bf16.mxu1 %v3550_v37 }
  0xc7   :  { %3485 = vmatpush3.bf16.msra.mxu0 %v3552_v52  ;;  %3534 = vmatpush3.bf16.msra.mxu1 %v3550_v37  ;;  %v4314_v37 = vsel %vm1139_vm4, 1.0, %v5810_v36 }
  0xc8   :  { %3486 = vmatprep.subr.bf16.mxu0 %v3553_v59  ;;  %3527 = vmatprep.subr.bf16.mxu1 %v3551_v42  ;;  %v2501_v41 = vsel %vm2500_vm3, %v4314_v37, -inf }
  0xcb   :  { %3487 = vmatpush3.bf16.msra.mxu0 %v3553_v59  ;;  %3535 = vmatpush3.bf16.msra.mxu1 %v3551_v42  ;;  %v2502_v42 = vsel %vm2500_vm3, %v4319_v38, -inf }
  0xcc   :  { %3488 = vmatprep.subr.bf16.mxu0 %v3554_v43  ;;  %3528 = vmatprep.subr.bf16.mxu1 %v3552_v52 }
  0xcf   :  { %3489 = vmatpush3.bf16.msra.mxu0 %v3554_v43  ;;  %3536 = vmatpush3.bf16.msra.mxu1 %v3552_v52  ;;  %v2470_v52 = vsel %vm1141_vm5, 1.0, %v5810_v36 }
  0xd0   :  { %3490 = vmatprep.subr.bf16.mxu0 %v3555_v44  ;;  %3529 = vmatprep.subr.bf16.mxu1 %v3553_v59 }
  0xd3   :  { %3491 = vmatpush3.bf16.msra.mxu0 %v3555_v44  ;;  %3537 = vmatpush3.bf16.msra.mxu1 %v3553_v59  ;;  %v4349_v59 = vld [vmem:[%s5803_s2 + $0x30] sm:$0xff] }
  0xd4   :  { %3530 = vmatprep.subr.bf16.mxu1 %v3554_v43  ;;  %vm1145_vm9 = vcmp.gt.f32.partialorder %v4349_v59, 0.5 }
  0xd7   :  { %3538 = vmatpush3.bf16.msra.mxu1 %v3554_v43  ;;  %v2503_v43 = vmax.f32 %v2501_v41, %v2502_v42 }
  0xd8   :  { %3531 = vmatprep.subr.bf16.mxu1 %v3555_v44 }
  0xdb   :  { %3539 = vmatpush3.bf16.msra.mxu1 %v3555_v44  ;;  %v4355_v44 = vsel %vm1143_vm6, 1.0, %v5810_v36 }
 0x147   :  { %v4198_v45 = vpop.f32.mrf.mxu0 }
 0x148   :  { %5941 = vst [vmem:[#allocation5_spill] sm:$0xff] %v4198_v45 }
 0x149   :  { %v4200_v46 = vpop.f32.mrf.mxu0 }
 0x14a   :  { %5942 = vst [vmem:[#allocation6_spill] sm:$0xff] %v4200_v46 }
 0x14b   :  { %v4202_v47 = vpop.f32.mrf.mxu0 }
 0x14c   :  { %5943 = vst [vmem:[#allocation7_spill] sm:$0xff] %v4202_v47  ;;  %v757_v50 = vpack.c.bf16 %v4202_v47, %v4198_v45 }
 0x14d   :  { %v4204_v48 = vpop.f32.mrf.mxu0 }
 0x14e   :  { %5944 = vst [vmem:[#allocation8_spill] sm:$0xff] %v4204_v48  ;;  %v756_v49 = vpack.c.bf16 %v4204_v48, %v4200_v46 }
 0x150   :  { %3492 = vmatprep.mubr.bf16.mxu0 %v756_v49  ;;  %v4360_v49 = vsel %vm1144_vm7, 1.0, %v5810_v36 }
 0x151   :  { %3493 = vmatmul.mubr.bf16.vlgmr.msra.gmra.mxu0 %v757_v50  ;;  %v2504_v50 = vsel %vm2500_vm3, %v2470_v52, -inf }
 0x152   :  { %v4210_v53 = vpop.f32.mrf.mxu1 }
 0x153   :  { %5945 = vst [vmem:[#allocation9_spill] sm:$0xff] %v4210_v53 }
 0x154   :  { %v4212_v54 = vpop.f32.mrf.mxu1 }
 0x155   :  { %5946 = vst [vmem:[#allocation10_spill] sm:$0xff] %v4212_v54 }
 0x156   :  { %v4214_v55 = vpop.f32.mrf.mxu1  ;;  %v4216_v56 = vpop.f32.mrf.mxu0 }
 0x157   :  { %5947 = vst [vmem:[#allocation11_spill] sm:$0xff] %v4214_v55  ;;  %5948 = vst [vmem:[#allocation12_spill] sm:$0xff] %v4216_v56  ;;  %v759_v61 = vpack.c.bf16 %v4214_v55, %v4210_v53 }
 0x158   :  { %v4218_v57 = vpop.f32.mrf.mxu1  ;;  %v4220_v58 = vpop.f32.mrf.mxu0 }
 0x159   :  { %5949 = vst [vmem:[#allocation13_spill] sm:$0xff] %v4218_v57  ;;  %5950 = vst [vmem:[#allocation14_spill] sm:$0xff] %v4220_v58  ;;  %v758_v60 = vpack.c.bf16 %v4218_v57, %v4212_v54 }
 0x15a   :  { %v4226_v62 = vpop.f32.mrf.mxu0 }
 0x15b   :  { %5951 = vst [vmem:[#allocation15_spill] sm:$0xff] %v4226_v62  ;;  %3496 = vmatprep.mubr.bf16.mxu0 %v758_v60  ;;  %v761_v1 = vpack.c.bf16 %v4226_v62, %v4216_v56  ;;  %v4367_v60 = vld [vmem:[%s5803_s2 + $0x38] sm:$0xff]  ;;  %v4643_v62 = vld [vmem:[%s5803_s2 + $0x88] sm:$0xff] }
 0x15c   :  { %v4228_v63 = vpop.f32.mrf.mxu0  ;;  %3497 = vmatmul.mubr.bf16.gmra.mxu0 %v759_v61  ;;  %5975 = vst [vmem:[#allocation39_spill] sm:$0xff] %v4367_v60  ;;  %v4372_v61 = vld [vmem:[%s5803_s2 + $0x40] sm:$0xff]  ;;  %vm1146_vm10 = vcmp.gt.f32.partialorder %v4367_v60, 0.5  ;;  %5994 = vst [vmem:[#allocation57_spill] sm:$0xff] %v4643_v62 }
 0x15d   :  { %5952 = vst [vmem:[#allocation16_spill] sm:$0xff] %v4228_v63  ;;  %v760_v0 = vpack.c.bf16 %v4228_v63, %v4220_v58  ;;  %5976 = vst [vmem:[#allocation40_spill] sm:$0xff] %v4372_v61  ;;  %vm5881_vm11 = vcmp.gt.f32.partialorder %v4372_v61, 0.5 }
 0x15f   :  { %3500 = vmatprep.mubr.bf16.mxu0 %v760_v0  ;;  %v4377_v0 = vld [vmem:[%s5803_s2 + $0x48] sm:$0xff] }
 0x160   :  { %5977 = vst [vmem:[#allocation41_spill] sm:$0xff] %v4377_v0  ;;  %vm5857_vm12 = vcmp.gt.f32.partialorder %v4377_v0, 0.5 }
 0x161   :  { %v4416_v41 = vsel %vm5857_vm12, 1.0, %v5810_v36 }
 0x162   :  { %v4234_v2 = vpop.f32.mrf.mxu1 }
 0x163   :  { %5953 = vst [vmem:[#allocation17_spill] sm:$0xff] %v4234_v2 }
 0x164   :  { %v4236_v3 = vpop.f32.mrf.mxu1  ;;  %3501 = vmatmul.mubr.bf16.gmra.mxu0 %v761_v1  ;;  %v2471_v1 = vsel %vm1142_vm8, 1.0, %v5810_v36 }
 0x165   :  { %5954 = vst [vmem:[#allocation18_spill] sm:$0xff] %v4236_v3 }
 0x166   :  { %v4238_v4 = vpop.f32.mrf.mxu1  ;;  %v4240_v5 = vpop.f32.mrf.mxu0 }
 0x167   :  { %5955 = vst [vmem:[#allocation19_spill] sm:$0xff] %v4238_v4  ;;  %5956 = vst [vmem:[#allocation20_spill] sm:$0xff] %v4240_v5  ;;  %v763_v9 = vpack.c.bf16 %v4238_v4, %v4234_v2 }
 0x168   :  { %v4242_v6 = vpop.f32.mrf.mxu1  ;;  %v4244_v7 = vpop.f32.mrf.mxu0 }
 0x169   :  { %5957 = vst [vmem:[#allocation21_spill] sm:$0xff] %v4242_v6  ;;  %5958 = vst [vmem:[#allocation22_spill] sm:$0xff] %v4244_v7  ;;  %v762_v8 = vpack.c.bf16 %v4242_v6, %v4236_v3 }
 0x16a   :  { %v4250_v10 = vpop.f32.mrf.mxu0 }
 0x16b   :  { %5959 = vst [vmem:[#allocation23_spill] sm:$0xff] %v4250_v10  ;;  %3504 = vmatprep.mubr.bf16.mxu0 %v762_v8  ;;  %v765_v13 = vpack.c.bf16 %v4250_v10, %v4240_v5  ;;  %v2508_v8 = vsel %vm2500_vm3, %v4355_v44, -inf  ;;  %v4580_v10 = vld [vmem:[%s5803_s2 + $0xf0] sm:$0xff] }
 0x16c   :  { %v4252_v11 = vpop.f32.mrf.mxu0  ;;  %3505 = vmatmul.mubr.bf16.gmra.mxu0 %v763_v9  ;;  %v2509_v9 = vsel %vm2500_vm3, %v4360_v49, -inf  ;;  %5991 = vst [vmem:[#allocation54_spill] sm:$0xff] %v4580_v10 }
 0x16d   :  { %5960 = vst [vmem:[#allocation24_spill] sm:$0xff] %v4252_v11  ;;  %v764_v12 = vpack.c.bf16 %v4252_v11, %v4244_v7 }
 0x16e   :  { %v4258_v14 = vpop.f32.mrf.mxu1 }
 0x16f   :  { %5961 = vst [vmem:[#allocation25_spill] sm:$0xff] %v4258_v14  ;;  %3508 = vmatprep.mubr.bf16.mxu1 %v764_v12  ;;  %v2505_v12 = vmax.f32 %v2503_v43, %v2504_v50 }
 0x170   :  { %v4260_v15 = vpop.f32.mrf.mxu1  ;;  %3509 = vmatmul.mubr.bf16.vlgmr.msra.gmra.mxu1 %v765_v13  ;;  %v4389_v13 = vsel %vm1145_vm9, 1.0, %v5810_v36 }
 0x171   :  { %5962 = vst [vmem:[#allocation26_spill] sm:$0xff] %v4260_v15 }
 0x172   :  { %v4262_v16 = vpop.f32.mrf.mxu1 }
 0x173   :  { %5963 = vst [vmem:[#allocation27_spill] sm:$0xff] %v4262_v16  ;;  %v767_v19 = vpack.c.bf16 %v4262_v16, %v4258_v14 }
 0x174   :  { %v4264_v17 = vpop.f32.mrf.mxu1 }
 0x175   :  { %5964 = vst [vmem:[#allocation28_spill] sm:$0xff] %v4264_v17  ;;  %v766_v18 = vpack.c.bf16 %v4264_v17, %v4260_v15 }
 0x176   :  { %v4270_v20 = vpop.f32.mrf.mxu0 }
 0x177   :  { %5965 = vst [vmem:[#allocation29_spill] sm:$0xff] %v4270_v20  ;;  %3512 = vmatprep.mubr.bf16.mxu1 %v766_v18  ;;  %v2558_v18 = vshrl.u32 %v121_v51, 7  ;;  %v4406_v51 = vsel %vm1146_vm10, 1.0, %v5810_v36 }
 0x178   :  { %v4272_v21 = vpop.f32.mrf.mxu0  ;;  %3513 = vmatmul.mubr.bf16.gmra.mxu1 %v767_v19  ;;  %v2506_v19 = vsel %vm2500_vm3, %v2471_v1, -inf }
 0x179   :  { %5966 = vst [vmem:[#allocation30_spill] sm:$0xff] %v4272_v21  ;;  %v2507_v42 = vmax.f32 %v2505_v12, %v2506_v19  ;;  %v4418_v43 = vsub.s32 0, %v2558_v18  ;;  %v5980_v12 = vmov -10000.0   ;;  %v4440_v19 = vld [vmem:[%s5803_s2 + $0x60] sm:$0xff] }
 0x17a   :  { %v4274_v22 = vpop.f32.mrf.mxu0  ;;  %5981 = vst [vmem:[#allocation44_spill] sm:$0xff] %v4440_v19  ;;  %vm5831_vm15 = vcmp.gt.f32.partialorder %v4440_v19, 0.5 }
 0x17b   :  { %5967 = vst [vmem:[#allocation31_spill] sm:$0xff] %v4274_v22  ;;  %v769_v25 = vpack.c.bf16 %v4274_v22, %v4270_v20  ;;  %v4468_v22 = vsel %vm5831_vm15, 1.0, %v5980_v12 }
 0x17c   :  { %v4276_v23 = vpop.f32.mrf.mxu0 }
 0x17d   :  { %5968 = vst [vmem:[#allocation32_spill] sm:$0xff] %v4276_v23  ;;  %v768_v24 = vpack.c.bf16 %v4276_v23, %v4272_v21 }
 0x17e   :  { %v4282_v26 = vpop.f32.mrf.mxu1 }
 0x17f   :  { %5969 = vst [vmem:[#allocation33_spill] sm:$0xff] %v4282_v26  ;;  %3516 = vmatprep.mubr.bf16.mxu1 %v768_v24  ;;  %v2510_v24 = vmax.f32 %v2508_v8, %v2509_v9  ;;  %v4424_v8 = vld [vmem:[%s5803_s2 + $0x58] sm:$0xff]  ;;  %v2513_v9 = vsel %vm2500_vm3, %v4406_v51, -inf }
 0x180   :  { %v4284_v27 = vpop.f32.mrf.mxu1  ;;  %3517 = vmatmul.mubr.bf16.gmra.mxu1 %v769_v25  ;;  %v4399_v25 = vld [vmem:[%s5803_s2 + $0x50] sm:$0xff]  ;;  %5979 = vst [vmem:[#allocation43_spill] sm:$0xff] %v4424_v8  ;;  %vm1150_vm14 = vcmp.gt.f32.partialorder %v4424_v8, 0.5 }
 0x181   :  { %5970 = vst [vmem:[#allocation34_spill] sm:$0xff] %v4284_v27  ;;  %5978 = vst [vmem:[#allocation42_spill] sm:$0xff] %v4399_v25  ;;  %vm1149_vm13 = vcmp.gt.f32.partialorder %v4399_v25, 0.5  ;;  %v4456_v23 = vsel %vm1150_vm14, 1.0, %v5980_v12 }
 0x182   :  { %v4286_v28 = vpop.f32.mrf.mxu1  ;;  %v4435_v18 = vsel %vm1149_vm13, 1.0, %v5980_v12  ;;  %v2520_v17 = vsel %vm2500_vm3, %v4456_v23, -inf }
 0x183   :  { %5971 = vst [vmem:[#allocation35_spill] sm:$0xff] %v4286_v28  ;;  %v771_v31 = vpack.c.bf16 %v4286_v28, %v4282_v26  ;;  %v2518_v26 = vsel %vm2500_vm3, %v4435_v18, -inf }
 0x184   :  { %v4288_v29 = vpop.f32.mrf.mxu1 }
 0x185   :  { %5972 = vst [vmem:[#allocation36_spill] sm:$0xff] %v4288_v29  ;;  %v770_v30 = vpack.c.bf16 %v4288_v29, %v4284_v27 }
 0x187   :  { %3520 = vmatprep.mubr.bf16.mxu1 %v770_v30  ;;  %v2511_v30 = vsel %vm2500_vm3, %v4389_v13, -inf }
 0x188   :  { %3521 = vmatmul.mubr.bf16.gmra.mxu1 %v771_v31  ;;  %v4411_v31 = vsel %vm5881_vm11, 1.0, %v5810_v36  ;;  %v2512_v50 = vmax.f32 %v2510_v24, %v2511_v30  ;;  %v2516_v36 = vsel %vm2500_vm3, %v4416_v41, -inf  ;;  %v4445_v24 = vld [vmem:[%s5803_s2 + $0x68] sm:$0xff]  ;;  %v2560_v30 = vrot.slane %v2507_v42, %v4418_v43  ;;  %v4461_v42 = vld [vmem:[%s5803_s2 + $0x70] sm:$0xff] }
 0x189   :  { %v2515_v29 = vsel %vm2500_vm3, %v4411_v31, -inf  ;;  %5982 = vst [vmem:[#allocation45_spill] sm:$0xff] %v4445_v24  ;;  %vm5830_vm0 = vcmp.gt.f32.partialorder %v4445_v24, 0.5  ;;  %5983 = vst [vmem:[#allocation46_spill] sm:$0xff] %v4461_v42  ;;  %vm5832_vm1 = vcmp.gt.f32.partialorder %v4461_v42, 0.5 }
 0x18a   :  { %v2514_v28 = vmax.f32 %v2512_v50, %v2513_v9  ;;  %v2517_v27 = vmax.f32 %v2515_v29, %v2516_v36  ;;  %v2590_v50 = vsub.f32 %v4319_v38, %v2560_v30  ;;  %v2591_v29 = vsub.f32 %v2470_v52, %v2560_v30 }
 0x18b   :  { %v4473_v21 = vsel %vm5830_vm0, 1.0, %v5980_v12  ;;  %v2589_v20 = vsub.f32 %v4314_v37, %v2560_v30  ;;  %v2522_v38 = vsel %vm2500_vm3, %v4468_v22, -inf  ;;  %v4492_v6 = vsel %vm5832_vm1, 1.0, %v5980_v12 }
 0x18c   :  { %v2564_v36 = vrot.slane %v2514_v28, %v4418_v43  ;;  %v2519_v9 = vmax.f32 %v2517_v27, %v2518_v26  ;;  %v4482_v26 = vld [vmem:[%s5803_s2 + $0x78] sm:$0xff]  ;;  %v2592_v27 = vsub.f32 %v2471_v1, %v2560_v30  ;;  %v2623_v28 = vmul.f32 1.442695, %v2590_v50 }
 0x18d   :  { %5984 = vst [vmem:[#allocation47_spill] sm:$0xff] %v4482_v26  ;;  %v2523_v52 = vsel %vm2500_vm3, %v4473_v21, -inf  ;;  %v2625_v16 = vmul.f32 1.442695, %v2591_v29  ;;  %v2621_v14 = vmul.f32 1.442695, %v2589_v20 }
 0x18e   :  { %v2594_v37 = vsub.f32 %v4360_v49, %v2564_v36  ;;  %v2521_v15 = vmax.f32 %v2519_v9, %v2520_v17  ;;  %v2593_v7 = vsub.f32 %v4355_v44, %v2564_v36  ;;  %vm5833_vm0 = vcmp.gt.f32.partialorder %v4482_v26, 0.5  ;;  %v4503_v49 = vld [vmem:[%s5803_s2 + $0xa0] sm:$0xff]  ;;  %v4508_v20 = vld [vmem:[%s5803_s2 + $0xa8] sm:$0xff] }
 0x18f   :  { %v2595_v1 = vsub.f32 %v4389_v13, %v2564_v36  ;;  %v2524_v30 = vmax.f32 %v2522_v38, %v2523_v52  ;;  %3556 = vpow2.f32 %v2623_v28  ;;  %v2627_v50 = vmul.f32 1.442695, %v2592_v27  ;;  %5985 = vst [vmem:[#allocation48_spill] sm:$0xff] %v4503_v49  ;;  %5986 = vst [vmem:[#allocation49_spill] sm:$0xff] %v4508_v20  ;;  %v4519_v28 = vld [vmem:[%s5803_s2 + $0xb0] sm:$0xff] }
 0x190   :  { %v2596_v29 = vsub.f32 %v4406_v51, %v2564_v36  ;;  %v2525_v17 = vsel %vm2500_vm3, %v4492_v6, -inf  ;;  %3558 = vpow2.f32 %v2625_v16  ;;  %v2631_v44 = vmul.f32 1.442695, %v2594_v37  ;;  %5987 = vst [vmem:[#allocation50_spill] sm:$0xff] %v4519_v28 }
 0x191   :  { %v2568_v13 = vrot.slane %v2521_v15, %v4418_v43  ;;  %v4514_v51 = vsel %vm5833_vm0, 1.0, %v5980_v12  ;;  %3560 = vpow2.f32 %v2621_v14  ;;  %v2629_v36 = vmul.f32 1.442695, %v2593_v7  ;;  %v4528_v7 = vld [vmem:[%s5805_s4] ss:$0 sm:$0xff] }
 0x192   :  { %v2633_v9 = vmul.f32 1.442695, %v2595_v1  ;;  %v2526_v27 = vmax.f32 %v2524_v30, %v2525_v17  ;;  %vm5835_vm15 = vcmp.gt.f32.partialorder %v4503_v49, 0.5  ;;  %vm5834_vm1 = vcmp.gt.f32.partialorder %v4508_v20, 0.5 }
 0x193   :  { %3562 = vpow2.f32 %v2627_v50  ;;  %v2635_v15 = vmul.f32 1.442695, %v2596_v29  ;;  %v2527_v16 = vsel %vm2500_vm3, %v4514_v51, -inf  ;;  %v2598_v14 = vsub.f32 %v4416_v41, %v2568_v13  ;;  %v4546_v41 = vld [vmem:[%s5803_s2 + $0xe0] sm:$0xff]  ;;  %v4551_v50 = vld [vmem:[%s5803_s2 + $0xe8] sm:$0xff] }
 0x194   :  { %3564 = vpow2.f32 %v2631_v44  ;;  %vm5837_vm0 = vcmp.gt.f32.partialorder %v4519_v28, 0.5  ;;  %v4535_v38 = vsel %vm5835_vm15, 1.0, %v5980_v12  ;;  %v4540_v52 = vsel %vm5834_vm1, 1.0, %v5980_v12  ;;  %5988 = vst [vmem:[#allocation51_spill] sm:$0xff] %v4546_v41  ;;  %5989 = vst [vmem:[#allocation52_spill] sm:$0xff] %v4551_v50 }
 0x195   :  { %3566 = vpow2.f32 %v2629_v36  ;;  %v2599_v1 = vsub.f32 %v4435_v18, %v2568_v13  ;;  %v2528_v30 = vmax.f32 %v2526_v27, %v2527_v16  ;;  %v2597_v17 = vsub.f32 %v4411_v31, %v2568_v13  ;;  %v4558_v18 = vld [vmem:[%s5803_s2 + $0xb8] sm:$0xff] }
 0x196   :  { %3568 = vpow2.f32 %v2633_v9  ;;  %5990 = vst [vmem:[#allocation53_spill] sm:$0xff] %v4558_v18  ;;  %v2639_v36 = vmul.f32 1.442695, %v2598_v14  ;;  %v4563_v9 = vsel %vm5837_vm0, 1.0, %v5980_v12  ;;  %v2536_v27 = vsel %vm2500_vm3, %v4535_v38, -inf }
 0x197   :  { %3570 = vpow2.f32 %v2635_v15  ;;  %v2537_v15 = vsel %vm2500_vm3, %v4540_v52, -inf  ;;  %vm5842_vm1 = vcmp.gt.f32.partialorder %v4546_v41, 0.5  ;;  %vm5846_vm15 = vcmp.gt.f32.partialorder %v4551_v50, 0.5 }
 0x198   :  { %v2600_v14 = vsub.f32 %v4456_v23, %v2568_v13  ;;  %v4574_v4 = vrot.slane %v2528_v30, %v4418_v43  ;;  %vm5856_vm0 = vcmp.gt.f32.partialorder %v4558_v18, 0.5  ;;  %v2538_v3 = vmax.f32 %v2536_v27, %v2537_v15 }
 0x199   :  { %v2539_v23 = vsel %vm2500_vm3, %v4563_v9, -inf  ;;  %v4590_v13 = vsel %vm5842_vm1, 1.0, %v5980_v12  ;;  %v4605_v27 = vsel %vm5856_vm0, 1.0, %v5980_v12  ;;  %vm5854_vm1 = vcmp.gt.f32.partialorder %v4580_v10, 0.5 }
 0x19a   :  { %v2550_v5 = vsel %vm2500_vm3, %v4590_v13, -inf  ;;  %vm5871_vm0 = vcmp.gt.f32.partialorder %v4643_v62, 0.5 }
 0x19c   :  { %v4583_v11 = vpop.eup %3556 }
 0x19d   :  { %v4597_v30 = vpop.eup %3558 }
 0x19e   :  { %v4608_v15 = vpop.eup %3560 }
 0x1a0   :  { %v4621_v58 = vpop.eup %3562 }
 0x211   :  { %v3494_v37 = vpop.f32.mrf.mxu0 }
 0x212   :  { %v886_v29 = vadd.f32 %v3494_v37, %v4528_v7  ;;  %v2641_v37 = vmul.f32 1.442695, %v2599_v1  ;;  %v4595_v1 = vsel %vm5846_vm15, 1.0, %v5980_v12 }
 0x213   :  { %v877_v44 = vpop.f32.mrf.mxu0  ;;  %v2551_v63 = vsel %vm2500_vm3, %v4595_v1, -inf }
 0x214   :  { %3572 = vtanh.f32 %v886_v29  ;;  %v878_v31 = vadd.f32 %v4528_v7, %v877_v44  ;;  %v2637_v44 = vmul.f32 1.442695, %v2597_v17  ;;  %v2552_v55 = vmax.f32 %v2550_v5, %v2551_v63  ;;  %v4664_v5 = vld [vmem:[%s5806_s5] ss:$0 sm:$0xff] }
 0x215   :  { %v3495_v16 = vpop.f32.mrf.mxu0 }
 0x216   :  { %3574 = vtanh.f32 %v878_v31  ;;  %v889_v29 = vadd.f32 %v3495_v16, %v4528_v7  ;;  %v2643_v31 = vmul.f32 1.442695, %v2600_v14  ;;  %v2602_v16 = vsub.f32 %v4473_v21, %v4574_v4 }
 0x217   :  { %v880_v2 = vpop.f32.mrf.mxu0  ;;  %3576 = vpow2.f32 %v2639_v36  ;;  %v2601_v36 = vsub.f32 %v4468_v22, %v4574_v4  ;;  %v2540_v22 = vmax.f32 %v2538_v3, %v2539_v23  ;;  %v2541_v14 = vsel %vm2500_vm3, %v4605_v27, -inf  ;;  %v4633_v3 = vld [vmem:[%s5803_s2 + $0x80] sm:$0xff] }
 0x218   :  { %v881_v17 = vadd.f32 %v4528_v7, %v880_v2  ;;  %3578 = vtanh.f32 %v889_v29  ;;  %v4615_v2 = vld [vmem:[%s5803_s2 + $0xf8] sm:$0xff]  ;;  %v4628_v21 = vsel %vm5854_vm1, 1.0, %v5980_v12  ;;  %5993 = vst [vmem:[#allocation56_spill] sm:$0xff] %v4633_v3  ;;  %v4635_v29 = vpop.eup %3564  ;;  %v2647_v54 = vmul.f32 1.442695, %v2602_v16 }
 0x219   :  { %5992 = vst [vmem:[#allocation55_spill] sm:$0xff] %v4615_v2  ;;  %vm5870_vm15 = vcmp.gt.f32.partialorder %v4615_v2, 0.5  ;;  %v4645_v57 = vpop.eup %3566  ;;  %v2542_v53 = vmax.f32 %v2540_v22, %v2541_v14  ;;  %v2553_v47 = vsel %vm2500_vm3, %v4628_v21, -inf  ;;  %vm5874_vm1 = vcmp.gt.f32.partialorder %v4633_v3, 0.5 }
 0x21a   :  { %3580 = vtanh.f32 %v881_v17  ;;  %v2645_v17 = vmul.f32 1.442695, %v2601_v36  ;;  %v2604_v22 = vsub.f32 %v4514_v51, %v4574_v4  ;;  %v4679_v46 = vsel %vm5874_vm1, 1.0, %v5980_v12 }
 0x21b   :  { %3582 = vpow2.f32 %v2637_v44  ;;  %v2603_v44 = vsub.f32 %v4492_v6, %v4574_v4  ;;  %v4653_v6 = vpop.eup %3568  ;;  %v4687_v51 = vsel %vm5871_vm0, 1.0, %v5980_v12 }
 0x21c   :  { %v3498_v23 = vpop.f32.mrf.mxu0  ;;  %3584 = vpow2.f32 %v2641_v37  ;;  %v4651_v37 = vld [vmem:[%s5803_s2 + $0x90] sm:$0xff]  ;;  %v4658_v48 = vpop.eup %3570 }
 0x21d   :  { %v902_v56 = vadd.f32 %v3498_v23, %v4528_v7  ;;  %3586 = vpow2.f32 %v2643_v31  ;;  %5995 = vst [vmem:[#allocation58_spill] sm:$0xff] %v4651_v37  ;;  %v4669_v31 = vsel %vm5870_vm15, 1.0, %v5980_v12  ;;  %vm1157_vm12 = vcmp.gt.f32.partialorder %v4651_v37, 0.5 }
 0x21e   :  { %v893_v36 = vpop.f32.mrf.mxu0  ;;  %v2555_v4 = vsel %vm2500_vm3, %v4669_v31, -inf }
 0x21f   :  { %3588 = vtanh.f32 %v902_v56  ;;  %v894_v63 = vadd.f32 %v4528_v7, %v893_v36  ;;  %v2649_v56 = vmul.f32 1.442695, %v2603_v44  ;;  %v2554_v36 = vmax.f32 %v2552_v55, %v2553_v47 }
 0x220   :  { %v3499_v16 = vpop.f32.mrf.mxu0  ;;  %3590 = vpow2.f32 %v2645_v17  ;;  %v4691_v55 = vrot.slane %v2542_v53, %v4418_v43  ;;  %v4696_v17 = vld [vmem:[%s5803_s2 + $0xc0] sm:$0xff]  ;;  %v4713_v53 = vsel %vm1157_vm12, 1.0, %v5980_v12 }
 0x221   :  { %v3573_v14 = vpop.eup %3572  ;;  %3592 = vtanh.f32 %v894_v63  ;;  %v905_v23 = vadd.f32 %v3499_v16, %v4528_v7  ;;  %5996 = vst [vmem:[#allocation59_spill] sm:$0xff] %v4696_v17  ;;  %vm5903_vm15 = vcmp.gt.f32.partialorder %v4696_v17, 0.5 }
 0x222   :  { %v896_v45 = vpop.f32.mrf.mxu0  ;;  %v1045_v2 = vmul.f32 %v3573_v14, %v4664_v5  ;;  %3594 = vpow2.f32 %v2647_v54  ;;  %v4701_v54 = vld [vmem:[%s5803_s2 + $0xc8] sm:$0xff]  ;;  %v2651_v14 = vmul.f32 1.442695, %v2604_v22  ;;  %v2530_v22 = vsel %vm2500_vm3, %v4687_v51, -inf }
 0x223   :  { %v3575_v44 = vpop.eup %3574  ;;  %3596 = vtanh.f32 %v905_v23  ;;  %v897_v47 = vadd.f32 %v4528_v7, %v896_v45  ;;  %5997 = vst [vmem:[#allocation60_spill] sm:$0xff] %v4701_v54  ;;  %v4708_v45 = vld [vmem:[%s5803_s2 + $0x98] sm:$0xff]  ;;  %v2529_v23 = vsel %vm2500_vm3, %v4679_v46, -inf  ;;  %v2609_v20 = vsub.f32 %v4535_v38, %v4691_v55 }
 0x224   :  { %v4703_v63 = vpop.eup %3576  ;;  %1079 = vadd.xlane.f32.xlu0 %v1045_v2  ;;  %v3502_v16 = vpop.f32.mrf.mxu0  ;;  %3598 = vpow2.f32 %v2649_v56  ;;  %5998 = vst [vmem:[#allocation61_spill] sm:$0xff] %v4708_v45  ;;  %v2556_v2 = vmax.f32 %v2554_v36, %v2555_v4  ;;  %v1043_v10 = vmul.f32 %v3575_v44, %v4664_v5  ;;  %vm5888_vm0 = vcmp.gt.f32.partialorder %v4701_v54, 0.5  ;;  %v4735_v44 = vld [vmem:[%s5803_s2 + $0xd0] sm:$0xff]  ;;  %v4774_v54 = vld [vmem:[%s5803_s2 + $0xd8] sm:$0xff]  ;;  %s3853_s2 = smov [#allocation2]  }
 0x225   :  { %3600 = vtanh.f32 %v897_v47  ;;  %v918_v41 = vadd.f32 %v3502_v16, %v4528_v7  ;;  %v3579_v56 = vpop.eup %3578  ;;  %v2610_v36 = vsub.f32 %v4540_v52, %v4691_v55  ;;  %v2611_v4 = vsub.f32 %v4563_v9, %v4691_v55  ;;  %5999 = vst [vmem:[#allocation62_spill] sm:$0xff] %v4735_v44  ;;  %6000 = vst [vmem:[#allocation63_spill] sm:$0xff] %v4774_v54  ;;  %s3255_s28 = sshll.u32 %s3853_s2, 4  ;;  %s3256_s28 = int_to_ptr.vmem [resolvable:$true] %s3255_s28 }
 0x226   :  { %v4720_v50 = vpop.f32.mrf.mxu0  ;;  %vm1158_vm1 = vcmp.gt.f32.partialorder %v4708_v45, 0.5  ;;  %v2531_v52 = vmax.f32 %v2529_v23, %v2530_v22  ;;  %v2532_v9 = vsel %vm2500_vm3, %v4713_v53, -inf  ;;  %v4748_v19 = vrot.slane %v2556_v2, %v4418_v43  ;;  %s3828_s4 = scalar_lea.vmem %s3256_s28, 128  ;;  %p3833_p1 = scmp.lt.s32.totalorder %s3256_s28, %s3256_s28 }
 0x227   :  { %v3581_v24 = vpop.eup %3580  ;;  %3602 = vtanh.f32 %v918_v41  ;;  %v2612_v41 = vsub.f32 %v4605_v27, %v4691_v55  ;;  %v1046_v55 = vmul.f32 %v3579_v56, %v4664_v5  ;;  %v2661_v23 = vmul.f32 1.442695, %v2609_v20  ;;  %p3829_p0 = scmp.ne.s32.totalorder %s3256_s28, %s3828_s4  ;;  %p3834_p2 = scmp.lt.s32.totalorder %s3828_s4, %s3828_s4 }
 0x228   :  { %v4737_v38 = vpop.eup %3582  ;;  %v3503_v47 = vpop.f32.mrf.mxu0  ;;  %1075 = vadd.xlane.f32.xlu0 %v1043_v10  ;;  %v1044_v16 = vmul.f32 %v3581_v24, %v4664_v5  ;;  %v4753_v10 = vsel %vm5903_vm15, 1.0, %v5980_v12  ;;  %v4758_v24 = vsel %vm5888_vm0, 1.0, %v5980_v12  ;;  %v4766_v2 = vsel %vm1158_vm1, 1.0, %v5980_v12 }
 0x229   :  { %v4744_v49 = vpop.eup %3584  ;;  %v921_v18 = vadd.f32 %v3503_v47, %v4528_v7  ;;  %vm5905_vm11 = vcmp.gt.f32.partialorder %v4735_v44, 0.5  ;;  %v2663_v22 = vmul.f32 1.442695, %v2610_v36  ;;  %v2617_v47 = vsub.f32 %v4590_v13, %v4748_v19  ;;  %p3835_p3 = por %p3834_p2, %p3833_p1 }
 0x22a   :  { %v4760_v27 = vpop.eup %3586  ;;  %1077 = vadd.xlane.f32.xlu1 %v1044_v16  ;;  %v2665_v20 = vmul.f32 1.442695, %v2611_v4  ;;  %v2533_v56 = vmax.f32 %v2531_v52, %v2532_v9  ;;  %v2543_v17 = vsel %vm2500_vm3, %v4753_v10, -inf  ;;  %v2544_v26 = vsel %vm2500_vm3, %v4758_v24, -inf  ;;  %v912_v52 = vpop.f32.mrf.mxu0 }
 0x22b   :  { %3604 = vtanh.f32 %v921_v18  ;;  %v2534_v13 = vsel %vm2500_vm3, %v4766_v2, -inf  ;;  %v2667_v9 = vmul.f32 1.442695, %v2612_v41  ;;  %vm5904_vm0 = vcmp.gt.f32.partialorder %v4774_v54, 0.5  ;;  %p3836_p4 = pnand %p3835_p3, %p3829_p0 }
 0x22c   :  { %v3589_v16 = vpop.eup %3588  ;;  %1081 = vadd.xlane.f32.xlu0 %v1046_v55  ;;  %3606 = vpow2.f32 %v2651_v14  ;;  %v4788_v55 = vsel %vm5905_vm11, 1.0, %v5980_v12  ;;  %v2545_v14 = vmax.f32 %v2543_v17, %v2544_v26  ;;  %v2618_v44 = vsub.f32 %v4595_v1, %v4748_v19 }
 0x22d   :  { %v4780_v18 = vpop.eup %3590  ;;  %v1049_v36 = vmul.f32 %v3589_v16, %v4664_v5  ;;  %3608 = vpow2.f32 %v2661_v23  ;;  %v2677_v16 = vmul.f32 1.442695, %v2617_v47  ;;  %v2535_v3 = vmax.f32 %v2533_v56, %v2534_v13  ;;  %v3506_v47 = vpop.f32.mrf.mxu0 }
 0x22e   :  { %v3593_v4 = vpop.eup %3592  ;;  %3610 = vpow2.f32 %v2663_v22  ;;  %v2546_v0 = vsel %vm2500_vm3, %v4788_v55, -inf  ;;  %v4805_v26 = vsel %vm5904_vm0, 1.0, %v5980_v12  ;;  %v910_v1 = vadd.f32 %v4528_v7, %v4720_v50 }
 0x22f   :  { %v4791_v28 = vpop.eup %3594  ;;  %1087 = vadd.xlane.f32.xlu1 %v1049_v36  ;;  %3612 = vpow2.f32 %v2665_v20  ;;  %v1047_v61 = vmul.f32 %v3593_v4, %v4664_v5  ;;  %v2717_v56 = vrot.slane %v4583_v11, 7  ;;  %vm2718_vm15 = vcmask 1041409  }
 0x230   :  { %v3597_v42 = vpop.eup %3596  ;;  %v3510_v62 = vpop.f32.mrf.mxu1  ;;  %3614 = vpow2.f32 %v2667_v9  ;;  %v2547_v12 = vmax.f32 %v2545_v14, %v2546_v0  ;;  %v2679_v50 = vmul.f32 1.442695, %v2618_v44  ;;  %v4815_v4 = vrot.slane %v2535_v3, %v4418_v43 }
 0x231   :  { %v4797_v23 = vpop.eup %3598  ;;  %v950_v41 = vadd.f32 %v3510_v62, %v4528_v7  ;;  %v1050_v22 = vmul.f32 %v3597_v42, %v4664_v5  ;;  %v2619_v62 = vsub.f32 %v4628_v21, %v4748_v19  ;;  %v2620_v42 = vsub.f32 %v4669_v31, %v4748_v19  ;;  %v925_v0 = vpop.f32.mrf.mxu0 }
 0x232   :  { %v3601_v17 = vpop.eup %3600  ;;  %v941_v20 = vpop.f32.mrf.mxu1  ;;  %3616 = vpow2.f32 %v2677_v16  ;;  %v2548_v9 = vsel %vm2500_vm3, %v4805_v26, -inf  ;;  %v2720_v44 = vrot.slane %v4597_v30, 6  ;;  %vm2721_vm3 = vcmask 1042434  }
 0x233   :  { %1083 = vadd.xlane.f32.xlu1 %v1047_v61  ;;  %1089 = vadd.xlane.f32.xlu0 %v1050_v22  ;;  %3618 = vtanh.f32 %v950_v41  ;;  %v913_v61 = vadd.f32 %v4528_v7, %v912_v52  ;;  %v1048_v19 = vmul.f32 %v3601_v17, %v4664_v5  ;;  %v942_v31 = vadd.f32 %v4528_v7, %v941_v20 }
 0x234   :  { %v3603_v36 = vpop.eup %3602  ;;  %v3511_v13 = vpop.f32.mrf.mxu1  ;;  %3620 = vtanh.f32 %v910_v1  ;;  %v2681_v3 = vmul.f32 1.442695, %v2619_v62  ;;  %v2605_v52 = vsub.f32 %v4679_v46, %v4815_v4  ;;  %v2549_v14 = vmax.f32 %v2547_v12, %v2548_v9 }
 0x235   :  { %v953_v22 = vadd.f32 %v3511_v13, %v4528_v7  ;;  %v1053_v21 = vmul.f32 %v3603_v36, %v4664_v5  ;;  %v2719_v17 = vsel %vm2718_vm15, %v2717_v56, %v4608_v15  ;;  %v2683_v1 = vmul.f32 1.442695, %v2620_v42  ;;  %v3507_v12 = vpop.f32.mrf.mxu0 }
 0x236   :  { %v944_v16 = vpop.f32.mrf.mxu1  ;;  %v2606_v20 = vsub.f32 %v4687_v51, %v4815_v4  ;;  %v934_v46 = vadd.f32 %v3506_v47, %v4528_v7  ;;  %v2723_v56 = vrot.slane %v4621_v58, 5  ;;  %v2607_v51 = vsub.f32 %v4713_v53, %v4815_v4 }
 0x237   :  { %3622 = vtanh.f32 %v953_v22  ;;  %1095 = vadd.xlane.f32.xlu1 %v1053_v21  ;;  %1085 = vadd.xlane.f32.xlu0 %v1048_v19  ;;  %v945_v36 = vadd.f32 %v4528_v7, %v944_v16  ;;  %v2653_v42 = vmul.f32 1.442695, %v2605_v52  ;;  %v2722_v47 = vsel %vm2721_vm3, %v2720_v44, %v2719_v17 }
 0x238   :  { %v3605_v41 = vpop.eup %3604  ;;  %v3514_v13 = vpop.f32.mrf.mxu1  ;;  %3624 = vpow2.f32 %v2679_v50  ;;  %vm5926_vm0 = vcmask 1043459   ;;  %vm2776_vm11 = vcmask 3072  }
 0x239   :  { %3626 = vtanh.f32 %v913_v61  ;;  %v1054_v22 = vmul.f32 %v3605_v41, %v4664_v5  ;;  %v4833_v62 = vpop.eup %3606  ;;  %v4842_v61 = vrot.slane %v2549_v14, %v4418_v43  ;;  %v937_v41 = vadd.f32 %v3507_v12, %v4528_v7 }
 0x23a   :  { %6001 = vst [vmem:[#allocation64_spill] sm:$0xff] %v4833_v62  ;;  %3628 = vtanh.f32 %v942_v31  ;;  %v957_v9 = vpop.f32.mrf.mxu1  ;;  %v4837_v50 = vpop.eup %3608  ;;  %v2655_v31 = vmul.f32 1.442695, %v2606_v20  ;;  %v966_v53 = vadd.f32 %v3514_v13, %v4528_v7  ;;  %v2725_v14 = vsel %vm5926_vm0, %v2723_v56, %v2722_v47 }
 0x23b   :  { %6002 = vst [vmem:[#allocation65_spill] sm:$0xff] %v4837_v50  ;;  %1097 = vadd.xlane.f32.xlu0 %v1054_v22  ;;  %3630 = vpow2.f32 %v2681_v3  ;;  %v4844_v21 = vpop.eup %3610  ;;  %v2657_v22 = vmul.f32 1.442695, %v2607_v51  ;;  %v2614_v44 = vsub.f32 %v4758_v24, %v4842_v61  ;;  %v926_v12 = vadd.f32 %v4528_v7, %v925_v0 }
 0x23c   :  { %v3515_v19 = vpop.f32.mrf.mxu1  ;;  %3632 = vpow2.f32 %v2683_v1  ;;  %v4847_v16 = vpop.eup %3612 }
 0x23d   :  { %3634 = vtanh.f32 %v945_v36  ;;  %v4851_v52 = vpop.eup %3614  ;;  %v969_v1 = vadd.f32 %v3515_v19, %v4528_v7  ;;  %v2726_v36 = vrot.slane %v4635_v29, 7  ;;  %v2728_v19 = vrot.slane %v4653_v6, 6 }
 0x23e   :  { %3636 = vtanh.f32 %v934_v46  ;;  %v960_v3 = vpop.f32.mrf.mxu1  ;;  %6003 = vst [vmem:[#allocation66_spill] sm:$0xff] %v4851_v52  ;;  %v928_v46 = vpop.f32.mrf.mxu0  ;;  %v2671_v54 = vmul.f32 1.442695, %v2614_v44 }
 0x23f   :  { %3638 = vpow2.f32 %v2653_v42  ;;  %v4856_v17 = vpop.eup %3616  ;;  %v2777_v42 = vsel %vm2776_vm11, %v2725_v14, 0.0  ;;  %v2727_v0 = vsel %vm2718_vm15, %v2726_v36, %v4645_v57 }
 0x240   :  { %6004 = vst [vmem:[#allocation67_spill] sm:$0xff] %v4856_v17  ;;  %v3518_v20 = vpop.f32.mrf.mxu1  ;;  %3640 = vpow2.f32 %v2655_v31  ;;  %v3619_v13 = vpop.eup %3618  ;;  %v929_v31 = vadd.f32 %v4528_v7, %v928_v46  ;;  %v2729_v36 = vsel %vm2721_vm3, %v2728_v19, %v2727_v0 }
 0x241   :  { %3642 = vtanh.f32 %v937_v41  ;;  %v1061_v51 = vmul.f32 %v3619_v13, %v4664_v5  ;;  %v3621_v24 = vpop.eup %3620  ;;  %v2778_v13 = vrot.slane %v2777_v42, 4 }
 0x242   :  { %3644 = vtanh.f32 %v966_v53  ;;  %v973_v56 = vpop.f32.mrf.mxu1  ;;  %v1051_v37 = vmul.f32 %v3621_v24, %v4664_v5 }
 0x243   :  { %v974_v47 = vadd.f32 %v4528_v7, %v973_v56  ;;  %3646 = vpow2.f32 %v2657_v22  ;;  %1111 = vadd.xlane.f32.xlu1 %v1061_v51  ;;  %v958_v22 = vadd.f32 %v4528_v7, %v957_v9 }
 0x244   :  { %v3623_v45 = vpop.eup %3622  ;;  %3648 = vtanh.f32 %v969_v1  ;;  %v3519_v41 = vpop.f32.mrf.mxu1  ;;  %v2730_v1 = vrot.slane %v4658_v48, 5 }
 0x245   :  { %v4868_v53 = vpop.eup %3624  ;;  %3650 = vtanh.f32 %v974_v47  ;;  %v1062_v14 = vmul.f32 %v3623_v45, %v4664_v5  ;;  %v2732_v47 = vrot.slane %v4703_v63, 7 }
 0x246   :  { %v3627_v56 = vpop.eup %3626  ;;  %3652 = vtanh.f32 %v926_v12  ;;  %v976_v44 = vpop.f32.mrf.mxu1  ;;  %v961_v12 = vadd.f32 %v4528_v7, %v960_v3  ;;  %v2731_v3 = vsel %vm5926_vm0, %v2730_v1, %v2729_v36  ;;  %v2615_v1 = vsub.f32 %v4788_v55, %v4842_v61 }
 0x247   :  { %v3629_v46 = vpop.eup %3628  ;;  %v977_v51 = vadd.f32 %v4528_v7, %v976_v44  ;;  %1113 = vadd.xlane.f32.xlu0 %v1062_v14  ;;  %3654 = vpow2.f32 %v2671_v54  ;;  %1091 = vadd.xlane.f32.xlu1 %v1051_v37  ;;  %v1052_v44 = vmul.f32 %v3627_v56, %v4664_v5  ;;  %v4884_v14 = vadd.f32 %v2778_v13, %v2777_v42 }
 0x248   :  { %v4877_v45 = vpop.eup %3630  ;;  %3656 = vtanh.f32 %v929_v31  ;;  %v3522_v9 = vpop.f32.mrf.mxu1  ;;  %v982_v54 = vadd.f32 %v3518_v20, %v4528_v7  ;;  %v1059_v31 = vmul.f32 %v3629_v46, %v4664_v5  ;;  %v2608_v42 = vsub.f32 %v4766_v2, %v4815_v4 }
 0x249   :  { %v4880_v8 = vpop.eup %3632  ;;  %3658 = vtanh.f32 %v977_v51  ;;  %v998_v24 = vadd.f32 %v3522_v9, %v4528_v7  ;;  %v2733_v51 = vsel %vm2718_vm15, %v2732_v47, %v4737_v38  ;;  %v985_v20 = vadd.f32 %v3519_v41, %v4528_v7 }
 0x24a   :  { %6005 = vst [vmem:[#allocation68_spill] sm:$0xff] %v4880_v8  ;;  %v3635_v19 = vpop.eup %3634  ;;  %3660 = vtanh.f32 %v958_v22  ;;  %v989_v0 = vpop.f32.mrf.mxu1  ;;  %v2734_v22 = vrot.slane %v4744_v49, 6  ;;  %v2613_v2 = vsub.f32 %v4753_v10, %v4842_v61  ;;  %v2784_v9 = vsel %vm2776_vm11, %v2731_v3, 0.0 }
 0x24b   :  { %v3637_v37 = vpop.eup %3636  ;;  %3662 = vtanh.f32 %v998_v24  ;;  %v990_v32 = vadd.f32 %v4528_v7, %v989_v0  ;;  %1093 = vadd.xlane.f32.xlu0 %v1052_v44  ;;  %1107 = vadd.xlane.f32.xlu1 %v1059_v31  ;;  %v1060_v47 = vmul.f32 %v3635_v19, %v4664_v5  ;;  %v2738_v24 = vrot.slane %v4791_v28, 7 }
 0x24c   :  { %v4894_v13 = vpop.eup %3638  ;;  %3664 = vtanh.f32 %v961_v12  ;;  %v3523_v56 = vpop.f32.mrf.mxu1  ;;  %v1057_v12 = vmul.f32 %v3637_v37, %v4664_v5  ;;  %v2659_v44 = vmul.f32 1.442695, %v2608_v42  ;;  %v2616_v19 = vsub.f32 %v4805_v26, %v4842_v61 }
 0x24d   :  { %6006 = vst [vmem:[#allocation69_spill] sm:$0xff] %v4894_v13  ;;  %v4900_v46 = vpop.eup %3640  ;;  %3666 = vtanh.f32 %v990_v32  ;;  %v1001_v36 = vadd.f32 %v3523_v56, %v4528_v7  ;;  %v2735_v10 = vsel %vm2721_vm3, %v2734_v22, %v2733_v51  ;;  %v2673_v31 = vmul.f32 1.442695, %v2615_v1 }
 0x24e   :  { %v3643_v4 = vpop.eup %3642  ;;  %3668 = vtanh.f32 %v982_v54  ;;  %v992_v41 = vpop.f32.mrf.mxu1  ;;  %v2736_v54 = vrot.slane %v4760_v27, 5  ;;  %v2669_v56 = vmul.f32 1.442695, %v2613_v2  ;;  %v2780_v26 = vrot.slane %v4884_v14, 2 }
 0x24f   :  { %v3645_v55 = vpop.eup %3644  ;;  %3670 = vtanh.f32 %v1001_v36  ;;  %v993_v32 = vadd.f32 %v4528_v7, %v992_v41  ;;  %1109 = vadd.xlane.f32.xlu0 %v1060_v47  ;;  %1103 = vadd.xlane.f32.xlu1 %v1057_v12  ;;  %v1058_v37 = vmul.f32 %v3643_v4, %v4664_v5  ;;  %v2740_v7 = vrot.slane %v4797_v23, 6 }
 0x250   :  { %v4912_v0 = vpop.eup %3646  ;;  %3672 = vtanh.f32 %v985_v20  ;;  %v1065_v36 = vmul.f32 %v3645_v55, %v4664_v5  ;;  %v2739_v61 = vsel %vm2718_vm15, %v2738_v24, %v4780_v18  ;;  %v2785_v22 = vrot.slane %v2784_v9, 4 }
 0x251   :  { %v3649_v3 = vpop.eup %3648  ;;  %3674 = vtanh.f32 %v993_v32  ;;  %v2675_v1 = vmul.f32 1.442695, %v2616_v19  ;;  %v2737_v2 = vsel %vm5926_vm0, %v2736_v54, %v2735_v10  ;;  %v2742_v4 = vrot.slane %v4833_v62, 5 }
 0x252   :  { %v3651_v42 = vpop.eup %3650  ;;  %3676 = vpow2.f32 %v2659_v44  ;;  %v1066_v12 = vmul.f32 %v3649_v3, %v4664_v5  ;;  %v2741_v24 = vsel %vm2721_vm3, %v2740_v7, %v2739_v61  ;;  %v2750_v55 = vrot.slane %v4844_v21, 7 }
 0x253   :  { %v3653_v20 = vpop.eup %3652  ;;  %1105 = vadd.xlane.f32.xlu0 %v1058_v37  ;;  %v4923_v51 = vmul.f32 %v3651_v42, %v4664_v5  ;;  %1119 = vadd.xlane.f32.xlu1 %v1065_v36  ;;  %3678 = vpow2.f32 %v2673_v31  ;;  %v2781_v19 = vadd.f32 %v2780_v26, %v4884_v14  ;;  %v2786_v54 = vadd.f32 %v2785_v22, %v2784_v9 }
 0x254   :  { %v4925_v47 = vpop.eup %3654  ;;  %3680 = vpow2.f32 %v2669_v56  ;;  %v1055_v44 = vmul.f32 %v3653_v20, %v4664_v5  ;;  %v2791_v3 = vsel %vm2776_vm11, %v2737_v2, 0.0  ;;  %v2743_v7 = vsel %vm5926_vm0, %v2742_v4, %v2741_v24 }
 0x255   :  { %v3657_v41 = vpop.eup %3656  ;;  %3682 = vpow2.f32 %v2675_v1  ;;  %v2752_v56 = vrot.slane %v4847_v16, 6  ;;  %v2751_v26 = vsel %vm2718_vm15, %v2750_v55, %v4837_v50  ;;  %v2762_v61 = vrot.slane %v4868_v53, 7 }
 0x256   :  { %v3659_v32 = vpop.eup %3658  ;;  %v1056_v36 = vmul.f32 %v3657_v41, %v4664_v5  ;;  %v2782_v22 = vrot.slane %v2781_v19, 1  ;;  %v2787_v4 = vrot.slane %v2786_v54, 2  ;;  %v2792_v24 = vrot.slane %v2791_v3, 4 }
 0x257   :  { %v3661_v37 = vpop.eup %3660  ;;  %1121 = vadd.xlane.f32.xlu0 %v1066_v12  ;;  %v4935_v10 = vmul.f32 %v3659_v32, %v4664_v5  ;;  %1099 = vadd.xlane.f32.xlu1 %v1055_v44  ;;  %v2754_v12 = vrot.slane %v4851_v52, 5  ;;  %v2798_v32 = vsel %vm2776_vm11, %v2743_v7, 0.0  ;;  %v2753_v55 = vsel %vm2721_vm3, %v2752_v56, %v2751_v26 }
 0x258   :  { %v3663_v31 = vpop.eup %3662  ;;  %v1063_v20 = vmul.f32 %v3661_v37, %v4664_v5  ;;  %v2764_v44 = vrot.slane %v4877_v45, 6  ;;  %v2744_v62 = vrot.slane %v4900_v46, 7  ;;  %v2783_v50 = vadd.f32 %v2782_v22, %v2781_v19 }
 0x259   :  { %v3665_v42 = vpop.eup %3664  ;;  %v1073_v14 = vmul.f32 %v3663_v31, %v4664_v5  ;;  %v2788_v56 = vadd.f32 %v2787_v4, %v2786_v54  ;;  %v2755_v26 = vsel %vm5926_vm0, %v2754_v12, %v2753_v55  ;;  %v2766_v25 = vrot.slane %v4880_v8, 5 }
 0x25a   :  { %v3667_v9 = vpop.eup %3666  ;;  %v1064_v37 = vmul.f32 %v3665_v42, %v4664_v5  ;;  %v2799_v60 = vrot.slane %v2798_v32, 4  ;;  %v2756_v54 = vrot.slane %v4925_v47, 7 }
 0x25b   :  { %v3669_v1 = vpop.eup %3668  ;;  %1101 = vadd.xlane.f32.xlu0 %v1056_v36  ;;  %v4947_v2 = vmul.f32 %v3667_v9, %v4664_v5  ;;  %1115 = vadd.xlane.f32.xlu1 %v1063_v20  ;;  %v2763_v9 = vsel %vm2718_vm15, %v2762_v61, %v4856_v17  ;;  %v2746_v17 = vrot.slane %v4912_v0, 6  ;;  %v2789_v4 = vrot.slane %v2788_v56, 1 }
 0x25c   :  { %v3671_v41 = vpop.eup %3670  ;;  %v1069_v20 = vmul.f32 %v3669_v1, %v4664_v5  ;;  %v2765_v61 = vsel %vm2721_vm3, %v2764_v44, %v2763_v9  ;;  %v2812_v1 = vsel %vm2776_vm11, %v2755_v26, 0.0 }
 0x25d   :  { %v3673_v31 = vpop.eup %3672  ;;  %v1074_v36 = vmul.f32 %v3671_v41, %v4664_v5  ;;  %v2793_v41 = vadd.f32 %v2792_v24, %v2791_v3  ;;  %v2836_v3 = vrot.slane %v2783_v50, %v4418_v43  ;;  %v2767_v12 = vsel %vm5926_vm0, %v2766_v25, %v2765_v61 }
 0x25e   :  { %v3675_v52 = vpop.eup %3674  ;;  %v1070_v19 = vmul.f32 %v3673_v31, %v4664_v5  ;;  %v2826_v50 = vsel %vm2776_vm11, %v2767_v12, 0.0 }
 0x25f   :  { %1117 = vadd.xlane.f32.xlu0 %v1064_v37  ;;  %v1072_v7 = vmul.f32 %v3675_v52, %v4664_v5  ;;  %v4962_v42 = vpop.eup %3676  ;;  %1127 = vadd.xlane.f32.xlu1 %v1069_v20  ;;  %v2745_v52 = vsel %vm2718_vm15, %v2744_v62, %v4894_v13  ;;  %v2794_v5 = vrot.slane %v2793_v41, 2  ;;  %v2800_v62 = vadd.f32 %v2799_v60, %v2798_v32 }
 0x260   :  { %6007 = vst [vmem:[#allocation70_spill] sm:$0xff] %v4962_v42  ;;  %v4966_v39 = vpop.eup %3678  ;;  %v2748_v24 = vrot.slane %v4962_v42, 5  ;;  %v2747_v44 = vsel %vm2721_vm3, %v2746_v17, %v2745_v52  ;;  %v2813_v37 = vrot.slane %v2812_v1, 4  ;;  %3684 = vrcp.f32 %v2836_v3 }
 0x261   :  { %v4972_v22 = vpop.eup %3680  ;;  %v2758_v31 = vrot.slane %v4966_v39, 6  ;;  %v2795_v60 = vadd.f32 %v2794_v5, %v2793_v41  ;;  %v2801_v32 = vrot.slane %v2800_v62, 2  ;;  %v2827_v61 = vrot.slane %v2826_v50, 4 }
 0x262   :  { %6008 = vst [vmem:[#allocation71_spill] sm:$0xff] %v4972_v22  ;;  %v4978_v55 = vpop.eup %3682  ;;  %v2757_v9 = vsel %vm2718_vm15, %v2756_v54, %v4972_v22  ;;  %v2749_v25 = vsel %vm5926_vm0, %v2748_v24, %v2747_v44  ;;  %v2814_v26 = vadd.f32 %v2813_v37, %v2812_v1 }
 0x263   :  { %1129 = vadd.xlane.f32.xlu0 %v1070_v19  ;;  %6009 = vst [vmem:[#allocation72_spill] sm:$0xff] %v4978_v55  ;;  %1123 = vadd.xlane.f32.xlu1 %v4923_v51  ;;  %v2760_v20 = vrot.slane %v4978_v55, 5  ;;  %v2790_v51 = vadd.f32 %v2789_v4, %v2788_v56  ;;  %v2759_v17 = vsel %vm2721_vm3, %v2758_v31, %v2757_v9  ;;  %v2805_v19 = vsel %vm2776_vm11, %v2749_v25, 0.0 }
 0x264   :  { %v2796_v54 = vrot.slane %v2795_v60, 1  ;;  %v2802_v3 = vadd.f32 %v2801_v32, %v2800_v62  ;;  %v2815_v12 = vrot.slane %v2814_v26, 2  ;;  %v2806_v56 = vrot.slane %v2805_v19, 4 }
 0x265   :  { %v2761_v52 = vsel %vm5926_vm0, %v2760_v20, %v2759_v17 }
 0x266   :  { %v2819_v41 = vsel %vm2776_vm11, %v2761_v52, 0.0  ;;  %v2797_v1 = vadd.f32 %v2796_v54, %v2795_v60  ;;  %v2803_v4 = vrot.slane %v2802_v3, 1  ;;  %v2816_v24 = vadd.f32 %v2815_v12, %v2814_v26 }
 0x267   :  { %1125 = vadd.xlane.f32.xlu0 %v4935_v10  ;;  %1135 = vadd.xlane.f32.xlu1 %v1073_v14  ;;  %v2840_v10 = vrot.slane %v2790_v51, %v4418_v43  ;;  %v2828_v14 = vadd.f32 %v2827_v61, %v2826_v50  ;;  %v2820_v44 = vrot.slane %v2819_v41, 4  ;;  %vm1203_vm11 = vcmask 7168  }
 0x268   :  { %v2804_v37 = vadd.f32 %v2803_v4, %v2802_v3  ;;  %v2817_v9 = vrot.slane %v2816_v24, 1 }
 0x269   :  { %3686 = vrcp.f32 %v2840_v10  ;;  %v2829_v5 = vrot.slane %v2828_v14, 2  ;;  %v2821_v20 = vadd.f32 %v2820_v44, %v2819_v41 }
 0x26a   :  { %v2818_v51 = vadd.f32 %v2817_v9, %v2816_v24 }
 0x26b   :  { %1133 = vadd.xlane.f32.xlu0 %v1072_v7  ;;  %1131 = vadd.xlane.f32.xlu1 %v4947_v2  ;;  %v2807_v7 = vadd.f32 %v2806_v56, %v2805_v19  ;;  %v2844_v2 = vrot.slane %v2797_v1, %v4418_v43  ;;  %v2830_v25 = vadd.f32 %v2829_v5, %v2828_v14  ;;  %v2822_v17 = vrot.slane %v2821_v20, 2 }
 0x26c   :  { %v2856_v19 = vrot.slane %v2818_v51, %v4418_v43 }
 0x26d   :  { %v3685_v31 = vpop.eup %3684  ;;  %v2808_v62 = vrot.slane %v2807_v7, 2  ;;  %3688 = vrcp.f32 %v2844_v2  ;;  %v2831_v60 = vrot.slane %v2830_v25, 1  ;;  %v2823_v54 = vadd.f32 %v2822_v17, %v2821_v20 }
 0x26e   :  { %v2867_v50 = vmul.f32 %v3685_v31, %v4583_v11  ;;  %v2869_v26 = vmul.f32 %v3685_v31, %v4621_v58  ;;  %v2866_v11 = vmul.f32 %v3685_v31, %v4608_v15  ;;  %v2868_v1 = vmul.f32 %v3685_v31, %v4597_v30 }
 0x26f   :  { %1137 = vadd.xlane.f32.xlu0 %v1074_v36  ;;  %v2848_v36 = vrot.slane %v2804_v37, %v4418_v43  ;;  %v2809_v32 = vadd.f32 %v2808_v62, %v2807_v7  ;;  %v2832_v52 = vadd.f32 %v2831_v60, %v2830_v25  ;;  %v2824_v56 = vrot.slane %v2823_v54, 1 }
 0x271   :  { %3690 = vrcp.f32 %v2848_v36  ;;  %v2810_v10 = vrot.slane %v2809_v32, 1  ;;  %v2864_v12 = vrot.slane %v2832_v52, %v4418_v43  ;;  %v2825_v24 = vadd.f32 %v2824_v56, %v2823_v54 }
 0x272   :  { %3692 = vrcp.f32 %v2856_v19 }
 0x273   :  { %v2811_v14 = vadd.f32 %v2810_v10, %v2809_v32  ;;  %3694 = vrcp.f32 %v2864_v12 }
 0x275   :  { %v2852_v4 = vrot.slane %v2811_v14, %v4418_v43 }
 0x276   :  { %v3687_v61 = vpop.eup %3686 }
 0x277   :  { %v2872_v3 = vmul.f32 %v3687_v61, %v4635_v29  ;;  %v2874_v58 = vmul.f32 %v3687_v61, %v4658_v48  ;;  %v2871_v5 = vmul.f32 %v3687_v61, %v4645_v57  ;;  %3696 = vrcp.f32 %v2852_v4 }
 0x278   :  { %v2860_v48 = vrot.slane %v2825_v24, %v4418_v43  ;;  %v2873_v7 = vmul.f32 %v3687_v61, %v4653_v6 }
 0x27a   :  { %v3689_v41 = vpop.eup %3688  ;;  %3698 = vrcp.f32 %v2860_v48 }
 0x27b   :  { %v2877_v15 = vmul.f32 %v3689_v41, %v4703_v63  ;;  %v2876_v57 = vmul.f32 %v3689_v41, %v4737_v38 }
 0x27c   :  { %2912 = vperm.xlu1 %3547, %v2867_v50  }
 0x27e   :  { %v5006_v29 = vpop.eup %3690 }
 0x27f   :  { %6010 = vst [vmem:[#allocation73_spill] sm:$0xff] %v5006_v29  ;;  %v2882_v30 = vmul.f32 %v5006_v29, %v4791_v28  ;;  %v5014_v44 = vpop.eup %3692  ;;  %v2878_v28 = vmul.f32 %v3689_v41, %v4744_v49 }
 0x280   :  { %2922 = vperm.xlu1 %3547, %v2869_v26   ;;  %6011 = vst [vmem:[#allocation74_spill] sm:$0xff] %v5014_v44  ;;  %v2892_v63 = vmul.f32 %v5014_v44, %v4844_v21  ;;  %v5019_v31 = vpop.eup %3694 }
 0x281   :  { %6012 = vst [vmem:[#allocation75_spill] sm:$0xff] %v5019_v31  ;;  %v2902_v43 = vmul.f32 %v5019_v31, %v4868_v53  ;;  %v2879_v53 = vmul.f32 %v3689_v41, %v4760_v27  ;;  %v2903_v9 = vmul.f32 %v5019_v31, %v4877_v45 }
 0x284   :  { %2932 = vperm.xlu1 %3547, %v2872_v3   ;;  %v5024_v6 = vpop.eup %3696 }
 0x285   :  { %2907 = vperm.xlu0 %3546, %v2866_v11   ;;  %6013 = vst [vmem:[#allocation76_spill] sm:$0xff] %v5024_v6  ;;  %v2888_v2 = vmul.f32 %v5024_v6, %v4912_v0  ;;  %v2887_v21 = vmul.f32 %v5024_v6, %v4900_v46  ;;  %v2883_v0 = vmul.f32 %v5006_v29, %v4797_v23 }
 0x286   :  { %v2893_v46 = vmul.f32 %v5014_v44, %v4847_v16 }
 0x287   :  { %v5030_v38 = vpop.eup %3698 }
 0x288   :  { %2942 = vperm.xlu1 %3547, %v2874_v58   ;;  %6014 = vst [vmem:[#allocation77_spill] sm:$0xff] %v5030_v38  ;;  %v2898_v37 = vmul.f32 %v5030_v38, %v4966_v39  ;;  %v2897_v49 = vmul.f32 %v5030_v38, %v4925_v47  ;;  %v2881_v47 = vmul.f32 %v5006_v29, %v4780_v18 }
 0x289   :  { %2917 = vperm.xlu0 %3546, %v2868_v1  }
 0x28c   :  { %2952 = vperm.xlu1 %3547, %v2877_v15  }
 0x28d   :  { %2927 = vperm.xlu0 %3546, %v2871_v5  }
 0x290   :  { %2972 = vperm.xlu1 %3547, %v2882_v30  }
 0x291   :  { %2937 = vperm.xlu0 %3546, %v2873_v7  }
 0x294   :  { %3012 = vperm.xlu1 %3547, %v2892_v63  }
 0x295   :  { %2947 = vperm.xlu0 %3546, %v2876_v57  }
 0x298   :  { %3052 = vperm.xlu1 %3547, %v2902_v43  }
 0x299   :  { %2957 = vperm.xlu0 %3546, %v2878_v28  }
 0x29c   :  { %2997 = vperm.xlu1 %3547, %v2888_v2  }
 0x29d   :  { %2992 = vperm.xlu0 %3546, %v2887_v21  }
 0x2a0   :  { %3037 = vperm.xlu1 %3547, %v2898_v37  }
 0x2a1   :  { %3032 = vperm.xlu0 %3546, %v2897_v49  }
 0x2a4   :  { %2962 = vperm.xlu1 %3547, %v2879_v53  }
 0x2a5   :  { %2977 = vperm.xlu0 %3546, %v2883_v0  }
 0x2a9   :  { %3017 = vperm.xlu0 %3546, %v2893_v46  }
 0x2ad   :  { %v1080_v39 = vpop.xlane.xlu0 %1079  ;;  %3057 = vperm.xlu0 %3546, %v2903_v9  }
 0x2ae   :  { %v1173_v27 = vsel %vm1141_vm5, %v1080_v39, -1e+30 }
 0x2af   :  { %v1218_v23 = vsel %vm1203_vm11, %v1173_v27, -inf }
 0x2b0   :  { %v1219_v25 = vrot.slane %v1218_v23, 4 }
 0x2b1   :  { %v1076_v62 = vpop.xlane.xlu0 %1075  ;;  %2967 = vperm.xlu0 %3546, %v2881_v47  }
 0x2b2   :  { %v1220_v20 = vmax.f32 %v1218_v23, %v1219_v25  ;;  %v1171_v16 = vsel %vm1139_vm4, %v1076_v62, -1e+30 }
 0x2b3   :  { %v1204_v45 = vsel %vm1203_vm11, %v1171_v16, -inf  ;;  %v1078_v50 = vpop.xlane.xlu1 %1077 }
 0x2b4   :  { %v1221_v36 = vrot.slane %v1220_v20, 2  ;;  %v1205_v51 = vrot.slane %v1204_v45, 4  ;;  %v1172_v18 = vsel %vm1140_vm2, %v1078_v50, -1e+30 }
 0x2b5   :  { %v1211_v60 = vsel %vm1203_vm11, %v1172_v18, -inf  ;;  %v1082_v32 = vpop.xlane.xlu0 %1081 }
 0x2b6   :  { %v1222_v17 = vmax.f32 %v1220_v20, %v1221_v36  ;;  %v1206_v26 = vmax.f32 %v1204_v45, %v1205_v51  ;;  %v1212_v61 = vrot.slane %v1211_v60, 4  ;;  %v1174_v19 = vsel %vm1142_vm8, %v1082_v32, -1e+30 }
 0x2b7   :  { %v1225_v52 = vsel %vm1203_vm11, %v1174_v19, -inf }
 0x2b8   :  { %v1223_v10 = vrot.slane %v1222_v17, 1  ;;  %v1207_v54 = vrot.slane %v1206_v26, 2  ;;  %v1213_v3 = vmax.f32 %v1211_v60, %v1212_v61  ;;  %v1226_v11 = vrot.slane %v1225_v52, 4  ;;  %v1088_v12 = vpop.xlane.xlu1 %1087 }
 0x2b9   :  { %v5059_v14 = vsel %vm1145_vm9, %v1088_v12, -1e+30 }
 0x2ba   :  { %v1224_v56 = vmax.f32 %v1222_v17, %v1223_v10  ;;  %v1208_v58 = vmax.f32 %v1206_v26, %v1207_v54  ;;  %v1214_v41 = vrot.slane %v1213_v3, 2  ;;  %v1227_v1 = vmax.f32 %v1225_v52, %v1226_v11 }
 0x2bb   :  { %v1246_v4 = vsel %vm1203_vm11, %v5059_v14, -inf }
 0x2bc   :  { %v1430_v24 = vsub.f32 %v1173_v27, %v1224_v56  ;;  %v1209_v15 = vrot.slane %v1208_v58, 1  ;;  %v1215_v5 = vmax.f32 %v1213_v3, %v1214_v41  ;;  %v1228_v48 = vrot.slane %v1227_v1, 2  ;;  %v1084_v30 = vpop.xlane.xlu1 %1083  ;;  %v1090_v7 = vpop.xlane.xlu0 %1089 }
 0x2bd   :  { %v1247_v63 = vrot.slane %v1246_v4, 4  ;;  %v5065_v43 = vsel %vm1143_vm6, %v1084_v30, -1e+30  ;;  %v5069_v2 = vsel %vm1146_vm10, %v1090_v7, -1e+30 }
 0x2be   :  { %v1464_v21 = vmul.f32 1.442695, %v1430_v24  ;;  %v1210_v37 = vmax.f32 %v1208_v58, %v1209_v15  ;;  %v1216_v49 = vrot.slane %v1215_v5, 1  ;;  %v1229_v53 = vmax.f32 %v1227_v1, %v1228_v48 }
 0x2bf   :  { %v1248_v0 = vmax.f32 %v1246_v4, %v1247_v63  ;;  %v1232_v46 = vsel %vm1203_vm11, %v5065_v43, -inf  ;;  %v1253_v9 = vsel %vm1203_vm11, %v5069_v2, -inf }
 0x2c0   :  { %3700 = vpow2.f32 %v1464_v21  ;;  %v1428_v39 = vsub.f32 %v1171_v16, %v1210_v37  ;;  %v1217_v47 = vmax.f32 %v1215_v5, %v1216_v49  ;;  %v1230_v27 = vrot.slane %v1229_v53, 1  ;;  %v1096_v23 = vpop.xlane.xlu1 %1095  ;;  %v1086_v25 = vpop.xlane.xlu0 %1085 }
 0x2c1   :  { %v1249_v62 = vrot.slane %v1248_v0, 2  ;;  %v1233_v20 = vrot.slane %v1232_v46, 4  ;;  %v1254_v45 = vrot.slane %v1253_v9, 4  ;;  %v1181_v36 = vsel %vm1149_vm13, %v1096_v23, -1e+30 }
 0x2c2   :  { %v1429_v51 = vsub.f32 %v1172_v18, %v1217_v47  ;;  %v1231_v60 = vmax.f32 %v1229_v53, %v1230_v27  ;;  %v1274_v32 = vsel %vm1203_vm11, %v1181_v36, -inf  ;;  %v1460_v10 = vmul.f32 1.442695, %v1428_v39 }
 0x2c3   :  { %v1250_v17 = vmax.f32 %v1248_v0, %v1249_v62  ;;  %v1234_v26 = vmax.f32 %v1232_v46, %v1233_v20  ;;  %v1255_v61 = vmax.f32 %v1253_v9, %v1254_v45  ;;  %v1275_v52 = vrot.slane %v1274_v32, 4 }
 0x2c4   :  { %v1431_v16 = vsub.f32 %v1174_v19, %v1231_v60  ;;  %v5080_v3 = vsel %vm1144_vm7, %v1086_v25, -1e+30  ;;  %v1098_v11 = vpop.xlane.xlu0 %1097  ;;  %v1462_v1 = vmul.f32 1.442695, %v1429_v51  ;;  %3702 = vpow2.f32 %v1460_v10 }
 0x2c5   :  { %v1251_v12 = vrot.slane %v1250_v17, 1  ;;  %v1235_v56 = vrot.slane %v1234_v26, 2  ;;  %v1256_v58 = vrot.slane %v1255_v61, 2  ;;  %v1276_v41 = vmax.f32 %v1274_v32, %v1275_v52 }
 0x2c6   :  { %v1239_v18 = vsel %vm1203_vm11, %v5080_v3, -inf  ;;  %v5086_v24 = vsel %vm1150_vm14, %v1098_v11, -1e+30  ;;  %v1466_v30 = vmul.f32 1.442695, %v1431_v16  ;;  %3704 = vpow2.f32 %v1462_v1 }
 0x2c7   :  { %v1252_v15 = vmax.f32 %v1250_v17, %v1251_v12  ;;  %v1236_v5 = vmax.f32 %v1234_v26, %v1235_v56  ;;  %v1257_v19 = vmax.f32 %v1255_v61, %v1256_v58  ;;  %v1277_v48 = vrot.slane %v1276_v41, 2 }
 0x2c8   :  { %v1240_v7 = vrot.slane %v1239_v18, 4  ;;  %v1281_v63 = vsel %vm1203_vm11, %v5086_v24, -inf  ;;  %3706 = vpow2.f32 %v1466_v30 }
 0x2c9   :  { %v1434_v21 = vsub.f32 %v5059_v14, %v1252_v15  ;;  %v1237_v37 = vrot.slane %v1236_v5, 1  ;;  %v1258_v49 = vrot.slane %v1257_v19, 1  ;;  %v1278_v53 = vmax.f32 %v1276_v41, %v1277_v48  ;;  %v6022_v48 = vld [vmem:[#allocation40_spill] sm:$0xff] }
 0x2ca   :  { %v1241_v0 = vmax.f32 %v1239_v18, %v1240_v7  ;;  %v1282_v46 = vrot.slane %v1281_v63, 4 }
 0x2cb   :  { %v1472_v9 = vmul.f32 1.442695, %v1434_v21  ;;  %v1238_v39 = vmax.f32 %v1236_v5, %v1237_v37  ;;  %v1259_v47 = vmax.f32 %v1257_v19, %v1258_v49  ;;  %v1279_v27 = vrot.slane %v1278_v53, 1 }
 0x2cc   :  { %v1242_v23 = vrot.slane %v1241_v0, 2  ;;  %v1283_v25 = vmax.f32 %v1281_v63, %v1282_v46  ;;  %v1112_v51 = vpop.xlane.xlu1 %1111 }
 0x2cd   :  { %v3701_v62 = vpop.eup %3700  ;;  %3708 = vpow2.f32 %v1472_v9  ;;  %v1432_v20 = vsub.f32 %v5065_v43, %v1238_v39  ;;  %v1435_v45 = vsub.f32 %v5069_v2, %v1259_v47  ;;  %v1280_v14 = vmax.f32 %v1278_v53, %v1279_v27  ;;  %v6024_v27 = vld [vmem:[#allocation41_spill] sm:$0xff] }
 0x2ce   :  { %v1243_v60 = vmax.f32 %v1241_v0, %v1242_v23  ;;  %v1284_v32 = vrot.slane %v1283_v25, 2  ;;  %v5095_v26 = vsel %vm1157_vm12, %v1112_v51, -1e+30  ;;  %v5099_v61 = vsel %vm1141_vm5, %v3701_v62, 0.0 }
 0x2cf   :  { %v1468_v52 = vmul.f32 1.442695, %v1432_v20  ;;  %v1474_v10 = vmul.f32 1.442695, %v1435_v45  ;;  %v1438_v16 = vsub.f32 %v1181_v36, %v1280_v14  ;;  %v1330_v43 = vsel %vm1203_vm11, %v5095_v26, -inf  ;;  %v6026_v45 = vld [vmem:[#allocation56_spill] sm:$0xff] }
 0x2d0   :  { %v1244_v11 = vrot.slane %v1243_v60, 1  ;;  %v1285_v2 = vmax.f32 %v1283_v25, %v1284_v32  ;;  %v1331_v12 = vrot.slane %v1330_v43, 4  ;;  %v1114_v56 = vpop.xlane.xlu0 %1113  ;;  %v1570_v58 = vsel %vm1203_vm11, %v5099_v61, 0.0  ;;  %v1092_v1 = vpop.xlane.xlu1 %1091 }
 0x2d1   :  { %3710 = vpow2.f32 %v1468_v52  ;;  %v1480_v41 = vmul.f32 1.442695, %v1438_v16  ;;  %v5107_v35 = vsel %vm1158_vm1, %v1114_v56, -1e+30  ;;  %v1571_v15 = vrot.slane %v1570_v58, 4  ;;  %v5120_v46 = vpop.eup %3702 }
 0x2d2   :  { %3712 = vpow2.f32 %v1474_v10  ;;  %v1245_v36 = vmax.f32 %v1243_v60, %v1244_v11  ;;  %v1286_v5 = vrot.slane %v1285_v2, 1  ;;  %v1332_v19 = vmax.f32 %v1330_v43, %v1331_v12 }
 0x2d3   :  { %3714 = vpow2.f32 %v1480_v41  ;;  %vm6023_vm5 = vcmp.gt.f32.partialorder %v6022_v48, 0.5  ;;  %v1337_v7 = vsel %vm1203_vm11, %v5107_v35, -inf  ;;  %v5115_v63 = vadd.f32 %v1571_v15, %v1570_v58  ;;  %v5132_v51 = vpop.eup %3704 }
 0x2d4   :  { %v5111_v30 = vsel %vm6023_vm5, %v1092_v1, -1e+30  ;;  %v1433_v21 = vsub.f32 %v5080_v3, %v1245_v36  ;;  %v1287_v37 = vmax.f32 %v1285_v2, %v1286_v5  ;;  %v1333_v49 = vrot.slane %v1332_v19, 2  ;;  %v1094_v0 = vpop.xlane.xlu0 %1093  ;;  %v1108_v47 = vpop.xlane.xlu1 %1107  ;;  %v6028_v1 = vld [vmem:[#allocation57_spill] sm:$0xff] }
 0x2d5   :  { %v1260_v53 = vsel %vm1203_vm11, %v5111_v30, -inf  ;;  %v1338_v39 = vrot.slane %v1337_v7, 4  ;;  %vm6025_vm5 = vcmp.gt.f32.partialorder %v6024_v27, 0.5  ;;  %vm6027_vm0 = vcmp.gt.f32.partialorder %v6026_v45, 0.5  ;;  %v5138_v2 = vpop.eup %3706 }
 0x2d6   :  { %v1261_v9 = vrot.slane %v1260_v53, 4  ;;  %v5124_v23 = vsel %vm6025_vm5, %v1094_v0, -1e+30  ;;  %v1470_v62 = vmul.f32 1.442695, %v1433_v21  ;;  %v1439_v3 = vsub.f32 %v5086_v24, %v1287_v37 }
 0x2d7   :  { %v1334_v20 = vmax.f32 %v1332_v19, %v1333_v49  ;;  %v5130_v14 = vsel %vm6027_vm0, %v1108_v47, -1e+30  ;;  %v1339_v32 = vmax.f32 %v1337_v7, %v1338_v39  ;;  %v1267_v10 = vsel %vm1203_vm11, %v5124_v23, -inf  ;;  %v6030_v7 = vld [vmem:[#allocation46_spill] sm:$0xff] }
 0x2d8   :  { %v1262_v60 = vmax.f32 %v1260_v53, %v1261_v9  ;;  %v1316_v52 = vsel %vm1203_vm11, %v5130_v14, -inf  ;;  %3716 = vpow2.f32 %v1470_v62  ;;  %v1482_v16 = vmul.f32 1.442695, %v1439_v3  ;;  %v1110_v24 = vpop.xlane.xlu0 %1109  ;;  %v1104_v41 = vpop.xlane.xlu1 %1103 }
 0x2d9   :  { %v1335_v43 = vrot.slane %v1334_v20, 1  ;;  %v1317_v11 = vrot.slane %v1316_v52, 4  ;;  %v1340_v56 = vrot.slane %v1339_v32, 2  ;;  %v1268_v58 = vrot.slane %v1267_v10, 4 }
 0x2da   :  { %v1263_v12 = vrot.slane %v1262_v60, 2  ;;  %vm6029_vm0 = vcmp.gt.f32.partialorder %v6028_v1, 0.5  ;;  %v5144_v36 = vpop.eup %3708  ;;  %3718 = vpow2.f32 %v1482_v16  ;;  %vm6031_vm5 = vcmp.gt.f32.partialorder %v6030_v7, 0.5 }
 0x2db   :  { %v5142_v15 = vsel %vm6029_vm0, %v1110_v24, -1e+30  ;;  %v1336_v5 = vmax.f32 %v1334_v20, %v1335_v43  ;;  %v1318_v19 = vmax.f32 %v1316_v52, %v1317_v11  ;;  %v5148_v21 = vsel %vm6031_vm5, %v1104_v41, -1e+30 }
 0x2dc   :  { %v1264_v37 = vmax.f32 %v1262_v60, %v1263_v12  ;;  %v1341_v49 = vmax.f32 %v1339_v32, %v1340_v56  ;;  %v1269_v53 = vmax.f32 %v1267_v10, %v1268_v58  ;;  %v1302_v0 = vsel %vm1203_vm11, %v5148_v21, -inf  ;;  %v1106_v3 = vpop.xlane.xlu0 %1105  ;;  %v1120_v11 = vpop.xlane.xlu1 %1119  ;;  %v6032_v12 = vld [vmem:[#allocation50_spill] sm:$0xff] }
 0x2dd   :  { %v1446_v9 = vsub.f32 %v5095_v26, %v1336_v5  ;;  %v1319_v39 = vrot.slane %v1318_v19, 2  ;;  %v1303_v47 = vrot.slane %v1302_v0, 4  ;;  %v1323_v62 = vsel %vm1203_vm11, %v5142_v15, -inf }
 0x2de   :  { %v1265_v20 = vrot.slane %v1264_v37, 1  ;;  %v1342_v52 = vrot.slane %v1341_v49, 1  ;;  %v1270_v16 = vrot.slane %v1269_v53, 2  ;;  %v1324_v43 = vrot.slane %v1323_v62, 4  ;;  %v5155_v24 = vpop.eup %3710 }
 0x2df   :  { %v1496_v60 = vmul.f32 1.442695, %v1446_v9  ;;  %v1320_v32 = vmax.f32 %v1318_v19, %v1319_v39  ;;  %v1304_v10 = vmax.f32 %v1302_v0, %v1303_v47  ;;  %vm6033_vm0 = vcmp.gt.f32.partialorder %v6032_v12, 0.5  ;;  %v5161_v26 = vpop.eup %3712 }
 0x2e0   :  { %v5159_v56 = vsel %vm6033_vm0, %v1120_v11, -1e+30  ;;  %v1266_v58 = vmax.f32 %v1264_v37, %v1265_v20  ;;  %v1343_v41 = vmax.f32 %v1341_v49, %v1342_v52  ;;  %v1271_v5 = vmax.f32 %v1269_v53, %v1270_v16  ;;  %v5163_v8 = vpop.eup %3714  ;;  %v1122_v19 = vpop.xlane.xlu0 %1121  ;;  %v6034_v53 = vld [vmem:[#allocation47_spill] sm:$0xff] }
 0x2e1   :  { %v1325_v25 = vmax.f32 %v1323_v62, %v1324_v43  ;;  %3720 = vpow2.f32 %v1496_v60  ;;  %v1321_v55 = vrot.slane %v1320_v32, 1  ;;  %v1305_v31 = vrot.slane %v1304_v10, 2  ;;  %v1100_v20 = vpop.xlane.xlu1 %1099 }
 0x2e2   :  { %v1358_v9 = vsel %vm1203_vm11, %v5159_v56, -inf  ;;  %v1436_v0 = vsub.f32 %v5111_v30, %v1266_v58  ;;  %v1447_v39 = vsub.f32 %v5107_v35, %v1343_v41  ;;  %v1272_v47 = vrot.slane %v1271_v5, 1 }
 0x2e3   :  { %v1326_v11 = vrot.slane %v1325_v25, 2  ;;  %v1322_v42 = vmax.f32 %v1320_v32, %v1321_v55  ;;  %v1306_v37 = vmax.f32 %v1304_v10, %v1305_v31  ;;  %v1359_v49 = vrot.slane %v1358_v9, 4 }
 0x2e4   :  { %vm6035_vm5 = vcmp.gt.f32.partialorder %v6034_v53, 0.5  ;;  %v1476_v52 = vmul.f32 1.442695, %v1436_v0  ;;  %v1498_v16 = vmul.f32 1.442695, %v1447_v39  ;;  %v1273_v43 = vmax.f32 %v1271_v5, %v1272_v47  ;;  %v1102_v5 = vpop.xlane.xlu0 %1101  ;;  %v6036_v0 = vld [vmem:[#allocation44_spill] sm:$0xff] }
 0x2e5   :  { %v5171_v62 = vsel %vm6035_vm5, %v1106_v3, -1e+30  ;;  %v1327_v60 = vmax.f32 %v1325_v25, %v1326_v11  ;;  %v1444_v38 = vsub.f32 %v5130_v14, %v1322_v42  ;;  %v1307_v22 = vrot.slane %v1306_v37, 1  ;;  %v5176_v58 = vpop.eup %3716  ;;  %v6051_v53 = vld [vmem:[#allocation59_spill] sm:$0xff] }
 0x2e6   :  { %v1360_v30 = vmax.f32 %v1358_v9, %v1359_v49  ;;  %v1309_v35 = vsel %vm1203_vm11, %v5171_v62, -inf  ;;  %3722 = vpow2.f32 %v1476_v52  ;;  %v1437_v55 = vsub.f32 %v5124_v23, %v1273_v43  ;;  %v6038_v43 = vld [vmem:[#allocation53_spill] sm:$0xff] }
 0x2e7   :  { %v1328_v31 = vrot.slane %v1327_v60, 1  ;;  %v1310_v3 = vrot.slane %v1309_v35, 4  ;;  %3724 = vpow2.f32 %v1498_v16  ;;  %v1492_v32 = vmul.f32 1.442695, %v1444_v38  ;;  %v5179_v25 = vpop.eup %3718  ;;  %v1116_v38 = vpop.xlane.xlu1 %1115 }
 0x2e8   :  { %v1308_v10 = vmax.f32 %v1306_v37, %v1307_v22  ;;  %v1361_v41 = vrot.slane %v1360_v30, 2  ;;  %v1478_v42 = vmul.f32 1.442695, %v1437_v55  ;;  %vm6037_vm0 = vcmp.gt.f32.partialorder %v6036_v0, 0.5 }
 0x2e9   :  { %v1329_v14 = vmax.f32 %v1327_v60, %v1328_v31  ;;  %v1311_v9 = vmax.f32 %v1309_v35, %v1310_v3  ;;  %v5183_v39 = vsel %vm6037_vm0, %v1100_v20, -1e+30  ;;  %3726 = vpow2.f32 %v1492_v32  ;;  %v6041_v32 = vld [vmem:[#allocation48_spill] sm:$0xff] }
 0x2ea   :  { %v1442_v47 = vsub.f32 %v5148_v21, %v1308_v10  ;;  %v1362_v23 = vmax.f32 %v1360_v30, %v1361_v41  ;;  %v1288_v11 = vsel %vm1203_vm11, %v5183_v39, -inf  ;;  %3728 = vpow2.f32 %v1478_v42 }
 0x2eb   :  { %v1445_v22 = vsub.f32 %v5142_v15, %v1329_v14  ;;  %v1312_v37 = vrot.slane %v1311_v9, 2  ;;  %v1289_v49 = vrot.slane %v1288_v11, 4  ;;  %vm6039_vm5 = vcmp.gt.f32.partialorder %v6038_v43, 0.5 }
 0x2ec   :  { %v1488_v52 = vmul.f32 1.442695, %v1442_v47  ;;  %v1363_v16 = vrot.slane %v1362_v23, 1  ;;  %v5191_v60 = vsel %vm6039_vm5, %v1122_v19, -1e+30  ;;  %v6040_v20 = vrot.slane %v5115_v63, 2  ;;  %v1118_v19 = vpop.xlane.xlu0 %1117 }
 0x2ed   :  { %v1494_v30 = vmul.f32 1.442695, %v1445_v22  ;;  %v1313_v35 = vmax.f32 %v1311_v9, %v1312_v37  ;;  %v1290_v55 = vmax.f32 %v1288_v11, %v1289_v49  ;;  %v1365_v31 = vsel %vm1203_vm11, %v5191_v60, -inf  ;;  %v6043_v22 = vld [vmem:[#allocation45_spill] sm:$0xff]  ;;  %v1128_v37 = vpop.xlane.xlu1 %1127 }
 0x2ee   :  { %v5196_v21 = vadd.f32 %v6040_v20, %v5115_v63  ;;  %3730 = vpow2.f32 %v1488_v52  ;;  %v1364_v15 = vmax.f32 %v1362_v23, %v1363_v16  ;;  %v1366_v3 = vrot.slane %v1365_v31, 4  ;;  %v5204_v41 = vpop.eup %3720  ;;  %v6045_v16 = vld [vmem:[#allocation49_spill] sm:$0xff] }
 0x2ef   :  { %vm6042_vm0 = vcmp.gt.f32.partialorder %v6041_v32, 0.5  ;;  %3732 = vpow2.f32 %v1494_v30  ;;  %v1314_v42 = vrot.slane %v1313_v35, 1  ;;  %v1291_v63 = vrot.slane %v1290_v55, 2 }
 0x2f0   :  { %v5202_v10 = vsel %vm6042_vm0, %v1116_v38, -1e+30  ;;  %v1450_v9 = vsub.f32 %v5159_v56, %v1364_v15  ;;  %v1367_v47 = vmax.f32 %v1365_v31, %v1366_v3  ;;  %vm6044_vm5 = vcmp.gt.f32.partialorder %v6043_v22, 0.5  ;;  %v6047_v3 = vld [vmem:[#allocation62_spill] sm:$0xff] }
 0x2f1   :  { %v1344_v14 = vsel %vm1203_vm11, %v5202_v10, -inf  ;;  %v5211_v23 = vsel %vm6044_vm5, %v1102_v5, -1e+30  ;;  %v1315_v38 = vmax.f32 %v1313_v35, %v1314_v42  ;;  %v1292_v49 = vmax.f32 %v1290_v55, %v1291_v63  ;;  %v1124_v22 = vpop.xlane.xlu1 %1123 }
 0x2f2   :  { %v1345_v11 = vrot.slane %v1344_v14, 4  ;;  %v1295_v52 = vsel %vm1203_vm11, %v5211_v23, -inf  ;;  %vm6046_vm0 = vcmp.gt.f32.partialorder %v6045_v16, 0.5  ;;  %v1504_v30 = vmul.f32 1.442695, %v1450_v9  ;;  %v1130_v9 = vpop.xlane.xlu0 %1129 }
 0x2f3   :  { %v5217_v20 = vsel %vm6046_vm0, %v1118_v19, -1e+30  ;;  %v1368_v29 = vrot.slane %v1367_v47, 2  ;;  %v1296_v56 = vrot.slane %v1295_v52, 4  ;;  %v1443_v31 = vsub.f32 %v5171_v62, %v1315_v38  ;;  %v5226_v55 = vpop.eup %3722 }
 0x2f4   :  { %v1346_v44 = vmax.f32 %v1344_v14, %v1345_v11  ;;  %v1293_v15 = vrot.slane %v1292_v49, 1  ;;  %v1351_v5 = vsel %vm1203_vm11, %v5217_v20, -inf  ;;  %vm6048_vm5 = vcmp.gt.f32.partialorder %v6047_v3, 0.5  ;;  %v5228_v6 = vpop.eup %3724 }
 0x2f5   :  { %v5224_v35 = vsel %vm6048_vm5, %v1128_v37, -1e+30  ;;  %3734 = vpow2.f32 %v1504_v30  ;;  %v1369_v42 = vmax.f32 %v1367_v47, %v1368_v29  ;;  %v1297_v63 = vmax.f32 %v1295_v52, %v1296_v56  ;;  %v6049_v52 = vld [vmem:[#allocation63_spill] sm:$0xff] }
 0x2f6   :  { %v1347_v19 = vrot.slane %v1346_v44, 2  ;;  %v1490_v14 = vmul.f32 1.442695, %v1443_v31  ;;  %v1294_v11 = vmax.f32 %v1292_v49, %v1293_v15  ;;  %v1352_v62 = vrot.slane %v1351_v5, 4  ;;  %v5232_v32 = vpop.eup %3726 }
 0x2f7   :  { %v1386_v38 = vsel %vm1203_vm11, %v5224_v35, -inf  ;;  %v1370_v13 = vrot.slane %v1369_v42, 1  ;;  %v1298_v3 = vrot.slane %v1297_v63, 2  ;;  %vm6050_vm0 = vcmp.gt.f32.partialorder %v6049_v52, 0.5  ;;  %v5239_v49 = vpop.eup %3728 }
 0x2f8   :  { %v1348_v16 = vmax.f32 %v1346_v44, %v1347_v19  ;;  %v1387_v37 = vrot.slane %v1386_v38, 4  ;;  %3736 = vpow2.f32 %v1490_v14  ;;  %v1440_v29 = vsub.f32 %v5183_v39, %v1294_v11 }
 0x2f9   :  { %v1353_v47 = vmax.f32 %v1351_v5, %v1352_v62  ;;  %v5237_v30 = vsel %vm6050_vm0, %v1130_v9, -1e+30  ;;  %v1371_v56 = vmax.f32 %v1369_v42, %v1370_v13  ;;  %v1299_v15 = vmax.f32 %v1297_v63, %v1298_v3  ;;  %v1126_v62 = vpop.xlane.xlu0 %1125 }
 0x2fa   :  { %v1349_v31 = vrot.slane %v1348_v16, 1  ;;  %v1388_v43 = vmax.f32 %v1386_v38, %v1387_v37  ;;  %v1484_v44 = vmul.f32 1.442695, %v1440_v29  ;;  %v1393_v0 = vsel %vm1203_vm11, %v5237_v30, -inf }
 0x2fb   :  { %v1354_v19 = vrot.slane %v1353_v47, 2  ;;  %vm6052_vm5 = vcmp.gt.f32.partialorder %v6051_v53, 0.5  ;;  %v1451_v39 = vsub.f32 %v5191_v60, %v1371_v56  ;;  %v1300_v9 = vrot.slane %v1299_v15, 1  ;;  %v5248_v52 = vpop.eup %3730 }
 0x2fc   :  { %v5245_v14 = vsel %vm6052_vm5, %v1124_v22, -1e+30  ;;  %v1350_v5 = vmax.f32 %v1348_v16, %v1349_v31  ;;  %v1389_v11 = vrot.slane %v1388_v43, 2  ;;  %3738 = vpow2.f32 %v1484_v44  ;;  %v5252_v63 = vpop.eup %3732  ;;  %v6054_v31 = vld [vmem:[#allocation60_spill] sm:$0xff] }
 0x2fd   :  { %v1355_v13 = vmax.f32 %v1353_v47, %v1354_v19  ;;  %v1394_v3 = vrot.slane %v1393_v0, 4  ;;  %v1372_v42 = vsel %vm1203_vm11, %v5245_v14, -inf  ;;  %6053 = vst [vmem:[#allocation37_spill] sm:$0xff] %v5252_v63  ;;  %v1506_v38 = vmul.f32 1.442695, %v1451_v39 }
 0x2fe   :  { %v1448_v22 = vsub.f32 %v5202_v10, %v1350_v5  ;;  %v1301_v37 = vmax.f32 %v1299_v15, %v1300_v9  ;;  %v1390_v29 = vmax.f32 %v1388_v43, %v1389_v11  ;;  %v1373_v56 = vrot.slane %v1372_v42, 4  ;;  %v1136_v15 = vpop.xlane.xlu1 %1135 }
 0x2ff   :  { %v1356_v60 = vrot.slane %v1355_v13, 1  ;;  %v1395_v16 = vmax.f32 %v1393_v0, %v1394_v3  ;;  %vm6055_vm0 = vcmp.gt.f32.partialorder %v6054_v31, 0.5  ;;  %3740 = vpow2.f32 %v1506_v38  ;;  %v1134_v3 = vpop.xlane.xlu0 %1133  ;;  %v6056_v38 = vld [vmem:[#allocation54_spill] sm:$0xff] }
 0x300   :  { %v5257_v53 = vsel %vm6055_vm0, %v1126_v62, -1e+30  ;;  %v1500_v47 = vmul.f32 1.442695, %v1448_v22  ;;  %v1441_v44 = vsub.f32 %v5211_v23, %v1301_v37  ;;  %v1391_v19 = vrot.slane %v1390_v29, 1 }
 0x301   :  { %v1357_v12 = vmax.f32 %v1355_v13, %v1356_v60  ;;  %v1396_v1 = vrot.slane %v1395_v16, 2  ;;  %v1374_v63 = vmax.f32 %v1372_v42, %v1373_v56  ;;  %v1379_v10 = vsel %vm1203_vm11, %v5257_v53, -inf }
 0x302   :  { %3742 = vpow2.f32 %v1500_v47  ;;  %v1486_v43 = vmul.f32 1.442695, %v1441_v44  ;;  %v1392_v0 = vmax.f32 %v1390_v29, %v1391_v19  ;;  %v1380_v39 = vrot.slane %v1379_v10, 4  ;;  %v5262_v5 = vpop.eup %3734 }
 0x303   :  { %v1449_v9 = vsub.f32 %v5217_v20, %v1357_v12  ;;  %v1397_v11 = vmax.f32 %v1395_v16, %v1396_v1  ;;  %v1375_v62 = vrot.slane %v1374_v63, 2  ;;  %v1575_v23 = vrot.slane %v5196_v21, 1  ;;  %v6058_v16 = vld [vmem:[#allocation52_spill] sm:$0xff] }
 0x304   :  { %3744 = vpow2.f32 %v1486_v43  ;;  %v1454_v13 = vsub.f32 %v5224_v35, %v1392_v0  ;;  %v1381_v42 = vmax.f32 %v1379_v10, %v1380_v39  ;;  %vm6057_vm5 = vcmp.gt.f32.partialorder %v6056_v38, 0.5 }
 0x305   :  { %v5269_v22 = vsel %vm6057_vm5, %v1136_v15, -1e+30  ;;  %v1502_v37 = vmul.f32 1.442695, %v1449_v9  ;;  %v1398_v29 = vrot.slane %v1397_v11, 1  ;;  %v1376_v60 = vmax.f32 %v1374_v63, %v1375_v62  ;;  %v5272_v47 = vpop.eup %3736 }
 0x306   :  { %v1576_v56 = vadd.f32 %v1575_v23, %v5196_v21  ;;  %v1512_v1 = vmul.f32 1.442695, %v1454_v13  ;;  %v1382_v12 = vrot.slane %v1381_v42, 2  ;;  %v1414_v20 = vsel %vm1203_vm11, %v5269_v22, -inf  ;;  %v1132_v21 = vpop.xlane.xlu1 %1131 }
 0x307   :  { %vm6059_vm0 = vcmp.gt.f32.partialorder %v6058_v16, 0.5  ;;  %3746 = vpow2.f32 %v1502_v37  ;;  %v1399_v44 = vmax.f32 %v1397_v11, %v1398_v29  ;;  %v1377_v19 = vrot.slane %v1376_v60, 1  ;;  %v6060_v37 = vld [vmem:[#allocation51_spill] sm:$0xff] }
 0x308   :  { %v5278_v35 = vsel %vm6059_vm0, %v1134_v3, -1e+30  ;;  %vm1782_vm5 = vcmp.gt.f32.partialorder %v1576_v56, 0.0  ;;  %3748 = vpow2.f32 %v1512_v1  ;;  %v1383_v10 = vmax.f32 %v1381_v42, %v1382_v12 }
 0x309   :  { %v1814_v63 = vsel %vm1782_vm5, %v1576_v56, 1.0  ;;  %v1415_v15 = vrot.slane %v1414_v20, 4  ;;  %v1455_v43 = vsub.f32 %v5237_v30, %v1399_v44  ;;  %v1378_v0 = vmax.f32 %v1376_v60, %v1377_v19  ;;  %v5283_v9 = vpop.eup %3738 }
 0x30a   :  { %3750 = vrcp.f32 %v1814_v63  ;;  %v1407_v39 = vsel %vm1203_vm11, %v5278_v35, -inf  ;;  %v1384_v62 = vrot.slane %v1383_v10, 1  ;;  %v5288_v11 = vsel %vm1139_vm4, %v5120_v46, 0.0 }
 0x30b   :  { %v1416_v23 = vmax.f32 %v1414_v20, %v1415_v15  ;;  %v1408_v3 = vrot.slane %v1407_v39, 4  ;;  %v1514_v13 = vmul.f32 1.442695, %v1455_v43  ;;  %v1452_v42 = vsub.f32 %v5245_v14, %v1378_v0  ;;  %v1138_v20 = vpop.xlane.xlu0 %1137 }
 0x30c   :  { %v1556_v30 = vsel %vm1203_vm11, %v5288_v11, 0.0  ;;  %vm6061_vm0 = vcmp.gt.f32.partialorder %v6060_v37, 0.5  ;;  %v1385_v60 = vmax.f32 %v1383_v10, %v1384_v62  ;;  %v5297_v44 = vpop.eup %3740  ;;  %v5304_v14 = vsel %vm1140_vm2, %v5132_v51, 0.0 }
 0x30d   :  { %v5295_v29 = vsel %vm6061_vm0, %v1132_v21, -1e+30  ;;  %v1417_v56 = vrot.slane %v1416_v23, 2  ;;  %v1409_v1 = vmax.f32 %v1407_v39, %v1408_v3  ;;  %v1557_v12 = vrot.slane %v1556_v30, 4  ;;  %v6062_v39 = vld [vmem:[#allocation55_spill] sm:$0xff] }
 0x30e   :  { %3752 = vpow2.f32 %v1514_v13  ;;  %v1508_v33 = vmul.f32 1.442695, %v1452_v42  ;;  %v1400_v46 = vsel %vm1203_vm11, %v5295_v29, -inf  ;;  %v1453_v19 = vsub.f32 %v5257_v53, %v1385_v60 }
 0x30f   :  { %v1418_v63 = vmax.f32 %v1416_v23, %v1417_v56  ;;  %v1410_v10 = vrot.slane %v1409_v1, 2  ;;  %v1558_v15 = vadd.f32 %v1557_v12, %v1556_v30  ;;  %v5307_v21 = vpop.eup %3742  ;;  %v1401_v43 = vrot.slane %v1400_v46, 4 }
 0x310   :  { %3754 = vpow2.f32 %v1508_v33  ;;  %v1563_v0 = vsel %vm1203_vm11, %v5304_v14, 0.0  ;;  %vm6063_vm4 = vcmp.gt.f32.partialorder %v6062_v39, 0.5  ;;  %v1510_v3 = vmul.f32 1.442695, %v1453_v19 }
 0x311   :  { %v5313_v62 = vsel %vm6063_vm4, %v1138_v20, -1e+30  ;;  %v1419_v34 = vrot.slane %v1418_v63, 1  ;;  %v1411_v51 = vmax.f32 %v1409_v1, %v1410_v10  ;;  %v1559_v13 = vrot.slane %v1558_v15, 2  ;;  %v5315_v42 = vpop.eup %3744 }
 0x312   :  { %v1402_v53 = vmax.f32 %v1400_v46, %v1401_v43  ;;  %v1564_v23 = vrot.slane %v1563_v0, 4  ;;  %v1421_v30 = vsel %vm1203_vm11, %v5313_v62, -inf  ;;  %v5322_v60 = vsel %vm1142_vm8, %v5138_v2, 0.0 }
 0x313   :  { %3756 = vpow2.f32 %v1510_v3  ;;  %v1420_v56 = vmax.f32 %v1418_v63, %v1419_v34  ;;  %v1412_v12 = vrot.slane %v1411_v51, 1  ;;  %v1560_v20 = vadd.f32 %v1559_v13, %v1558_v15 }
 0x314   :  { %v1403_v33 = vrot.slane %v1402_v53, 2  ;;  %v1565_v19 = vadd.f32 %v1564_v23, %v1563_v0  ;;  %v1422_v1 = vrot.slane %v1421_v30, 4  ;;  %v1577_v10 = vsel %vm1203_vm11, %v5322_v60, 0.0  ;;  %v5326_v46 = vpop.eup %3746 }
 0x315   :  { %v1458_v43 = vsub.f32 %v5269_v22, %v1420_v56  ;;  %v1413_v16 = vmax.f32 %v1411_v51, %v1412_v12  ;;  %v1561_v39 = vrot.slane %v1560_v20, 1  ;;  %v1578_v37 = vrot.slane %v1577_v10, 4  ;;  %v5329_v40 = vpop.eup %3748 }
 0x316   :  { %v1404_v2 = vmax.f32 %v1402_v53, %v1403_v33  ;;  %v1566_v3 = vrot.slane %v1565_v19, 2  ;;  %v1423_v63 = vmax.f32 %v1421_v30, %v1422_v1  ;;  %v5334_v15 = vsel %vm1145_vm9, %v5144_v36, 0.0 }
 0x317   :  { %v3751_v0 = vpop.eup %3750  ;;  %v1520_v34 = vmul.f32 1.442695, %v1458_v43  ;;  %v1457_v13 = vsub.f32 %v5278_v35, %v1413_v16  ;;  %v1562_v23 = vadd.f32 %v1561_v39, %v1560_v20  ;;  %v1579_v38 = vadd.f32 %v1578_v37, %v1577_v10 }
 0x318   :  { %v1849_v22 = vmul.f32 %v3751_v0, %v5099_v61  ;;  %v1405_v51 = vrot.slane %v1404_v2, 1  ;;  %v1567_v56 = vadd.f32 %v1566_v3, %v1565_v19  ;;  %v1424_v12 = vrot.slane %v1423_v63, 2 }
 0x319   :  { %3758 = vpow2.f32 %v1520_v34  ;;  %v1518_v53 = vmul.f32 1.442695, %v1457_v13  ;;  %vm1780_vm2 = vcmp.gt.f32.partialorder %v1562_v23, 0.0  ;;  %v1580_v30 = vrot.slane %v1579_v38, 2 }
 0x31a   :  { %v1910_v33 = vpack.c.bf16 %v1849_v22, %v1849_v22  ;;  %v1812_v1 = vsel %vm1780_vm2, %v1562_v23, 1.0  ;;  %v1406_v59 = vmax.f32 %v1404_v2, %v1405_v51  ;;  %v1568_v36 = vrot.slane %v1567_v56, 1 }
 0x31b   :  { %v5338_v31 = vpop.eup %3752  ;;  %3760 = vpow2.f32 %v1518_v53  ;;  %v1425_v43 = vmax.f32 %v1423_v63, %v1424_v12  ;;  %v1581_v16 = vadd.f32 %v1580_v30, %v1579_v38  ;;  %v1598_v35 = vsel %vm1203_vm11, %v5334_v15, 0.0 }
 0x31c   :  { %2064 = vperm.xlu1 %3547, %v1910_v33   ;;  %3762 = vrcp.f32 %v1812_v1  ;;  %v1456_v61 = vsub.f32 %v5295_v29, %v1406_v59  ;;  %v1569_v37 = vadd.f32 %v1568_v36, %v1567_v56  ;;  %v1599_v39 = vrot.slane %v1598_v35, 4 }
 0x31d   :  { %v5343_v20 = vpop.eup %3754  ;;  %v1426_v19 = vrot.slane %v1425_v43, 1  ;;  %v1582_v10 = vrot.slane %v1581_v16, 1  ;;  %v5348_v2 = vsel %vm1143_vm6, %v5155_v24, 0.0  ;;  %v5353_v38 = vsel %vm1146_vm10, %v5161_v26, 0.0 }
 0x31e   :  { %v1516_v3 = vmul.f32 1.442695, %v1456_v61  ;;  %vm1781_vm8 = vcmp.gt.f32.partialorder %v1569_v37, 0.0  ;;  %v1600_v63 = vadd.f32 %v1599_v39, %v1598_v35  ;;  %v1584_v29 = vsel %vm1203_vm11, %v5348_v2, 0.0 }
 0x31f   :  { %v1813_v0 = vsel %vm1781_vm8, %v1569_v37, 1.0  ;;  %v1427_v34 = vmax.f32 %v1425_v43, %v1426_v19  ;;  %v1583_v13 = vadd.f32 %v1582_v10, %v1581_v16  ;;  %v1585_v23 = vrot.slane %v1584_v29, 4 }
 0x320   :  { %v5357_v22 = vpop.eup %3756  ;;  %3764 = vpow2.f32 %v1516_v3  ;;  %v1601_v57 = vrot.slane %v1600_v63, 2  ;;  %v1605_v24 = vsel %vm1203_vm11, %v5353_v38, 0.0  ;;  %v5364_v28 = vsel %vm1149_vm13, %v5163_v8, 0.0 }
 0x321   :  { %3766 = vrcp.f32 %v1813_v0  ;;  %v1459_v26 = vsub.f32 %v5313_v62, %v1427_v34  ;;  %vm1783_vm6 = vcmp.gt.f32.partialorder %v1583_v13, 0.0  ;;  %v1586_v51 = vadd.f32 %v1585_v23, %v1584_v29 }
 0x322   :  { %v1815_v56 = vsel %vm1783_vm6, %v1583_v13, 1.0  ;;  %v1602_v12 = vadd.f32 %v1601_v57, %v1600_v63  ;;  %v1606_v53 = vrot.slane %v1605_v24, 4  ;;  %v1626_v30 = vsel %vm1203_vm11, %v5364_v28, 0.0 }
 0x323   :  { %v1522_v33 = vmul.f32 1.442695, %v1459_v26  ;;  %3768 = vrcp.f32 %v1815_v56  ;;  %v1587_v1 = vrot.slane %v1586_v51, 2  ;;  %v1627_v59 = vrot.slane %v1626_v30, 4 }
 0x324   :  { %v1603_v36 = vrot.slane %v1602_v12, 1  ;;  %v1607_v43 = vadd.f32 %v1606_v53, %v1605_v24  ;;  %v5372_v8 = vsel %vm1144_vm7, %v5176_v58, 0.0  ;;  %v5377_v50 = vsel %vm1150_vm14, %v5179_v25, 0.0 }
 0x325   :  { %3770 = vpow2.f32 %v1522_v33  ;;  %v1588_v62 = vadd.f32 %v1587_v1, %v1586_v51  ;;  %v1628_v16 = vadd.f32 %v1627_v59, %v1626_v30  ;;  %v1591_v35 = vsel %vm1203_vm11, %v5372_v8, 0.0 }
 0x326   :  { %v5381_v61 = vpop.eup %3758  ;;  %v1604_v37 = vadd.f32 %v1603_v36, %v1602_v12  ;;  %v1608_v39 = vrot.slane %v1607_v43, 2  ;;  %v1592_v19 = vrot.slane %v1591_v35, 4  ;;  %v1633_v54 = vsel %vm1203_vm11, %v5377_v50, 0.0 }
 0x327   :  { %v1589_v58 = vrot.slane %v1588_v62, 1  ;;  %v1629_v10 = vrot.slane %v1628_v16, 2  ;;  %v1634_v3 = vrot.slane %v1633_v54, 4  ;;  %v5388_v4 = vsel %vm1157_vm12, %v5204_v41, 0.0 }
 0x328   :  { %v5390_v25 = vpop.eup %3760  ;;  %vm1786_vm7 = vcmp.gt.f32.partialorder %v1604_v37, 0.0  ;;  %v1609_v63 = vadd.f32 %v1608_v39, %v1607_v43  ;;  %v1593_v29 = vadd.f32 %v1592_v19, %v1591_v35  ;;  %v1682_v0 = vsel %vm1203_vm11, %v5388_v4, 0.0 }
 0x329   :  { %v3763_v34 = vpop.eup %3762  ;;  %v1818_v13 = vsel %vm1786_vm7, %v1604_v37, 1.0  ;;  %v1590_v23 = vadd.f32 %v1589_v58, %v1588_v62  ;;  %v1630_v57 = vadd.f32 %v1629_v10, %v1628_v16  ;;  %v1635_v24 = vadd.f32 %v1634_v3, %v1633_v54 }
 0x32a   :  { %v1845_v26 = vmul.f32 %v3763_v34, %v5288_v11  ;;  %3772 = vrcp.f32 %v1818_v13  ;;  %v1610_v51 = vrot.slane %v1609_v63, 1  ;;  %v1594_v17 = vrot.slane %v1593_v29, 2 }
 0x32b   :  { %vm1784_vm9 = vcmp.gt.f32.partialorder %v1590_v23, 0.0  ;;  %v1631_v41 = vrot.slane %v1630_v57, 1  ;;  %v1636_v56 = vrot.slane %v1635_v24, 2  ;;  %v1683_v12 = vrot.slane %v1682_v0, 4 }
 0x32c   :  { %v1908_v53 = vpack.c.bf16 %v1845_v26, %v1845_v26  ;;  %v1816_v30 = vsel %vm1784_vm9, %v1590_v23, 1.0  ;;  %v1611_v33 = vadd.f32 %v1610_v51, %v1609_v63  ;;  %v1595_v1 = vadd.f32 %v1594_v17, %v1593_v29 }
 0x32d   :  { %v5395_v59 = vpop.eup %3764  ;;  %3774 = vrcp.f32 %v1816_v30  ;;  %v1632_v36 = vadd.f32 %v1631_v41, %v1630_v57  ;;  %v1637_v43 = vadd.f32 %v1636_v56, %v1635_v24  ;;  %v1684_v62 = vadd.f32 %v1683_v12, %v1682_v0 }
 0x32e   :  { %v3767_v16 = vpop.eup %3766  ;;  %2054 = vperm.xlu1 %3547, %v1908_v53   ;;  %vm1787_vm10 = vcmp.gt.f32.partialorder %v1611_v33, 0.0  ;;  %v1596_v11 = vrot.slane %v1595_v1, 1  ;;  %vm6064_vm12 = vcmp.gt.f32.partialorder %v6022_v48, 0.5  ;;  %v5405_v37 = vsel %vm1158_vm1, %v5228_v6, 0.0 }
 0x32f   :  { %v5400_v35 = vsel %vm6064_vm12, %v5226_v55, 0.0  ;;  %v1847_v39 = vmul.f32 %v3767_v16, %v5304_v14  ;;  %v1819_v19 = vsel %vm1787_vm10, %v1611_v33, 1.0  ;;  %vm1790_vm13 = vcmp.gt.f32.partialorder %v1632_v36, 0.0 }
 0x330   :  { %v1638_v54 = vrot.slane %v1637_v43, 1  ;;  %v3769_v58 = vpop.eup %3768  ;;  %3776 = vrcp.f32 %v1819_v19  ;;  %v1822_v10 = vsel %vm1790_vm13, %v1632_v36, 1.0  ;;  %v1597_v3 = vadd.f32 %v1596_v11, %v1595_v1 }
 0x331   :  { %v1685_v63 = vrot.slane %v1684_v62, 2  ;;  %v1909_v29 = vpack.c.bf16 %v1847_v39, %v1847_v39  ;;  %v1851_v48 = vmul.f32 %v3769_v58, %v5322_v60  ;;  %3778 = vrcp.f32 %v1822_v10 }
 0x332   :  { %v1639_v55 = vadd.f32 %v1638_v54, %v1637_v43  ;;  %v5409_v0 = vpop.eup %3770  ;;  %vm1785_vm14 = vcmp.gt.f32.partialorder %v1597_v3, 0.0  ;;  %v1612_v18 = vsel %vm1203_vm11, %v5400_v35, 0.0  ;;  %v1689_v14 = vsel %vm1203_vm11, %v5405_v37, 0.0 }
 0x333   :  { %v1686_v6 = vadd.f32 %v1685_v63, %v1684_v62  ;;  %2059 = vperm.xlu0 %3546, %v1909_v29   ;;  %v1911_v34 = vpack.c.bf16 %v1851_v48, %v1851_v48  ;;  %v1817_v13 = vsel %vm1785_vm14, %v1597_v3, 1.0  ;;  %v1613_v23 = vrot.slane %v1612_v18, 4  ;;  %v6068_v29 = vld [vmem:[#allocation37_spill] sm:$0xff] }
 0x334   :  { %vm1791_vm1 = vcmp.gt.f32.partialorder %v1639_v55, 0.0  ;;  %3780 = vrcp.f32 %v1817_v13  ;;  %v1690_v24 = vrot.slane %v1689_v14, 4  ;;  %vm6065_vm5 = vcmp.gt.f32.partialorder %v6026_v45, 0.5  ;;  %v6069_v48 = vld [vmem:[#allocation57_spill] sm:$0xff] }
 0x335   :  { %v1823_v57 = vsel %vm1791_vm1, %v1639_v55, 1.0  ;;  %v1687_v60 = vrot.slane %v1686_v6, 1  ;;  %2069 = vperm.xlu1 %3547, %v1911_v34   ;;  %v1614_v26 = vadd.f32 %v1613_v23, %v1612_v18  ;;  %v5418_v51 = vsel %vm6065_vm5, %v5232_v32, 0.0 }
 0x336   :  { %3782 = vrcp.f32 %v1823_v57  ;;  %vm6066_vm0 = vcmp.gt.f32.partialorder %v6024_v27, 0.5  ;;  %v1691_v56 = vadd.f32 %v1690_v24, %v1689_v14  ;;  %v1668_v12 = vsel %vm1203_vm11, %v5418_v51, 0.0 }
 0x337   :  { %v5423_v17 = vsel %vm6066_vm0, %v5239_v49, 0.0  ;;  %v1688_v41 = vadd.f32 %v1687_v60, %v1686_v6  ;;  %v3773_v30 = vpop.eup %3772  ;;  %v1615_v33 = vrot.slane %v1614_v26, 2  ;;  %v1669_v1 = vrot.slane %v1668_v12, 4  ;;  %v6071_v6 = vld [vmem:[#allocation50_spill] sm:$0xff] }
 0x338   :  { %v1619_v53 = vsel %vm1203_vm11, %v5423_v17, 0.0  ;;  %vm6067_vm4 = vcmp.gt.f32.partialorder %v6030_v7, 0.5  ;;  %v1857_v27 = vmul.f32 %v3773_v30, %v5334_v15  ;;  %v1692_v32 = vrot.slane %v1691_v56, 2 }
 0x339   :  { %v1620_v36 = vrot.slane %v1619_v53, 4  ;;  %v5432_v45 = vsel %vm6067_vm4, %v5248_v52, 0.0  ;;  %vm1798_vm2 = vcmp.gt.f32.partialorder %v1688_v41, 0.0  ;;  %v1616_v62 = vadd.f32 %v1615_v33, %v1614_v26 }
 0x33a   :  { %v1654_v49 = vsel %vm1203_vm11, %v5432_v45, 0.0  ;;  %v1830_v43 = vsel %vm1798_vm2, %v1688_v41, 1.0  ;;  %v1670_v16 = vadd.f32 %v1669_v1, %v1668_v12  ;;  %v3775_v39 = vpop.eup %3774  ;;  %v1914_v19 = vpack.c.bf16 %v1857_v27, %v1857_v27 }
 0x33b   :  { %v1621_v11 = vadd.f32 %v1620_v36, %v1619_v53  ;;  %3784 = vrcp.f32 %v1830_v43  ;;  %v1693_v54 = vadd.f32 %v1692_v32, %v1691_v56  ;;  %v1655_v58 = vrot.slane %v1654_v49, 4 }
 0x33c   :  { %v1853_v7 = vmul.f32 %v3775_v39, %v5348_v2  ;;  %v1617_v52 = vrot.slane %v1616_v62, 1  ;;  %v1671_v10 = vrot.slane %v1670_v16, 2  ;;  %2084 = vperm.xlu0 %3546, %v1914_v19   ;;  %vm6070_vm8 = vcmp.gt.f32.partialorder %v6069_v48, 0.5  ;;  %v6075_v48 = vld [vmem:[#allocation44_spill] sm:$0xff] }
 0x33d   :  { %v1622_v3 = vrot.slane %v1621_v11, 2  ;;  %v1694_v15 = vrot.slane %v1693_v54, 1  ;;  %v1656_v63 = vadd.f32 %v1655_v58, %v1654_v49  ;;  %v5441_v55 = vsel %vm6070_vm8, %v6068_v29, 0.0  ;;  %v3777_v14 = vpop.eup %3776 }
 0x33e   :  { %vm6072_vm6 = vcmp.gt.f32.partialorder %v6071_v6, 0.5  ;;  %v1912_v34 = vpack.c.bf16 %v1853_v7, %v1853_v7  ;;  %v1618_v13 = vadd.f32 %v1617_v52, %v1616_v62  ;;  %v1672_v2 = vadd.f32 %v1671_v10, %v1670_v16  ;;  %v3779_v57 = vpop.eup %3778 }
 0x33f   :  { %v5446_v18 = vsel %vm6072_vm6, %v5262_v5, 0.0  ;;  %v1623_v23 = vadd.f32 %v1622_v3, %v1621_v11  ;;  %v1859_v60 = vmul.f32 %v3777_v14, %v5353_v38  ;;  %v1695_v24 = vadd.f32 %v1694_v15, %v1693_v54 }
 0x340   :  { %v1657_v26 = vrot.slane %v1656_v63, 2  ;;  %v1675_v41 = vsel %vm1203_vm11, %v5441_v55, 0.0  ;;  %v1865_v56 = vmul.f32 %v3779_v57, %v5364_v28  ;;  %vm1788_vm7 = vcmp.gt.f32.partialorder %v1618_v13, 0.0  ;;  %2074 = vperm.xlu0 %3546, %v1912_v34  }
 0x341   :  { %v1673_v12 = vrot.slane %v1672_v2, 1  ;;  %v1624_v53 = vrot.slane %v1623_v23, 1  ;;  %v1915_v5 = vpack.c.bf16 %v1859_v60, %v1859_v60  ;;  %v1820_v30 = vsel %vm1788_vm7, %v1618_v13, 1.0  ;;  %v3781_v1 = vpop.eup %3780  ;;  %v6079_v60 = vld [vmem:[#allocation48_spill] sm:$0xff] }
 0x342   :  { %vm1799_vm9 = vcmp.gt.f32.partialorder %v1695_v24, 0.0  ;;  %v1658_v33 = vadd.f32 %v1657_v26, %v1656_v63  ;;  %v1918_v36 = vpack.c.bf16 %v1865_v56, %v1865_v56  ;;  %3786 = vrcp.f32 %v1820_v30 }
 0x343   :  { %v1831_v27 = vsel %vm1799_vm9, %v1695_v24, 1.0  ;;  %v1674_v38 = vadd.f32 %v1673_v12, %v1672_v2  ;;  %v3783_v32 = vpop.eup %3782  ;;  %2089 = vperm.xlu1 %3547, %v1915_v5   ;;  %v1855_v49 = vmul.f32 %v3781_v1, %v5372_v8  ;;  %v1625_v43 = vadd.f32 %v1624_v53, %v1623_v23  ;;  %v6077_v23 = vld [vmem:[#allocation53_spill] sm:$0xff] }
 0x344   :  { %3788 = vrcp.f32 %v1831_v27  ;;  %v1659_v28 = vrot.slane %v1658_v33, 1  ;;  %v1867_v62 = vmul.f32 %v3783_v32, %v5377_v50  ;;  %v1676_v16 = vrot.slane %v1675_v41, 4  ;;  %2104 = vperm.xlu0 %3546, %v1918_v36   ;;  %v6073_v50 = vld [vmem:[#allocation47_spill] sm:$0xff]  ;;  %v6083_v32 = vld [vmem:[#allocation62_spill] sm:$0xff] }
 0x345   :  { %vm1796_vm10 = vcmp.gt.f32.partialorder %v1674_v38, 0.0  ;;  %v1710_v11 = vsel %vm1203_vm11, %v5446_v18, 0.0  ;;  %v1913_v39 = vpack.c.bf16 %v1855_v49, %v1855_v49  ;;  %vm1789_vm12 = vcmp.gt.f32.partialorder %v1625_v43, 0.0 }
 0x346   :  { %v1828_v19 = vsel %vm1796_vm10, %v1674_v38, 1.0  ;;  %v1660_v54 = vadd.f32 %v1659_v28, %v1658_v33  ;;  %v1919_v58 = vpack.c.bf16 %v1867_v62, %v1867_v62  ;;  %v1821_v7 = vsel %vm1789_vm12, %v1625_v43, 1.0 }
 0x347   :  { %3790 = vrcp.f32 %v1828_v19  ;;  %v1677_v52 = vadd.f32 %v1676_v16, %v1675_v41  ;;  %2079 = vperm.xlu1 %3547, %v1913_v39   ;;  %v1711_v8 = vrot.slane %v1710_v11, 4  ;;  %vm6074_vm14 = vcmp.gt.f32.partialorder %v6073_v50, 0.5 }
 0x348   :  { %3792 = vrcp.f32 %v1821_v7  ;;  %vm1794_vm13 = vcmp.gt.f32.partialorder %v1660_v54, 0.0  ;;  %v5459_v10 = vsel %vm6074_vm14, %v5272_v47, 0.0  ;;  %v3785_v3 = vpop.eup %3784  ;;  %vm6076_vm1 = vcmp.gt.f32.partialorder %v6075_v48, 0.5 }
 0x349   :  { %v1826_v15 = vsel %vm1794_vm13, %v1660_v54, 1.0  ;;  %v1678_v63 = vrot.slane %v1677_v52, 2  ;;  %v1661_v29 = vsel %vm1203_vm11, %v5459_v10, 0.0  ;;  %v5466_v6 = vsel %vm6076_vm1, %v5283_v9, 0.0 }
 0x34a   :  { %v1881_v14 = vmul.f32 %v3785_v3, %v5388_v4  ;;  %3794 = vrcp.f32 %v1826_v15  ;;  %v1712_v34 = vadd.f32 %v1711_v8, %v1710_v11  ;;  %v1662_v13 = vrot.slane %v1661_v29, 4 }
 0x34b   :  { %v1679_v2 = vadd.f32 %v1678_v63, %v1677_v52  ;;  %v1640_v47 = vsel %vm1203_vm11, %v5466_v6, 0.0  ;;  %vm6078_vm5 = vcmp.gt.f32.partialorder %v6077_v23, 0.5  ;;  %vm6080_vm0 = vcmp.gt.f32.partialorder %v6079_v60, 0.5  ;;  %2109 = vperm.xlu1 %3547, %v1919_v58  }
 0x34c   :  { %v5474_v57 = vsel %vm6078_vm5, %v5297_v44, 0.0  ;;  %v5479_v24 = vsel %vm6080_vm0, %v5307_v21, 0.0  ;;  %v1926_v9 = vpack.c.bf16 %v1881_v14, %v1881_v14  ;;  %v1713_v4 = vrot.slane %v1712_v34, 2  ;;  %v6081_v44 = vld [vmem:[#allocation45_spill] sm:$0xff] }
 0x34d   :  { %v1663_v26 = vadd.f32 %v1662_v13, %v1661_v29  ;;  %v1641_v41 = vrot.slane %v1640_v47, 4  ;;  %v1680_v56 = vrot.slane %v1679_v2, 1  ;;  %v1717_v12 = vsel %vm1203_vm11, %v5474_v57, 0.0 }
 0x34e   :  { %v1696_v53 = vsel %vm1203_vm11, %v5479_v24, 0.0  ;;  %vm6082_vm4 = vcmp.gt.f32.partialorder %v6081_v44, 0.5  ;;  %2144 = vperm.xlu0 %3546, %v1926_v9   ;;  %v1714_v21 = vadd.f32 %v1713_v4, %v1712_v34  ;;  %v1718_v1 = vrot.slane %v1717_v12, 4 }
 0x34f   :  { %v5488_v5 = vsel %vm6082_vm4, %v5315_v42, 0.0  ;;  %v1664_v30 = vrot.slane %v1663_v26, 2  ;;  %v1642_v33 = vadd.f32 %v1641_v41, %v1640_v47  ;;  %v1681_v36 = vadd.f32 %v1680_v56, %v1679_v2  ;;  %v3787_v43 = vpop.eup %3786 }
 0x350   :  { %v1697_v27 = vrot.slane %v1696_v53, 4  ;;  %v1647_v38 = vsel %vm1203_vm11, %v5488_v5, 0.0  ;;  %vm6084_vm2 = vcmp.gt.f32.partialorder %v6083_v32, 0.5  ;;  %v1715_v28 = vrot.slane %v1714_v21, 1 }
 0x351   :  { %v5495_v49 = vsel %vm6084_vm2, %v5329_v40, 0.0  ;;  %v1665_v62 = vadd.f32 %v1664_v30, %v1663_v26  ;;  %v1643_v42 = vrot.slane %v1642_v33, 2  ;;  %v1719_v16 = vadd.f32 %v1718_v1, %v1717_v12  ;;  %v3789_v11 = vpop.eup %3788 }
 0x352   :  { %v1861_v39 = vmul.f32 %v3787_v43, %v5400_v35  ;;  %vm1797_vm8 = vcmp.gt.f32.partialorder %v1681_v36, 0.0  ;;  %v1698_v19 = vadd.f32 %v1697_v27, %v1696_v53  ;;  %v1648_v54 = vrot.slane %v1647_v38, 4  ;;  %v5511_v43 = vpop.permute.xlu1 %2912 }
 0x353   :  { %v1883_v58 = vmul.f32 %v3789_v11, %v5405_v37  ;;  %v1829_v7 = vsel %vm1797_vm8, %v1681_v36, 1.0  ;;  %v1716_v52 = vadd.f32 %v1715_v28, %v1714_v21  ;;  %v1666_v8 = vrot.slane %v1665_v62, 1  ;;  %v6085_v36 = vld [vmem:[#allocation49_spill] sm:$0xff]  ;;  %v6087_v11 = vld [vmem:[#allocation63_spill] sm:$0xff] }
 0x354   :  { %v1916_v50 = vpack.c.bf16 %v1861_v39, %v1861_v39  ;;  %3796 = vrcp.f32 %v1829_v7  ;;  %v1644_v40 = vadd.f32 %v1643_v42, %v1642_v33  ;;  %v1720_v3 = vrot.slane %v1719_v16, 2  ;;  %v3791_v15 = vpop.eup %3790  ;;  %v6089_v39 = vld [vmem:[#allocation59_spill] sm:$0xff] }
 0x355   :  { %v1927_v63 = vpack.c.bf16 %v1883_v58, %v1883_v58  ;;  %vm1802_vm6 = vcmp.gt.f32.partialorder %v1716_v52, 0.0  ;;  %v1667_v29 = vadd.f32 %v1666_v8, %v1665_v62  ;;  %v1699_v48 = vrot.slane %v1698_v19, 2  ;;  %v3793_v14 = vpop.eup %3792 }
 0x356   :  { %2094 = vperm.xlu0 %3546, %v1916_v50   ;;  %v1877_v35 = vmul.f32 %v3791_v15, %v5418_v51  ;;  %v1834_v34 = vsel %vm1802_vm6, %v1716_v52, 1.0  ;;  %v1645_v13 = vrot.slane %v1644_v40, 1  ;;  %v1721_v2 = vadd.f32 %v1720_v3, %v1719_v16 }
 0x357   :  { %2149 = vperm.xlu1 %3547, %v1927_v63   ;;  %v1863_v37 = vmul.f32 %v3793_v14, %v5423_v17  ;;  %3798 = vrcp.f32 %v1834_v34  ;;  %vm1795_vm7 = vcmp.gt.f32.partialorder %v1667_v29, 0.0  ;;  %v1700_v47 = vadd.f32 %v1699_v48, %v1698_v19  ;;  %v3795_v23 = vpop.eup %3794 }
 0x358   :  { %v1924_v60 = vpack.c.bf16 %v1877_v35, %v1877_v35  ;;  %v1827_v9 = vsel %vm1795_vm7, %v1667_v29, 1.0  ;;  %v1646_v4 = vadd.f32 %v1645_v13, %v1644_v40  ;;  %v1722_v26 = vrot.slane %v1721_v2, 1 }
 0x359   :  { %v1917_v41 = vpack.c.bf16 %v1863_v37, %v1863_v37  ;;  %v1873_v56 = vmul.f32 %v3795_v23, %v5432_v45  ;;  %3800 = vrcp.f32 %v1827_v9  ;;  %v1701_v12 = vrot.slane %v1700_v47, 1  ;;  %v5535_v37 = vpop.permute.xlu1 %2922 }
 0x35a   :  { %2134 = vperm.xlu0 %3546, %v1924_v60   ;;  %vm1792_vm9 = vcmp.gt.f32.partialorder %v1646_v4, 0.0  ;;  %v1723_v51 = vadd.f32 %v1722_v26, %v1721_v2  ;;  %v1649_v53 = vadd.f32 %v1648_v54, %v1647_v38  ;;  %v1738_v17 = vsel %vm1203_vm11, %v5495_v49, 0.0 }
 0x35b   :  { %2099 = vperm.xlu1 %3547, %v1917_v41   ;;  %v1922_v44 = vpack.c.bf16 %v1873_v56, %v1873_v56  ;;  %v1824_v21 = vsel %vm1792_vm9, %v1646_v4, 1.0  ;;  %v1702_v30 = vadd.f32 %v1701_v12, %v1700_v47  ;;  %v1739_v33 = vrot.slane %v1738_v17, 4 }
 0x35c   :  { %3802 = vrcp.f32 %v1824_v21  ;;  %vm1803_vm10 = vcmp.gt.f32.partialorder %v1723_v51, 0.0  ;;  %v1650_v1 = vrot.slane %v1649_v53, 2  ;;  %vm6086_vm12 = vcmp.gt.f32.partialorder %v6085_v36, 0.5 }
 0x35d   :  { %v5507_v45 = vsel %vm6086_vm12, %v5326_v46, 0.0  ;;  %v1835_v27 = vsel %vm1803_vm10, %v1723_v51, 1.0  ;;  %vm1800_vm13 = vcmp.gt.f32.partialorder %v1702_v30, 0.0  ;;  %v1740_v32 = vadd.f32 %v1739_v33, %v1738_v17 }
 0x35e   :  { %v1703_v38 = vsel %vm1203_vm11, %v5507_v45, 0.0  ;;  %2124 = vperm.xlu0 %3546, %v1922_v44   ;;  %3804 = vrcp.f32 %v1835_v27  ;;  %v1832_v28 = vsel %vm1800_vm13, %v1702_v30, 1.0  ;;  %v1651_v62 = vadd.f32 %v1650_v1, %v1649_v53 }
 0x35f   :  { %v1704_v42 = vrot.slane %v1703_v38, 4  ;;  %3806 = vrcp.f32 %v1832_v28  ;;  %v1741_v16 = vrot.slane %v1740_v32, 2  ;;  %vm6088_vm14 = vcmp.gt.f32.partialorder %v6087_v11, 0.5 }
 0x360   :  { %v5516_v46 = vsel %vm6088_vm14, %v5338_v31, 0.0  ;;  %vm6090_vm1 = vcmp.gt.f32.partialorder %v6089_v39, 0.5  ;;  %v1652_v54 = vrot.slane %v1651_v62, 1  ;;  %v6091_v31 = vld [vmem:[#allocation60_spill] sm:$0xff] }
 0x361   :  { %v5521_v19 = vsel %vm6090_vm1, %v5343_v20, 0.0  ;;  %v1705_v58 = vadd.f32 %v1704_v42, %v1703_v38  ;;  %v1745_v7 = vsel %vm1203_vm11, %v5516_v46, 0.0  ;;  %v3797_v8 = vpop.eup %3796  ;;  %v1742_v50 = vadd.f32 %v1741_v16, %v1740_v32  ;;  %v5546_v32 = vpop.permute.xlu1 %2932 }
 0x362   :  { %v1724_v52 = vsel %vm1203_vm11, %v5521_v19, 0.0  ;;  %v1746_v40 = vrot.slane %v1745_v7, 4  ;;  %vm6092_vm5 = vcmp.gt.f32.partialorder %v6091_v31, 0.5  ;;  %v1879_v20 = vmul.f32 %v3797_v8, %v5441_v55  ;;  %v5549_v42 = vpop.permute.xlu0 %2907 }
 0x363   :  { %v1725_v3 = vrot.slane %v1724_v52, 4  ;;  %v5530_v15 = vsel %vm6092_vm5, %v5357_v22, 0.0  ;;  %v1653_v63 = vadd.f32 %v1652_v54, %v1651_v62  ;;  %v1706_v29 = vrot.slane %v1705_v58, 2  ;;  %v6093_v22 = vld [vmem:[#allocation54_spill] sm:$0xff]  ;;  %v6095_v54 = vld [vmem:[#allocation51_spill] sm:$0xff] }
 0x364   :  { %v1731_v48 = vsel %vm1203_vm11, %v5530_v15, 0.0  ;;  %v1743_v14 = vrot.slane %v1742_v50, 1  ;;  %v1747_v35 = vadd.f32 %v1746_v40, %v1745_v7  ;;  %v3799_v2 = vpop.eup %3798  ;;  %v1925_v47 = vpack.c.bf16 %v1879_v20, %v1879_v20 }
 0x365   :  { %v1726_v34 = vadd.f32 %v1725_v3, %v1724_v52  ;;  %v1732_v13 = vrot.slane %v1731_v48, 4  ;;  %vm1793_vm0 = vcmp.gt.f32.partialorder %v1653_v63, 0.0  ;;  %v1707_v23 = vadd.f32 %v1706_v29, %v1705_v58 }
 0x366   :  { %vm6094_vm4 = vcmp.gt.f32.partialorder %v6093_v22, 0.5  ;;  %v1889_v55 = vmul.f32 %v3799_v2, %v5446_v18  ;;  %v1825_v9 = vsel %vm1793_vm0, %v1653_v63, 1.0  ;;  %v1744_v4 = vadd.f32 %v1743_v14, %v1742_v50  ;;  %v3801_v41 = vpop.eup %3800  ;;  %2139 = vperm.xlu1 %3547, %v1925_v47   ;;  %v5560_v14 = vpop.permute.xlu1 %2942  ;;  %v6099_v47 = vld [vmem:[#allocation52_spill] sm:$0xff] }
 0x367   :  { %v5540_v60 = vsel %vm6094_vm4, %v5381_v61, 0.0  ;;  %v1748_v26 = vrot.slane %v1747_v35, 2  ;;  %3808 = vrcp.f32 %v1825_v9  ;;  %v1708_v56 = vrot.slane %v1707_v23, 1 }
 0x368   :  { %v1727_v12 = vrot.slane %v1726_v34, 2  ;;  %v1733_v51 = vadd.f32 %v1732_v13, %v1731_v48  ;;  %v1930_v53 = vpack.c.bf16 %v1889_v55, %v1889_v55  ;;  %v1875_v17 = vmul.f32 %v3801_v41, %v5459_v10  ;;  %v5567_v13 = vpop.permute.xlu0 %2917 }
 0x369   :  { %vm1806_vm2 = vcmp.gt.f32.partialorder %v1744_v4, 0.0  ;;  %v1749_v44 = vadd.f32 %v1748_v26, %v1747_v35  ;;  %v1709_v30 = vadd.f32 %v1708_v56, %v1707_v23  ;;  %v3803_v1 = vpop.eup %3802  ;;  %v1766_v27 = vsel %vm1203_vm11, %v5540_v60, 0.0  ;;  %v6097_v35 = vld [vmem:[#allocation55_spill] sm:$0xff] }
 0x36a   :  { %v1838_v21 = vsel %vm1806_vm2, %v1744_v4, 1.0  ;;  %v1728_v61 = vadd.f32 %v1727_v12, %v1726_v34  ;;  %v1734_v33 = vrot.slane %v1733_v51, 2  ;;  %2164 = vperm.xlu0 %3546, %v1930_v53   ;;  %v1923_v18 = vpack.c.bf16 %v1875_v17, %v1875_v17 }
 0x36b   :  { %3810 = vrcp.f32 %v1838_v21  ;;  %v1750_v36 = vrot.slane %v1749_v44, 1  ;;  %v1869_v38 = vmul.f32 %v3803_v1, %v5466_v6  ;;  %vm1801_vm8 = vcmp.gt.f32.partialorder %v1709_v30, 0.0  ;;  %v3805_v62 = vpop.eup %3804 }
 0x36c   :  { %v1729_v10 = vrot.slane %v1728_v61, 1  ;;  %v1735_v28 = vadd.f32 %v1734_v33, %v1733_v51  ;;  %2129 = vperm.xlu1 %3547, %v1923_v18   ;;  %v1833_v16 = vsel %vm1801_vm8, %v1709_v30, 1.0  ;;  %v1767_v39 = vrot.slane %v1766_v27, 4  ;;  %v3807_v7 = vpop.eup %3806  ;;  %v5581_v33 = vpop.permute.xlu0 %2927 }
 0x36d   :  { %v1751_v11 = vadd.f32 %v1750_v36, %v1749_v44  ;;  %vm6096_vm6 = vcmp.gt.f32.partialorder %v6095_v54, 0.5  ;;  %v1920_v52 = vpack.c.bf16 %v1869_v38, %v1869_v38  ;;  %v1891_v8 = vmul.f32 %v3805_v62, %v5474_v57  ;;  %v5579_v44 = vpop.permute.xlu1 %2952 }
 0x36e   :  { %v5554_v58 = vsel %vm6096_vm6, %v5395_v59, 0.0  ;;  %3812 = vrcp.f32 %v1833_v16  ;;  %v1730_v6 = vadd.f32 %v1729_v10, %v1728_v61  ;;  %v1885_v50 = vmul.f32 %v3807_v7, %v5479_v24 }
 0x36f   :  { %vm1807_vm7 = vcmp.gt.f32.partialorder %v1751_v11, 0.0  ;;  %v1736_v40 = vrot.slane %v1735_v28, 1  ;;  %v1768_v3 = vadd.f32 %v1767_v39, %v1766_v27  ;;  %2114 = vperm.xlu0 %3546, %v1920_v52   ;;  %v1931_v31 = vpack.c.bf16 %v1891_v8, %v1891_v8 }
 0x370   :  { %v1839_v20 = vsel %vm1807_vm7, %v1751_v11, 1.0  ;;  %vm1804_vm9 = vcmp.gt.f32.partialorder %v1730_v6, 0.0  ;;  %v1752_v63 = vsel %vm1203_vm11, %v5554_v58, 0.0  ;;  %v1928_v59 = vpack.c.bf16 %v1885_v50, %v1885_v50 }
 0x371   :  { %3814 = vrcp.f32 %v1839_v20  ;;  %v1836_v29 = vsel %vm1804_vm9, %v1730_v6, 1.0  ;;  %v1737_v48 = vadd.f32 %v1736_v40, %v1735_v28  ;;  %2169 = vperm.xlu1 %3547, %v1931_v31   ;;  %v1769_v57 = vrot.slane %v1768_v3, 2  ;;  %v5585_v7 = vpop.permute.xlu1 %2972  ;;  %v5587_v6 = vpop.permute.xlu0 %2937 }
 0x372   :  { %3816 = vrcp.f32 %v1836_v29  ;;  %v1753_v24 = vrot.slane %v1752_v63, 4  ;;  %vm6098_vm10 = vcmp.gt.f32.partialorder %v6097_v35, 0.5  ;;  %vm6100_vm13 = vcmp.gt.f32.partialorder %v6099_v47, 0.5 }
 0x373   :  { %v5565_v34 = vsel %vm6098_vm10, %v5409_v0, 0.0  ;;  %vm1805_vm12 = vcmp.gt.f32.partialorder %v1737_v48, 0.0  ;;  %v5574_v23 = vsel %vm6100_vm13, %v5390_v25, 0.0  ;;  %2154 = vperm.xlu0 %3546, %v1928_v59   ;;  %v1770_v55 = vadd.f32 %v1769_v57, %v1768_v3 }
 0x374   :  { %v1773_v2 = vsel %vm1203_vm11, %v5565_v34, 0.0  ;;  %v1837_v22 = vsel %vm1805_vm12, %v1737_v48, 1.0  ;;  %v1754_v9 = vadd.f32 %v1753_v24, %v1752_v63  ;;  %v3809_v26 = vpop.eup %3808  ;;  %v1759_v0 = vsel %vm1203_vm11, %v5574_v23, 0.0 }
 0x375   :  { %v1774_v4 = vrot.slane %v1773_v2, 4  ;;  %3818 = vrcp.f32 %v1837_v22  ;;  %v1871_v41 = vmul.f32 %v3809_v26, %v5488_v5  ;;  %v1771_v56 = vrot.slane %v1770_v55, 1  ;;  %v5592_v57 = vpop.permute.xlu1 %3012  ;;  %v5594_v24 = vpop.permute.xlu0 %2947 }
 0x376   :  { %v1755_v12 = vrot.slane %v1754_v9, 2  ;;  %v1760_v53 = vrot.slane %v1759_v0, 4  ;;  %vm3185_vm0 = vcmask 1043456   ;;  %vm6125_vm4 = vcmask 1043459  }
 0x377   :  { %v1775_v51 = vadd.f32 %v1774_v4, %v1773_v2  ;;  %v1921_v25 = vpack.c.bf16 %v1871_v41, %v1871_v41  ;;  %v1772_v21 = vadd.f32 %v1771_v56, %v1770_v55  ;;  %vm6129_vm2 = vmmov %vm6125_vm4 }
 0x378   :  { %v3811_v17 = vpop.eup %3810  ;;  %v1756_v30 = vadd.f32 %v1755_v12, %v1754_v9  ;;  %v1761_v18 = vadd.f32 %v1760_v53, %v1759_v0  ;;  %v6101_v53 = vld [vmem:[#allocation69_spill] sm:$0xff]  ;;  %vm6141_vm8 = vmmov %vm6129_vm2 }
 0x379   :  { %v1776_v61 = vrot.slane %v1775_v51, 2  ;;  %v1897_v1 = vmul.f32 %v3811_v17, %v5495_v49  ;;  %2119 = vperm.xlu1 %3547, %v1921_v25   ;;  %vm1810_vm11 = vcmp.gt.f32.partialorder %v1772_v21, 0.0  ;;  %v5596_v2 = vpop.permute.xlu1 %3052  ;;  %v5599_v22 = vpop.permute.xlu0 %2957  ;;  %vm6150_vm6 = vmmov %vm6129_vm2 }
 0x37a   :  { %v1757_v36 = vrot.slane %v1756_v30, 1  ;;  %v1842_v10 = vsel %vm1810_vm11, %v1772_v21, 1.0  ;;  %v1762_v28 = vrot.slane %v1761_v18, 2  ;;  %vm6151_vm7 = vmmov %vm6129_vm2 }
 0x37b   :  { %v1777_v5 = vadd.f32 %v1776_v61, %v1775_v51  ;;  %v3813_v27 = vpop.eup %3812  ;;  %v1934_v38 = vpack.c.bf16 %v1897_v1, %v1897_v1  ;;  %3820 = vrcp.f32 %v1842_v10  ;;  %v6104_v61 = vld [vmem:[#allocation74_spill] sm:$0xff]  ;;  %vm6152_vm9 = vmmov %vm6129_vm2 }
 0x37c   :  { %v1887_v62 = vmul.f32 %v3813_v27, %v5507_v45  ;;  %v1758_v16 = vadd.f32 %v1757_v36, %v1756_v30  ;;  %v1763_v39 = vadd.f32 %v1762_v28, %v1761_v18  ;;  %v6103_v30 = vld [vmem:[#allocation65_spill] sm:$0xff]  ;;  %v6107_v27 = vld [vmem:[#allocation71_spill] sm:$0xff]  ;;  %vm6153_vm10 = vmmov %vm6129_vm2 }
 0x37d   :  { %v1778_v11 = vrot.slane %v1777_v5, 1  ;;  %2184 = vperm.xlu0 %3546, %v1934_v38   ;;  %v5602_v26 = vpop.permute.xlu1 %2997  ;;  %v5605_v56 = vpop.permute.xlu0 %2992  ;;  %v2891_v1 = vmul.f32 %v6104_v61, %v6103_v30  ;;  %v6106_v36 = vld [vmem:[#allocation73_spill] sm:$0xff]  ;;  %vm6154_vm12 = vmmov %vm6129_vm2 }
 0x37e   :  { %v3815_v54 = vpop.eup %3814  ;;  %v1929_v49 = vpack.c.bf16 %v1887_v62, %v1887_v62  ;;  %vm1808_vm14 = vcmp.gt.f32.partialorder %v1758_v16, 0.0  ;;  %v1764_v3 = vrot.slane %v1763_v39, 1  ;;  %v6108_v38 = vld [vmem:[#allocation77_spill] sm:$0xff] }
 0x37f   :  { %v1779_v52 = vadd.f32 %v1778_v11, %v1777_v5  ;;  %v3817_v8 = vpop.eup %3816  ;;  %v1899_v50 = vmul.f32 %v3815_v54, %v5516_v46  ;;  %v1840_v40 = vsel %vm1808_vm14, %v1758_v16, 1.0  ;;  %v2896_v10 = vmul.f32 %v6108_v38, %v6107_v27  ;;  %v6110_v11 = vld [vmem:[#allocation67_spill] sm:$0xff] }
 0x380   :  { %2159 = vperm.xlu1 %3547, %v1929_v49   ;;  %v1893_v45 = vmul.f32 %v3817_v8, %v5521_v19  ;;  %3822 = vrcp.f32 %v1840_v40  ;;  %v1765_v63 = vadd.f32 %v1764_v3, %v1763_v39  ;;  %v6111_v39 = vld [vmem:[#allocation75_spill] sm:$0xff]  ;;  %v6112_v49 = vld [vmem:[#allocation66_spill] sm:$0xff] }
 0x381   :  { %vm1811_vm1 = vcmp.gt.f32.partialorder %v1779_v52, 0.0  ;;  %v1935_v31 = vpack.c.bf16 %v1899_v50, %v1899_v50  ;;  %v5610_v21 = vpop.permute.xlu1 %3037  ;;  %v5614_v18 = vpop.permute.xlu0 %3032  ;;  %v2901_v54 = vmul.f32 %v6111_v39, %v6110_v11  ;;  %v6113_v50 = vld [vmem:[#allocation5_spill] sm:$0xff] }
 0x382   :  { %v1843_v20 = vsel %vm1811_vm1, %v1779_v52, 1.0  ;;  %v3819_v59 = vpop.eup %3818  ;;  %v1932_v29 = vpack.c.bf16 %v1893_v45, %v1893_v45  ;;  %vm1809_vm5 = vcmp.gt.f32.partialorder %v1765_v63, 0.0  ;;  %v2894_v52 = vmul.f32 %v6104_v61, %v6112_v49 }
 0x383   :  { %3824 = vrcp.f32 %v1843_v20  ;;  %v1895_v48 = vmul.f32 %v3819_v59, %v5530_v15  ;;  %v1841_v46 = vsel %vm1809_vm5, %v1765_v63, 1.0  ;;  %v3326_v40 = vpack.c.bf16 %v6113_v50, %v6113_v50  ;;  %v6115_v59 = vld [vmem:[#allocation68_spill] sm:$0xff] }
 0x384   :  { %2189 = vperm.xlu1 %3547, %v1935_v31   ;;  %2174 = vperm.xlu0 %3546, %v1932_v29   ;;  %3826 = vrcp.f32 %v1841_v46  ;;  %v6114_v31 = vld [vmem:[#allocation72_spill] sm:$0xff]  ;;  %v2904_v29 = vmul.f32 %v6111_v39, %v6115_v59 }
 0x385   :  { %v1933_v35 = vpack.c.bf16 %v1895_v48, %v1895_v48  ;;  %v5620_v28 = vpop.permute.xlu1 %2962  ;;  %v5624_v16 = vpop.permute.xlu0 %2977  ;;  %v2899_v20 = vmul.f32 %v6108_v38, %v6114_v31 }
 0x388   :  { %2179 = vperm.xlu1 %3547, %v1933_v35   ;;  %v3821_v19 = vpop.eup %3820  ;;  %v6116_v35 = vld [vmem:[#allocation6_spill] sm:$0xff] }
 0x389   :  { %v1905_v47 = vmul.f32 %v3821_v19, %v5540_v60  ;;  %v6102_v60 = vld [vmem:[#allocation76_spill] sm:$0xff]  ;;  %v5632_v3 = vpop.permute.xlu0 %3017  ;;  %v3324_v19 = vpack.c.bf16 %v6116_v35, %v6116_v35 }
 0x38a   :  { %v2886_v17 = vmul.f32 %v6102_v60, %v6101_v53 }
 0x38b   :  { %v1938_v55 = vpack.c.bf16 %v1905_v47, %v1905_v47 }
 0x38d   :  { %v3823_v15 = vpop.eup %3822  ;;  %2204 = vperm.xlu0 %3546, %v1938_v55   ;;  %v5638_v48 = vpop.permute.xlu0 %3057 }
 0x38e   :  { %v1901_v9 = vmul.f32 %v3823_v15, %v5554_v58 }
 0x390   :  { %v3825_v4 = vpop.eup %3824  ;;  %v1936_v0 = vpack.c.bf16 %v1901_v9, %v1901_v9 }
 0x391   :  { %v1907_v41 = vmul.f32 %v3825_v4, %v5565_v34  ;;  %v3827_v12 = vpop.eup %3826  ;;  %v6105_v34 = vld [vmem:[#allocation64_spill] sm:$0xff]  ;;  %v5642_v55 = vpop.permute.xlu0 %2967 }
 0x392   :  { %2194 = vperm.xlu0 %3546, %v1936_v0   ;;  %v1903_v25 = vmul.f32 %v3827_v12, %v5574_v23  ;;  %v2884_v5 = vmul.f32 %v6106_v36, %v6105_v34  ;;  %v6109_v23 = vld [vmem:[#allocation70_spill] sm:$0xff]  ;;  %v6117_v0 = vld [vmem:[#allocation8_spill] sm:$0xff] }
 0x393   :  { %v1939_v51 = vpack.c.bf16 %v1907_v41, %v1907_v41  ;;  %v2889_v62 = vmul.f32 %v6102_v60, %v6109_v23  ;;  %v3325_v41 = vpack.c.bf16 %v6117_v0, %v6117_v0  ;;  %v6118_v60 = vld [vmem:[#allocation7_spill] sm:$0xff] }
 0x394   :  { %v1937_v58 = vpack.c.bf16 %v1903_v25, %v1903_v25 }
 0x395   :  { %2209 = vperm.xlu1 %3547, %v1939_v51  }
 0x396   :  { %2987 = vperm.xlu0 %3546, %v2886_v17   ;;  %v3327_v17 = vpack.c.bf16 %v6118_v60, %v6118_v60 }
 0x397   :  { %v2065_v8 = vpop.permute.xlu1 %2064 }
 0x398   :  { %v2214_v45 = vmul.bf16 %v3326_v40, %v2065_v8 }
 0x399   :  { %2199 = vperm.xlu1 %3547, %v1937_v58  }
 0x39a   :  { %3007 = vperm.xlu0 %3546, %v2891_v1   ;;  %v2246_v63 = vunpack.c.l.bf16 %v2214_v45 }
 0x39c   :  { %v2288_v46 = vrot.slane %v2246_v63, 4 }
 0x39d   :  { %2982 = vperm.xlu1 %3547, %v2884_v5  }
 0x39e   :  { %3027 = vperm.xlu0 %3546, %v2896_v10   ;;  %v2289_v15 = vadd.f32 %v2288_v46, %v2246_v63 }
 0x3a0   :  { %v2290_v12 = vrot.slane %v2289_v15, 2 }
 0x3a1   :  { %3002 = vperm.xlu1 %3547, %v2889_v62   ;;  %v6119_v62 = vld [vmem:[#allocation9_spill] sm:$0xff] }
 0x3a2   :  { %3047 = vperm.xlu0 %3546, %v2901_v54   ;;  %v2291_v34 = vadd.f32 %v2290_v12, %v2289_v15  ;;  %v3330_v11 = vpack.c.bf16 %v6119_v62, %v6119_v62  ;;  %v6121_v15 = vld [vmem:[#allocation11_spill] sm:$0xff] }
 0x3a4   :  { %v2292_v39 = vrot.slane %v2291_v34, 1 }
 0x3a5   :  { %3022 = vperm.xlu1 %3547, %v2894_v52  }
 0x3a6   :  { %v2293_v59 = vadd.f32 %v2292_v39, %v2291_v34 }
 0x3a9   :  { %3042 = vperm.xlu1 %3547, %v2899_v20   ;;  %v2055_v47 = vpop.permute.xlu1 %2054  ;;  %v6120_v20 = vld [vmem:[#allocation10_spill] sm:$0xff] }
 0x3aa   :  { %v2212_v9 = vmul.bf16 %v3324_v19, %v2055_v47  ;;  %v3328_v63 = vpack.c.bf16 %v6120_v20, %v6120_v20 }
 0x3ac   :  { %v2244_v4 = vunpack.c.l.bf16 %v2212_v9  ;;  %v3331_v9 = vpack.c.bf16 %v6121_v15, %v6121_v15 }
 0x3ad   :  { %3062 = vperm.xlu1 %3547, %v2904_v29  }
 0x3ae   :  { %v2276_v51 = vrot.slane %v2244_v4, 4  ;;  %v2060_v53 = vpop.permute.xlu0 %2059 }
 0x3af   :  { %v2213_v25 = vmul.bf16 %v3325_v41, %v2060_v53  ;;  %v3067_v53 = vmul.f32 %v5567_v13, %v2293_v59 }
 0x3b0   :  { %v2277_v58 = vadd.f32 %v2276_v51, %v2244_v4  ;;  %v2070_v30 = vpop.permute.xlu1 %2069 }
 0x3b1   :  { %v2245_v61 = vunpack.c.l.bf16 %v2213_v25  ;;  %v2215_v1 = vmul.bf16 %v3327_v17, %v2070_v30  ;;  %v3131_v13 = vrot.slane %v3067_v53, 6 }
 0x3b2   :  { %v2278_v36 = vrot.slane %v2277_v58, 2 }
 0x3b3   :  { %v2282_v5 = vrot.slane %v2245_v61, 4  ;;  %v2247_v27 = vunpack.c.l.bf16 %v2215_v1  ;;  %v6122_v1 = vld [vmem:[#allocation12_spill] sm:$0xff] }
 0x3b4   :  { %v2279_v38 = vadd.f32 %v2278_v36, %v2277_v58  ;;  %v3334_v34 = vpack.c.bf16 %v6122_v1, %v6122_v1  ;;  %v6123_v36 = vld [vmem:[#allocation13_spill] sm:$0xff] }
 0x3b5   :  { %v2283_v10 = vadd.f32 %v2282_v5, %v2245_v61  ;;  %v2294_v23 = vrot.slane %v2247_v27, 4  ;;  %v3329_v5 = vpack.c.bf16 %v6123_v36, %v6123_v36  ;;  %v6126_v36 = vld [vmem:[#allocation14_spill] sm:$0xff] }
 0x3b6   :  { %v2280_v54 = vrot.slane %v2279_v38, 1 }
 0x3b7   :  { %v2284_v49 = vrot.slane %v2283_v10, 2  ;;  %v2295_v52 = vadd.f32 %v2294_v23, %v2247_v27  ;;  %v2085_v8 = vpop.permute.xlu0 %2084 }
 0x3b8   :  { %v2281_v50 = vadd.f32 %v2280_v54, %v2279_v38  ;;  %v2218_v40 = vmul.bf16 %v3330_v11, %v2085_v8 }
 0x3b9   :  { %v2285_v45 = vadd.f32 %v2284_v49, %v2283_v10  ;;  %v2296_v31 = vrot.slane %v2295_v52, 2 }
 0x3ba   :  { %v3065_v29 = vmul.f32 %v5549_v42, %v2281_v50  ;;  %v2250_v46 = vunpack.c.l.bf16 %v2218_v40  ;;  %v6124_v40 = vld [vmem:[#allocation15_spill] sm:$0xff] }
 0x3bb   :  { %v2286_v35 = vrot.slane %v2285_v45, 1  ;;  %v2297_v19 = vadd.f32 %v2296_v31, %v2295_v52  ;;  %v2075_v47 = vpop.permute.xlu0 %2074 }
 0x3bc   :  { %v2312_v4 = vrot.slane %v2250_v46, 4  ;;  %v2216_v0 = vmul.bf16 %v3328_v63, %v2075_v47 }
 0x3bd   :  { %v2287_v41 = vadd.f32 %v2286_v35, %v2285_v45  ;;  %v2298_v12 = vrot.slane %v2297_v19, 1  ;;  %v3335_v45 = vpack.c.bf16 %v6124_v40, %v6124_v40 }
 0x3be   :  { %v2090_v51 = vpop.permute.xlu1 %2089  ;;  %v2313_v60 = vadd.f32 %v2312_v4, %v2250_v46  ;;  %v2248_v17 = vunpack.c.l.bf16 %v2216_v0 }
 0x3bf   :  { %v2219_v25 = vmul.bf16 %v3331_v9, %v2090_v51  ;;  %v3066_v58 = vmul.f32 %v5511_v43, %v2287_v41  ;;  %v2299_v42 = vadd.f32 %v2298_v12, %v2297_v19  ;;  %v2105_v10 = vpop.permute.xlu0 %2104 }
 0x3c0   :  { %v2300_v30 = vrot.slane %v2248_v17, 4  ;;  %v2314_v62 = vrot.slane %v2313_v60, 2  ;;  %v2222_v50 = vmul.bf16 %v3334_v34, %v2105_v10 }
 0x3c1   :  { %v2251_v61 = vunpack.c.l.bf16 %v2219_v25  ;;  %v3129_v27 = vrot.slane %v3066_v58, 7  ;;  %v3068_v38 = vmul.f32 %v5535_v37, %v2299_v42 }
 0x3c2   :  { %v2080_v23 = vpop.permute.xlu1 %2079  ;;  %v2301_v11 = vadd.f32 %v2300_v30, %v2248_v17  ;;  %v2315_v46 = vadd.f32 %v2314_v62, %v2313_v60  ;;  %v2254_v9 = vunpack.c.l.bf16 %v2222_v50  ;;  %v6127_v50 = vld [vmem:[#allocation16_spill] sm:$0xff] }
 0x3c3   :  { %v2318_v39 = vrot.slane %v2251_v61, 4  ;;  %v3130_v43 = vsel %vm2718_vm15, %v3129_v27, %v3065_v29  ;;  %v3133_v54 = vrot.slane %v3068_v38, 5  ;;  %v2217_v49 = vmul.bf16 %v3329_v5, %v2080_v23 }
 0x3c4   :  { %v3132_v52 = vsel %vm2721_vm3, %v3131_v13, %v3130_v43  ;;  %v2302_v31 = vrot.slane %v2301_v11, 2  ;;  %v2316_v53 = vrot.slane %v2315_v46, 1  ;;  %v2336_v30 = vrot.slane %v2254_v9, 4 }
 0x3c5   :  { %v2319_v8 = vadd.f32 %v2318_v39, %v2251_v61  ;;  %v3134_v37 = vsel %vm6125_vm4, %v3133_v54, %v3132_v52  ;;  %v2249_v20 = vunpack.c.l.bf16 %v2217_v49  ;;  %v3332_v5 = vpack.c.bf16 %v6126_v36, %v6126_v36 }
 0x3c6   :  { %v2110_v63 = vpop.permute.xlu1 %2109  ;;  %v3186_v59 = vsel %vm3185_vm0, %v3134_v37, 0.0  ;;  %v2303_v41 = vadd.f32 %v2302_v31, %v2301_v11  ;;  %v2317_v27 = vadd.f32 %v2316_v53, %v2315_v46  ;;  %v2337_v39 = vadd.f32 %v2336_v30, %v2254_v9 }
 0x3c7   :  { %v2320_v35 = vrot.slane %v2319_v8, 2  ;;  %v3187_v29 = vrot.slane %v3186_v59, 4  ;;  %v2306_v19 = vrot.slane %v2249_v20, 4  ;;  %v2223_v47 = vmul.bf16 %v3335_v45, %v2110_v63  ;;  %v6128_v45 = vld [vmem:[#allocation20_spill] sm:$0xff] }
 0x3c8   :  { %v2304_v1 = vrot.slane %v2303_v41, 1  ;;  %v3333_v40 = vpack.c.bf16 %v6127_v50, %v6127_v50  ;;  %v3342_v37 = vpack.c.bf16 %v6128_v45, %v6128_v45  ;;  %v3071_v31 = vmul.f32 %v5587_v6, %v2317_v27 }
 0x3c9   :  { %v2321_v15 = vadd.f32 %v2320_v35, %v2319_v8  ;;  %v2145_v4 = vpop.permute.xlu0 %2144  ;;  %v3188_v0 = vadd.f32 %v3187_v29, %v3186_v59  ;;  %v2307_v12 = vadd.f32 %v2306_v19, %v2249_v20  ;;  %v2255_v51 = vunpack.c.l.bf16 %v2223_v47 }
 0x3ca   :  { %v2305_v49 = vadd.f32 %v2304_v1, %v2303_v41  ;;  %v2338_v29 = vrot.slane %v2337_v39, 2  ;;  %v2230_v19 = vmul.bf16 %v3342_v37, %v2145_v4  ;;  %v6131_v37 = vld [vmem:[#allocation24_spill] sm:$0xff] }
 0x3cb   :  { %v3189_v17 = vrot.slane %v3188_v0, 2  ;;  %v2322_v25 = vrot.slane %v2321_v15, 1  ;;  %v2308_v58 = vrot.slane %v2307_v12, 2  ;;  %v2342_v42 = vrot.slane %v2255_v51, 4 }
 0x3cc   :  { %v2262_v4 = vunpack.c.l.bf16 %v2230_v19 }
 0x3cd   :  { %v3190_v61 = vadd.f32 %v3189_v17, %v3188_v0  ;;  %v2309_v60 = vadd.f32 %v2308_v58, %v2307_v12  ;;  %v2343_v34 = vadd.f32 %v2342_v42, %v2255_v51  ;;  %v2323_v23 = vadd.f32 %v2322_v25, %v2321_v15 }
 0x3ce   :  { %v3069_v0 = vmul.f32 %v5581_v33, %v2305_v49  ;;  %v3137_v51 = vrot.slane %v3071_v31, 6  ;;  %v3341_v31 = vpack.c.bf16 %v6131_v37, %v6131_v37  ;;  %v6142_v37 = vld [vmem:[#allocation29_spill] sm:$0xff] }
 0x3cf   :  { %v3191_v10 = vrot.slane %v3190_v61, 1  ;;  %v2310_v13 = vrot.slane %v2309_v60, 1  ;;  %v2344_v62 = vrot.slane %v2343_v34, 2  ;;  %v3072_v63 = vmul.f32 %v5560_v14, %v2323_v23 }
 0x3d1   :  { %v2095_v38 = vpop.permute.xlu0 %2094  ;;  %v3192_v54 = vadd.f32 %v3191_v10, %v3190_v61  ;;  %v2311_v52 = vadd.f32 %v2310_v13, %v2309_v60  ;;  %v2345_v8 = vadd.f32 %v2344_v62, %v2343_v34  ;;  %v3139_v17 = vrot.slane %v3072_v63, 5  ;;  %v6130_v60 = vld [vmem:[#allocation17_spill] sm:$0xff] }
 0x3d2   :  { %v5670_v11 = vpop.permute.xlu1 %2149  ;;  %v2220_v43 = vmul.bf16 %v3332_v5, %v2095_v38  ;;  %v3338_v34 = vpack.c.bf16 %v6130_v60, %v6130_v60 }
 0x3d3   :  { %3242 = vst [vmem:[#allocation2] sm:$0x1] %v3192_v54  ;;  %v3070_v59 = vmul.f32 %v5546_v32, %v2311_v52  ;;  %v2346_v46 = vrot.slane %v2345_v8, 1  ;;  %v2339_v32 = vadd.f32 %v2338_v29, %v2337_v39 }
 0x3d4   :  { %v2252_v20 = vunpack.c.l.bf16 %v2220_v43 }
 0x3d5   :  { %v2135_v15 = vpop.permute.xlu0 %2134  ;;  %v3135_v41 = vrot.slane %v3070_v59, 7  ;;  %v2347_v12 = vadd.f32 %v2346_v46, %v2345_v8  ;;  %v2340_v38 = vrot.slane %v2339_v32, 1  ;;  %v6132_v46 = vld [vmem:[#allocation18_spill] sm:$0xff] }
 0x3d6   :  { %v2100_v35 = vpop.permute.xlu1 %2099  ;;  %v2324_v47 = vrot.slane %v2252_v20, 4 }
 0x3d7   :  { %v2221_v9 = vmul.bf16 %v3333_v40, %v2100_v35  ;;  %v3136_v25 = vsel %vm2718_vm15, %v3135_v41, %v3069_v0  ;;  %v5682_v14 = vmul.f32 %v5620_v28, %v2347_v12  ;;  %v2384_v28 = vrot.slane %v2262_v4, 4  ;;  %v6133_v0 = vld [vmem:[#allocation23_spill] sm:$0xff] }
 0x3d8   :  { %v2325_v53 = vadd.f32 %v2324_v47, %v2252_v20  ;;  %v3138_v58 = vsel %vm2721_vm3, %v3137_v51, %v3136_v25  ;;  %v2341_v49 = vadd.f32 %v2340_v38, %v2339_v32  ;;  %v3336_v35 = vpack.c.bf16 %v6132_v46, %v6132_v46  ;;  %v6135_v25 = vld [vmem:[#allocation22_spill] sm:$0xff] }
 0x3d9   :  { %v2253_v6 = vunpack.c.l.bf16 %v2221_v9  ;;  %v3140_v30 = vsel %vm6129_vm2, %v3139_v17, %v3138_v58  ;;  %v2125_v1 = vpop.permute.xlu0 %2124  ;;  %v2385_v52 = vadd.f32 %v2384_v28, %v2262_v4  ;;  %v3343_v41 = vpack.c.bf16 %v6133_v0, %v6133_v0  ;;  %v6136_v58 = vld [vmem:[#allocation25_spill] sm:$0xff]  ;;  %v6143_v46 = vld [vmem:[#allocation30_spill] sm:$0xff] }
 0x3da   :  { %v2326_v42 = vrot.slane %v2325_v53, 2  ;;  %v3193_v33 = vsel %vm3185_vm0, %v3140_v30, 0.0  ;;  %v2226_v13 = vmul.bf16 %v3338_v34, %v2125_v1  ;;  %v3075_v29 = vmul.f32 %v5599_v22, %v2341_v49  ;;  %v6137_v28 = vld [vmem:[#allocation21_spill] sm:$0xff] }
 0x3db   :  { %v2330_v61 = vrot.slane %v2253_v6, 4  ;;  %v3194_v36 = vrot.slane %v3193_v33, 4  ;;  %v2386_v19 = vrot.slane %v2385_v52, 2  ;;  %v3340_v32 = vpack.c.bf16 %v6135_v25, %v6135_v25 }
 0x3dc   :  { %v2327_v5 = vadd.f32 %v2326_v42, %v2325_v53  ;;  %v2258_v40 = vunpack.c.l.bf16 %v2226_v13  ;;  %v3346_v4 = vpack.c.bf16 %v6136_v58, %v6136_v58  ;;  %v2231_v30 = vmul.bf16 %v3343_v41, %v5670_v11  ;;  %v6145_v41 = vld [vmem:[#allocation32_spill] sm:$0xff] }
 0x3dd   :  { %v2331_v27 = vadd.f32 %v2330_v61, %v2253_v6  ;;  %v3195_v10 = vadd.f32 %v3194_v36, %v3193_v33  ;;  %v6134_v6 = vld [vmem:[#allocation19_spill] sm:$0xff]  ;;  %v3143_v1 = vrot.slane %v3075_v29, 6  ;;  %v2228_v60 = vmul.bf16 %v3340_v32, %v2135_v15  ;;  %v6147_v32 = vld [vmem:[#allocation34_spill] sm:$0xff] }
 0x3de   :  { %v2328_v43 = vrot.slane %v2327_v5, 1  ;;  %v2360_v53 = vrot.slane %v2258_v40, 4  ;;  %v3339_v17 = vpack.c.bf16 %v6134_v6, %v6134_v6  ;;  %v3145_v36 = vrot.slane %v5682_v14, 5  ;;  %v6144_v29 = vld [vmem:[#allocation31_spill] sm:$0xff] }
 0x3df   :  { %v2332_v23 = vrot.slane %v2331_v27, 2  ;;  %v3196_v39 = vrot.slane %v3195_v10, 2  ;;  %v3352_v58 = vpack.c.bf16 %v6147_v32, %v6147_v32 }
 0x3e0   :  { %v2329_v63 = vadd.f32 %v2328_v43, %v2327_v5  ;;  %v6140_v43 = vld [vmem:[#allocation28_spill] sm:$0xff] }
 0x3e1   :  { %v2140_v62 = vpop.permute.xlu1 %2139  ;;  %v2333_v54 = vadd.f32 %v2332_v23, %v2331_v27  ;;  %v3197_v8 = vadd.f32 %v3196_v39, %v3195_v10  ;;  %v2361_v27 = vadd.f32 %v2360_v53, %v2258_v40  ;;  %v3337_v10 = vpack.c.bf16 %v6137_v28, %v6137_v28  ;;  %v6138_v23 = vld [vmem:[#allocation26_spill] sm:$0xff]  ;;  %v6139_v39 = vld [vmem:[#allocation27_spill] sm:$0xff] }
 0x3e2   :  { %v2229_v47 = vmul.bf16 %v3341_v31, %v2140_v62  ;;  %v3073_v42 = vmul.f32 %v5594_v24, %v2329_v63  ;;  %v3344_v24 = vpack.c.bf16 %v6138_v23, %v6138_v23  ;;  %v3347_v15 = vpack.c.bf16 %v6139_v39, %v6139_v39  ;;  %v6149_v23 = vld [vmem:[#allocation36_spill] sm:$0xff] }
 0x3e3   :  { %v2334_v50 = vrot.slane %v2333_v54, 1  ;;  %v3198_v20 = vrot.slane %v3197_v8, 1  ;;  %v3345_v14 = vpack.c.bf16 %v6140_v43, %v6140_v43  ;;  %v3350_v31 = vpack.c.bf16 %v6142_v37, %v6142_v37 }
 0x3e4   :  { %v2261_v34 = vunpack.c.l.bf16 %v2229_v47  ;;  %v2362_v63 = vrot.slane %v2361_v27, 2 }
 0x3e5   :  { %v2165_v45 = vpop.permute.xlu0 %2164  ;;  %v2335_v59 = vadd.f32 %v2334_v50, %v2333_v54  ;;  %v3199_v12 = vadd.f32 %v3198_v20, %v3197_v8  ;;  %v2260_v8 = vunpack.c.l.bf16 %v2228_v60 }
 0x3e6   :  { %v2234_v13 = vmul.bf16 %v3346_v4, %v2165_v45  ;;  %v2378_v40 = vrot.slane %v2261_v34, 4 }
 0x3e7   :  { %v2130_v9 = vpop.permute.xlu1 %2129  ;;  %v3074_v51 = vmul.f32 %v5579_v44, %v2335_v59  ;;  %3243 = vst [vmem:[#allocation2 + $0x1] sm:$0x1] %v3199_v12  ;;  %v2387_v44 = vadd.f32 %v2386_v19, %v2385_v52  ;;  %v2263_v52 = vunpack.c.l.bf16 %v2231_v30  ;;  %v3351_v19 = vpack.c.bf16 %v6144_v29, %v6144_v29 }
 0x3e8   :  { %v2266_v47 = vunpack.c.l.bf16 %v2234_v13  ;;  %v2227_v0 = vmul.bf16 %v3339_v17, %v2130_v9  ;;  %v3349_v12 = vpack.c.bf16 %v6145_v41, %v6145_v41  ;;  %v6148_v9 = vld [vmem:[#allocation35_spill] sm:$0xff] }
 0x3e9   :  { %v3141_v61 = vrot.slane %v3074_v51, 7  ;;  %v2388_v45 = vrot.slane %v2387_v44, 1  ;;  %v6146_v51 = vld [vmem:[#allocation33_spill] sm:$0xff]  ;;  %v2390_v4 = vrot.slane %v2263_v52, 4  ;;  %v3355_v17 = vpack.c.bf16 %v6148_v9, %v6148_v9 }
 0x3ea   :  { %v2115_v22 = vpop.permute.xlu0 %2114  ;;  %v3354_v53 = vpack.c.bf16 %v6146_v51, %v6146_v51 }
 0x3eb   :  { %v2224_v33 = vmul.bf16 %v3336_v35, %v2115_v22  ;;  %v3142_v5 = vsel %vm2718_vm15, %v3141_v61, %v3073_v42  ;;  %v3348_v35 = vpack.c.bf16 %v6143_v46, %v6143_v46  ;;  %v2372_v22 = vrot.slane %v2260_v8, 4 }
 0x3ec   :  { %v3144_v11 = vsel %vm2721_vm3, %v3143_v1, %v3142_v5  ;;  %v5712_v62 = vpop.permute.xlu1 %2169  ;;  %v2379_v42 = vadd.f32 %v2378_v40, %v2261_v34  ;;  %v2389_v61 = vadd.f32 %v2388_v45, %v2387_v44  ;;  %v2363_v1 = vadd.f32 %v2362_v63, %v2361_v27 }
 0x3ed   :  { %v2256_v38 = vunpack.c.l.bf16 %v2224_v33  ;;  %v3146_v54 = vsel %vm6141_vm8, %v3145_v36, %v3144_v11  ;;  %v2408_v36 = vrot.slane %v2266_v47, 4  ;;  %v2259_v5 = vunpack.c.l.bf16 %v2227_v0 }
 0x3ee   :  { %v3200_v50 = vsel %vm3185_vm0, %v3146_v54, 0.0  ;;  %v2155_v59 = vpop.permute.xlu0 %2154  ;;  %v2391_v54 = vadd.f32 %v2390_v4, %v2263_v52  ;;  %v2373_v34 = vadd.f32 %v2372_v22, %v2260_v8  ;;  %v5737_v27 = vmul.f32 %v5602_v26, %v2389_v61 }
 0x3ef   :  { %v2348_v49 = vrot.slane %v2256_v38, 4  ;;  %v3201_v20 = vrot.slane %v3200_v50, 4  ;;  %v2232_v28 = vmul.bf16 %v3344_v24, %v2155_v59  ;;  %v2409_v37 = vadd.f32 %v2408_v36, %v2266_v47 }
 0x3f0   :  { %v2366_v45 = vrot.slane %v2259_v5, 4  ;;  %v2374_v52 = vrot.slane %v2373_v34, 2  ;;  %v2235_v26 = vmul.bf16 %v3347_v15, %v5712_v62 }
 0x3f1   :  { %v3202_v6 = vadd.f32 %v3201_v20, %v3200_v50  ;;  %v2349_v25 = vadd.f32 %v2348_v49, %v2256_v38  ;;  %v3353_v38 = vpack.c.bf16 %v6149_v23, %v6149_v23  ;;  %v2380_v49 = vrot.slane %v2379_v42, 2 }
 0x3f2   :  { %v2364_v50 = vrot.slane %v2363_v1, 1  ;;  %v2264_v24 = vunpack.c.l.bf16 %v2232_v28 }
 0x3f3   :  { %v3203_v33 = vrot.slane %v3202_v6, 2  ;;  %v2350_v13 = vrot.slane %v2349_v25, 2  ;;  %v2381_v8 = vadd.f32 %v2380_v49, %v2379_v42  ;;  %v2375_v49 = vadd.f32 %v2374_v52, %v2373_v34 }
 0x3f4   :  { %v2120_v30 = vpop.permute.xlu1 %2119  ;;  %v2365_v47 = vadd.f32 %v2364_v50, %v2363_v1  ;;  %v2396_v36 = vrot.slane %v2264_v24, 4 }
 0x3f5   :  { %v2225_v60 = vmul.bf16 %v3337_v10, %v2120_v30  ;;  %v3204_v11 = vadd.f32 %v3203_v33, %v3202_v6  ;;  %v2351_v46 = vadd.f32 %v2350_v13, %v2349_v25  ;;  %v2392_v30 = vrot.slane %v2391_v54, 2 }
 0x3f6   :  { %v2410_v33 = vrot.slane %v2409_v37, 2  ;;  %v3079_v1 = vmul.f32 %v5624_v16, %v2365_v47 }
 0x3f7   :  { %v2257_v39 = vunpack.c.l.bf16 %v2225_v60  ;;  %v3205_v10 = vrot.slane %v3204_v11, 1  ;;  %v2367_v60 = vadd.f32 %v2366_v45, %v2259_v5  ;;  %v2352_v25 = vrot.slane %v2351_v46, 1 }
 0x3f8   :  { %v2185_v43 = vpop.permute.xlu0 %2184  ;;  %v2411_v50 = vadd.f32 %v2410_v33, %v2409_v37  ;;  %v2397_v45 = vadd.f32 %v2396_v36, %v2264_v24  ;;  %v2376_v24 = vrot.slane %v2375_v49, 1 }
 0x3f9   :  { %v2238_v44 = vmul.bf16 %v3350_v31, %v2185_v43  ;;  %v2354_v40 = vrot.slane %v2257_v39, 4  ;;  %v3206_v59 = vadd.f32 %v3205_v10, %v3204_v11  ;;  %v3155_v31 = vrot.slane %v5737_v27, 6 }
 0x3fa   :  { %v2382_v43 = vrot.slane %v2381_v8, 1  ;;  %v2267_v10 = vunpack.c.l.bf16 %v2235_v26  ;;  %v2368_v5 = vrot.slane %v2367_v60, 2  ;;  %v2398_v52 = vrot.slane %v2397_v45, 2 }
 0x3fb   :  { %v2270_v20 = vunpack.c.l.bf16 %v2238_v44  ;;  %v2160_v63 = vpop.permute.xlu1 %2159  ;;  %v2355_v0 = vadd.f32 %v2354_v40, %v2257_v39  ;;  %3244 = vst [vmem:[#allocation2 + $0x2] sm:$0x1] %v3206_v59  ;;  %v5741_v44 = vadd.f32 %v2392_v30, %v2391_v54  ;;  %v2353_v59 = vadd.f32 %v2352_v25, %v2351_v46 }
 0x3fc   :  { %v2233_v6 = vmul.bf16 %v3345_v14, %v2160_v63  ;;  %v3149_v30 = vrot.slane %v3079_v1, 6  ;;  %v2412_v46 = vrot.slane %v2411_v50, 1  ;;  %v2369_v47 = vadd.f32 %v2368_v5, %v2367_v60 }
 0x3fd   :  { %v2432_v4 = vrot.slane %v2270_v20, 4  ;;  %v2356_v22 = vrot.slane %v2355_v0, 2 }
 0x3fe   :  { %v2265_v61 = vunpack.c.l.bf16 %v2233_v6  ;;  %v2370_v1 = vrot.slane %v2369_v47, 1 }
 0x3ff   :  { %v2175_v28 = vpop.permute.xlu0 %2174  ;;  %v2190_v11 = vpop.permute.xlu1 %2189  ;;  %v2357_v13 = vadd.f32 %v2356_v22, %v2355_v0  ;;  %v2433_v42 = vadd.f32 %v2432_v4, %v2270_v20  ;;  %v2414_v20 = vrot.slane %v2267_v10, 4 }
 0x400   :  { %v2402_v14 = vrot.slane %v2265_v61, 4  ;;  %v2236_v39 = vmul.bf16 %v3348_v35, %v2175_v28  ;;  %v2383_v35 = vadd.f32 %v2382_v43, %v2381_v8  ;;  %v2239_v54 = vmul.bf16 %v3351_v19, %v2190_v11 }
 0x401   :  { %v2358_v40 = vrot.slane %v2357_v13, 1  ;;  %v2434_v28 = vrot.slane %v2433_v42, 2  ;;  %v3077_v8 = vmul.f32 %v5642_v55, %v2353_v59  ;;  %v2415_v36 = vadd.f32 %v2414_v20, %v2267_v10 }
 0x402   :  { %v2403_v62 = vadd.f32 %v2402_v14, %v2265_v61  ;;  %v2268_v15 = vunpack.c.l.bf16 %v2236_v39  ;;  %v3082_v29 = vmul.f32 %v5605_v56, %v2383_v35  ;;  %v2271_v33 = vunpack.c.l.bf16 %v2239_v54 }
 0x403   :  { %v2180_v63 = vpop.permute.xlu1 %2179  ;;  %v2359_v6 = vadd.f32 %v2358_v40, %v2357_v13  ;;  %v2435_v19 = vadd.f32 %v2434_v28, %v2433_v42  ;;  %v2413_v13 = vadd.f32 %v2412_v46, %v2411_v50  ;;  %v2399_v55 = vadd.f32 %v2398_v52, %v2397_v45 }
 0x404   :  { %v2404_v0 = vrot.slane %v2403_v62, 2  ;;  %v2420_v22 = vrot.slane %v2268_v15, 4  ;;  %v2237_v34 = vmul.bf16 %v3349_v12, %v2180_v63  ;;  %v2377_v43 = vadd.f32 %v2376_v24, %v2375_v49 }
 0x405   :  { %v3078_v16 = vmul.f32 %v5585_v7, %v2359_v6  ;;  %v2394_v42 = vrot.slane %v5741_v44, 1  ;;  %v2436_v40 = vrot.slane %v2435_v19, 1  ;;  %v2438_v10 = vrot.slane %v2271_v33, 4 }
 0x406   :  { %v2405_v37 = vadd.f32 %v2404_v0, %v2403_v62  ;;  %v2269_v4 = vunpack.c.l.bf16 %v2237_v34  ;;  %v2421_v61 = vadd.f32 %v2420_v22, %v2268_v15  ;;  %v2416_v51 = vrot.slane %v2415_v36, 2 }
 0x407   :  { %v3147_v26 = vrot.slane %v3078_v16, 7  ;;  %v3087_v45 = vmul.f32 %v5632_v3, %v2413_v13  ;;  %v3153_v59 = vrot.slane %v3082_v29, 7  ;;  %v2400_v49 = vrot.slane %v2399_v55, 1 }
 0x408   :  { %v2205_v41 = vpop.permute.xlu0 %2204  ;;  %v2426_v12 = vrot.slane %v2269_v4, 4  ;;  %v2406_v11 = vrot.slane %v2405_v37, 1  ;;  %v2422_v60 = vrot.slane %v2421_v61, 2  ;;  %v2437_v54 = vadd.f32 %v2436_v40, %v2435_v19 }
 0x409   :  { %v2242_v7 = vmul.bf16 %v3354_v53, %v2205_v41  ;;  %v3148_v25 = vsel %vm2718_vm15, %v3147_v26, %v3077_v8  ;;  %v2439_v34 = vadd.f32 %v2438_v10, %v2271_v33  ;;  %v2401_v52 = vadd.f32 %v2400_v49, %v2399_v55 }
 0x40a   :  { %v2427_v14 = vadd.f32 %v2426_v12, %v2269_v4  ;;  %v5758_v39 = vsel %vm2721_vm3, %v3149_v30, %v3148_v25  ;;  %v2407_v53 = vadd.f32 %v2406_v11, %v2405_v37  ;;  %v2423_v28 = vadd.f32 %v2422_v60, %v2421_v61 }
 0x40b   :  { %v2274_v56 = vunpack.c.l.bf16 %v2242_v7  ;;  %v2371_v37 = vadd.f32 %v2370_v1, %v2369_v47  ;;  %v2417_v8 = vadd.f32 %v2416_v51, %v2415_v36  ;;  %v3161_v29 = vrot.slane %v3087_v45, 6 }
 0x40c   :  { %v2428_v62 = vrot.slane %v2427_v14, 2  ;;  %v3086_v32 = vmul.f32 %v5592_v57, %v2407_v53  ;;  %v2424_v61 = vrot.slane %v2423_v28, 1  ;;  %v3091_v41 = vmul.f32 %v5610_v21, %v2437_v54 }
 0x40d   :  { %v2195_v15 = vpop.permute.xlu0 %2194  ;;  %v2456_v5 = vrot.slane %v2274_v56, 4  ;;  %v2440_v12 = vrot.slane %v2439_v34, 2  ;;  %v2418_v21 = vrot.slane %v2417_v8, 1 }
 0x40e   :  { %v2240_v50 = vmul.bf16 %v3352_v58, %v2195_v15  ;;  %v2429_v63 = vadd.f32 %v2428_v62, %v2427_v14  ;;  %v3159_v11 = vrot.slane %v3086_v32, 7  ;;  %v2425_v27 = vadd.f32 %v2424_v61, %v2423_v28 }
 0x40f   :  { %v2457_v0 = vadd.f32 %v2456_v5, %v2274_v56  ;;  %v3167_v40 = vrot.slane %v3091_v41, 6  ;;  %v2441_v15 = vadd.f32 %v2440_v12, %v2439_v34 }
 0x410   :  { %v2210_v6 = vpop.permute.xlu1 %2209  ;;  %v2272_v22 = vunpack.c.l.bf16 %v2240_v50  ;;  %v2430_v20 = vrot.slane %v2429_v63, 1 }
 0x411   :  { %v2243_v35 = vmul.bf16 %v3355_v17, %v2210_v6  ;;  %v2988_v16 = vpop.permute.xlu0 %2987  ;;  %v2458_v30 = vrot.slane %v2457_v0, 2 }
 0x412   :  { %v2444_v58 = vrot.slane %v2272_v22, 4  ;;  %v3081_v3 = vmul.f32 %v2988_v16, %v2377_v43  ;;  %v2431_v46 = vadd.f32 %v2430_v20, %v2429_v63 }
 0x413   :  { %v2275_v24 = vunpack.c.l.bf16 %v2243_v35  ;;  %v2459_v7 = vadd.f32 %v2458_v30, %v2457_v0  ;;  %v2442_v35 = vrot.slane %v2441_v15, 1 }
 0x414   :  { %v2200_v4 = vpop.permute.xlu1 %2199  ;;  %v2445_v26 = vadd.f32 %v2444_v58, %v2272_v22  ;;  %v3154_v9 = vsel %vm2718_vm15, %v3153_v59, %v3081_v3  ;;  %v3090_v19 = vmul.f32 %v5614_v18, %v2431_v46  ;;  %v2419_v22 = vadd.f32 %v2418_v21, %v2417_v8 }
 0x415   :  { %v2462_v17 = vrot.slane %v2275_v24, 4  ;;  %v3156_v57 = vsel %vm2721_vm3, %v3155_v31, %v3154_v9  ;;  %v3008_v47 = vpop.permute.xlu0 %3007  ;;  %v2241_v33 = vmul.bf16 %v3353_v38, %v2200_v4  ;;  %v2395_v38 = vadd.f32 %v2394_v42, %v5741_v44 }
 0x416   :  { %v3085_v36 = vmul.f32 %v3008_v47, %v2401_v52  ;;  %v2446_v25 = vrot.slane %v2445_v26, 2  ;;  %v3165_v60 = vrot.slane %v3090_v19, 7  ;;  %v2460_v1 = vrot.slane %v2459_v7, 1 }
 0x417   :  { %v2463_v13 = vadd.f32 %v2462_v17, %v2275_v24  ;;  %v2273_v14 = vunpack.c.l.bf16 %v2241_v33  ;;  %v2443_v52 = vadd.f32 %v2442_v35, %v2441_v15 }
 0x418   :  { %v2983_v55 = vpop.permute.xlu1 %2982  ;;  %v3160_v18 = vsel %vm2718_vm15, %v3159_v11, %v3085_v36  ;;  %v2447_v5 = vadd.f32 %v2446_v25, %v2445_v26  ;;  %v2461_v28 = vadd.f32 %v2460_v1, %v2459_v7 }
 0x419   :  { %v3080_v31 = vmul.f32 %v2983_v55, %v2371_v37  ;;  %v3162_v56 = vsel %vm2721_vm3, %v3161_v29, %v3160_v18  ;;  %v2450_v43 = vrot.slane %v2273_v14, 4  ;;  %v3028_v23 = vpop.permute.xlu0 %3027  ;;  %v2464_v51 = vrot.slane %v2463_v13, 2 }
 0x41a   :  { %v3089_v10 = vmul.f32 %v3028_v23, %v2425_v27  ;;  %v2448_v34 = vrot.slane %v2447_v5, 1  ;;  %v3095_v4 = vmul.f32 %v5638_v48, %v2461_v28 }
 0x41b   :  { %v3151_v62 = vrot.slane %v3080_v31, 5  ;;  %v2451_v53 = vadd.f32 %v2450_v43, %v2273_v14  ;;  %v2465_v16 = vadd.f32 %v2464_v51, %v2463_v13 }
 0x41c   :  { %v3003_v50 = vpop.permute.xlu1 %3002  ;;  %v3166_v45 = vsel %vm2718_vm15, %v3165_v60, %v3089_v10  ;;  %v2449_v26 = vadd.f32 %v2448_v34, %v2447_v5  ;;  %v3173_v25 = vrot.slane %v3095_v4, 6 }
 0x41d   :  { %v3152_v63 = vsel %vm6150_vm6, %v3151_v62, %v5758_v39  ;;  %v3084_v59 = vmul.f32 %v3003_v50, %v2395_v38  ;;  %v2452_v6 = vrot.slane %v2451_v53, 2  ;;  %v3168_v49 = vsel %vm2721_vm3, %v3167_v40, %v3166_v45  ;;  %v3048_v29 = vpop.permute.xlu0 %3047 }
 0x41e   :  { %v3207_v44 = vsel %vm3185_vm0, %v3152_v63, 0.0  ;;  %v2466_v17 = vrot.slane %v2465_v16, 1  ;;  %v3093_v48 = vmul.f32 %v3048_v29, %v2449_v26 }
 0x41f   :  { %v3208_v42 = vrot.slane %v3207_v44, 4  ;;  %v3157_v0 = vrot.slane %v3084_v59, 5  ;;  %v2453_v54 = vadd.f32 %v2452_v6, %v2451_v53 }
 0x420   :  { %v3023_v20 = vpop.permute.xlu1 %3022  ;;  %v2467_v14 = vadd.f32 %v2466_v17, %v2465_v16 }
 0x421   :  { %v3209_v37 = vadd.f32 %v3208_v42, %v3207_v44  ;;  %v3158_v32 = vsel %vm6151_vm7, %v3157_v0, %v3156_v57  ;;  %v3088_v58 = vmul.f32 %v3023_v20, %v2419_v22  ;;  %v2454_v39 = vrot.slane %v2453_v54, 1 }
 0x422   :  { %v3214_v3 = vsel %vm3185_vm0, %v3158_v32, 0.0 }
 0x423   :  { %v3210_v24 = vrot.slane %v3209_v37, 2  ;;  %v3215_v30 = vrot.slane %v3214_v3, 4  ;;  %v3163_v46 = vrot.slane %v3088_v58, 5  ;;  %v2455_v8 = vadd.f32 %v2454_v39, %v2453_v54 }
 0x424   :  { %v3043_v9 = vpop.permute.xlu1 %3042 }
 0x425   :  { %v3211_v61 = vadd.f32 %v3210_v24, %v3209_v37  ;;  %v3216_v19 = vadd.f32 %v3215_v30, %v3214_v3  ;;  %v3164_v47 = vsel %vm6152_vm9, %v3163_v46, %v3162_v56  ;;  %v3092_v57 = vmul.f32 %v3043_v9, %v2443_v52 }
 0x426   :  { %v3094_v33 = vmul.f32 %v5596_v2, %v2455_v8  ;;  %v3221_v41 = vsel %vm3185_vm0, %v3164_v47, 0.0 }
 0x427   :  { %v3212_v12 = vrot.slane %v3211_v61, 1  ;;  %v3217_v36 = vrot.slane %v3216_v19, 2  ;;  %v3222_v11 = vrot.slane %v3221_v41, 4  ;;  %v3169_v7 = vrot.slane %v3092_v57, 5 }
 0x428   :  { %v3171_v13 = vrot.slane %v3094_v33, 7  ;;  %v3063_v55 = vpop.permute.xlu1 %3062 }
 0x429   :  { %v3213_v18 = vadd.f32 %v3212_v12, %v3211_v61  ;;  %v3218_v27 = vadd.f32 %v3217_v36, %v3216_v19  ;;  %v3223_v60 = vadd.f32 %v3222_v11, %v3221_v41  ;;  %v3170_v31 = vsel %vm6153_vm10, %v3169_v7, %v3168_v49 }
 0x42a   :  { %v3172_v56 = vsel %vm2718_vm15, %v3171_v13, %v3093_v48  ;;  %v3228_v2 = vsel %vm3185_vm0, %v3170_v31, 0.0  ;;  %v3096_v43 = vmul.f32 %v3063_v55, %v2467_v14 }
 0x42b   :  { %3245 = vst [vmem:[#allocation2 + $0x3] sm:$0x1] %v3213_v18  ;;  %v3174_v23 = vsel %vm2721_vm3, %v3173_v25, %v3172_v56  ;;  %v3219_v38 = vrot.slane %v3218_v27, 1  ;;  %v3224_v21 = vrot.slane %v3223_v60, 2  ;;  %v3229_v40 = vrot.slane %v3228_v2, 4 }
 0x42c   :  { %v3175_v10 = vrot.slane %v3096_v43, 5 }
 0x42d   :  { %v3220_v62 = vadd.f32 %v3219_v38, %v3218_v27  ;;  %v3225_v15 = vadd.f32 %v3224_v21, %v3223_v60  ;;  %v3230_v1 = vadd.f32 %v3229_v40, %v3228_v2 }
 0x42e   :  { %v3176_v51 = vsel %vm6154_vm12, %v3175_v10, %v3174_v23 }
 0x42f   :  { %3246 = vst [vmem:[#allocation2 + $0x4] sm:$0x1] %v3220_v62  ;;  %v3226_v53 = vrot.slane %v3225_v15, 1  ;;  %v3231_v5 = vrot.slane %v3230_v1, 2  ;;  %v3235_v50 = vsel %vm3185_vm0, %v3176_v51, 0.0 }
 0x430   :  { %v3236_v45 = vrot.slane %v3235_v50, 4 }
 0x431   :  { %v3227_v63 = vadd.f32 %v3226_v53, %v3225_v15  ;;  %v3232_v59 = vadd.f32 %v3231_v5, %v3230_v1 }
 0x432   :  { %v3237_v6 = vadd.f32 %v3236_v45, %v3235_v50 }
 0x433   :  { %3247 = vst [vmem:[#allocation2 + $0x5] sm:$0x1] %v3227_v63  ;;  %v3233_v49 = vrot.slane %v3232_v59, 1 }
 0x434   :  { %v3238_v44 = vrot.slane %v3237_v6, 2 }
 0x435   :  { %v3234_v42 = vadd.f32 %v3233_v49, %v3232_v59 }
 0x436   :  { %v3239_v0 = vadd.f32 %v3238_v44, %v3237_v6 }
 0x437   :  { %3248 = vst [vmem:[#allocation2 + $0x6] sm:$0x1] %v3234_v42 }
 0x438   :  { %v3240_v22 = vrot.slane %v3239_v0, 1 }
 0x43a   :  { %v3241_v35 = vadd.f32 %v3240_v22, %v3239_v0 }
 0x43c   :  { %3249 = vst [vmem:[#allocation2 + $0x7] sm:$0x1] %v3241_v35 }
 0x43d   :  { %3839 = shalt.err (!%p3836_p4)
}
 0x43e   :  { %s3854_s0 = smov 16   ;;  %s3855_s29 = smov 1  }
 0x43f   :  { %3261 = dma.vmem_to_hbm [thread:$0]  %s3256_s28, 128, %s5807_s6, [#allocation3], %s3854_s0, %s3854_s0, %s3855_s29  }
 0x440   :  { %3848 = dma.done.wait [#allocation3], 128  }
 0x441   :  { %3849 = vsyncadd [#allocation3], 4294967168 }
 0x442   :  { %3265 = vsyncpa [#allocation3], 1 }

</bundles_post_ra>
